<compile_context>
chip_gen: v6e
topology: v6e:2x2x1
jax: 0.10.0
libtpu: 0.0.40
codegen_flags: <defaults>
</compile_context>

<pallas_src>
import functools

import jax
import jax.numpy as jnp
from jax.experimental import pallas as pl
from jax.experimental.pallas import tpu as pltpu


def _round_up(x, m):
    return ((x + m - 1) // m) * m


# ---------------------------------------------------------------------------
# Pallas kernels
# ---------------------------------------------------------------------------
def _mm_k1_kernel(a_ref, b_ref, bias_ref, o_ref, *, relu):
    """Single-K-step matmul: o = act(a @ b + bias).  No accumulator needed."""
    r = jnp.dot(a_ref[...], b_ref[...], preferred_element_type=jnp.float32)
    r = r + bias_ref[...]                      # broadcast (cout,1) or (1,N)
    if relu:
        r = jnp.maximum(r, 0.0)
    o_ref[...] = r.astype(o_ref.dtype)


def _mm_multi_k_kernel(a_ref, b_ref, bias_ref, o_ref, acc_ref, *, relu):
    """K-tiled matmul with f32 accumulator; bias+act fused on the last step."""
    k = pl.program_id(0)

    @pl.when(k == 0)
    def _init():
        acc_ref[...] = jnp.zeros_like(acc_ref)

    acc_ref[...] += jnp.dot(a_ref[...], b_ref[...],
                            preferred_element_type=jnp.float32)

    @pl.when(k == pl.num_programs(0) - 1)
    def _finalize():
        r = acc_ref[...] + bias_ref[...]
        if relu:
            r = jnp.maximum(r, 0.0)
        o_ref[...] = r.astype(o_ref.dtype)


def _max4_kernel(a_ref, b_ref, c_ref, d_ref, o_ref):
    """Elementwise max of the four 2x2-pool window phases (lane-dense blocks)."""
    o_ref[...] = jnp.maximum(jnp.maximum(a_ref[...], b_ref[...]),
                             jnp.maximum(c_ref[...], d_ref[...]))


# ---------------------------------------------------------------------------
# Wrappers
# ---------------------------------------------------------------------------
def conv_matmul(w_mat, patches_t, bias_col, *, relu=True, tn=2048,
                out_dtype=jnp.bfloat16):
    """act(W(cout,K) @ P(K,S) + bias(cout,1)); S tiled on the lane axis."""
    cout, K = w_mat.shape
    _, S = patches_t.shape
    Sp = _round_up(S, tn)
    p = patches_t if Sp == S else jnp.pad(patches_t, ((0, 0), (0, Sp - S)))

    kernel = functools.partial(_mm_k1_kernel, relu=relu)
    out = pl.pallas_call(
        kernel,
        out_shape=jax.ShapeDtypeStruct((cout, Sp), out_dtype),
        grid_spec=pltpu.PrefetchScalarGridSpec(
            num_scalar_prefetch=0,
            grid=(Sp // tn,),
            in_specs=[
                pl.BlockSpec((cout, K), lambda j: (0, 0)),   # resident weight
                pl.BlockSpec((K, tn), lambda j: (0, j)),     # streamed patches
                pl.BlockSpec((cout, 1), lambda j: (0, 0)),   # resident bias
            ],
            out_specs=pl.BlockSpec((cout, tn), lambda j: (0, j)),
        ),
        compiler_params=pltpu.CompilerParams(
            dimension_semantics=("parallel",)),
    )(w_mat, p, bias_col)
    return out[:, :S]


def fc_single_k(x_pad, w_t, bias_row, *, relu, out_dtype):
    """act(x(Mp,K) @ Wt(K,N) + bias(1,N)) in one step (small K, full-dim blocks)."""
    Mp, K = x_pad.shape
    _, Nf = w_t.shape
    kernel = functools.partial(_mm_k1_kernel, relu=relu)
    return pl.pallas_call(
        kernel,
        out_shape=jax.ShapeDtypeStruct((Mp, Nf), out_dtype),
        grid_spec=pltpu.PrefetchScalarGridSpec(
            num_scalar_prefetch=0,
            grid=(1,),
            in_specs=[
                pl.BlockSpec((Mp, K), lambda i: (0, 0)),
                pl.BlockSpec((K, Nf), lambda i: (0, 0)),
                pl.BlockSpec((1, Nf), lambda i: (0, 0)),
            ],
            out_specs=pl.BlockSpec((Mp, Nf), lambda i: (0, 0)),
        ),
        compiler_params=pltpu.CompilerParams(
            dimension_semantics=("arbitrary",)),
    )(x_pad, w_t, bias_row)


def fc_multi_k(x_pad, w_t_pad, bias_row, *, relu, out_dtype, tk=2816):
    """Large-K FC layer: stream the (pre-padded) weight over a K grid."""
    Mp, Kp = x_pad.shape
    _, Nf = w_t_pad.shape
    assert Kp % tk == 0
    kernel = functools.partial(_mm_multi_k_kernel, relu=relu)
    return pl.pallas_call(
        kernel,
        out_shape=jax.ShapeDtypeStruct((Mp, Nf), out_dtype),
        grid_spec=pltpu.PrefetchScalarGridSpec(
            num_scalar_prefetch=0,
            grid=(Kp // tk,),
            in_specs=[
                pl.BlockSpec((Mp, tk), lambda k: (0, k)),
                pl.BlockSpec((tk, Nf), lambda k: (k, 0)),
                pl.BlockSpec((1, Nf), lambda k: (0, 0)),
            ],
            out_specs=pl.BlockSpec((Mp, Nf), lambda k: (0, 0)),
            scratch_shapes=[pltpu.VMEM((Mp, Nf), jnp.float32)],
        ),
        compiler_params=pltpu.CompilerParams(
            dimension_semantics=("arbitrary",)),
    )(x_pad, w_t_pad, bias_row)


def maxpool2x2_cmajor(x, *, lanes=1024, tile_rows=32):
    """2x2 / stride-2 max pool on a (C, N, H, W) tensor, lane-dense Pallas max."""
    C, N, H, W = x.shape
    Ho, Wo = H // 2, W // 2
    total = C * N * Ho * Wo
    rows = pl.cdiv(total, lanes)
    rows_p = _round_up(rows, tile_rows)
    padded = rows_p * lanes

    def prep(di, dj):
        ph = x[:, :, di::2, dj::2].reshape(-1)
        return jnp.pad(ph, (0, padded - total)).reshape(rows_p, lanes)

    a, b, c, d = prep(0, 0), prep(0, 1), prep(1, 0), prep(1, 1)
    out = pl.pallas_call(
        _max4_kernel,
        out_shape=jax.ShapeDtypeStruct((rows_p, lanes), x.dtype),
        grid=(rows_p // tile_rows,),
        in_specs=[pl.BlockSpec((tile_rows, lanes), lambda i: (i, 0))] * 4,
        out_specs=pl.BlockSpec((tile_rows, lanes), lambda i: (i, 0)),
        compiler_params=pltpu.CompilerParams(
            dimension_semantics=("parallel",)),
    )(a, b, c, d)
    return out.reshape(-1)[:total].reshape(C, N, Ho, Wo)


def _im2col_cmajor(x_cnhw, kh, kw):
    """(C,N,H,W) -> (C*kh*kw, N*Ho*Wo) patch matrix, rows ordered (c, i, j)."""
    C, N, H, W = x_cnhw.shape
    Ho, Wo = H - kh + 1, W - kw + 1
    taps = [x_cnhw[:, :, i:i + Ho, j:j + Wo]
            for i in range(kh) for j in range(kw)]
    p = jnp.stack(taps, axis=1)                  # (C, kh*kw, N, Ho, Wo)
    return p.reshape(C * kh * kw, N * Ho * Wo), (N, Ho, Wo)


def conv2d_relu_cmajor(x_cnhw, w_mat, bias_col, *, ksize=5, tn=2048):
    """Valid conv (stride 1), fused bias+ReLU, C-major in/out, bf16 activations."""
    patches, (N, Ho, Wo) = _im2col_cmajor(x_cnhw, ksize, ksize)
    y = conv_matmul(w_mat, patches, bias_col, relu=True, tn=tn)
    cout = w_mat.shape[0]
    return y.reshape(cout, N, Ho, Wo)


# ---------------------------------------------------------------------------
# Model
# ---------------------------------------------------------------------------
FC1_K = 16 * 53 * 53          # 44944
FC1_KP = _round_up(FC1_K, 128)  # 45056 (= 16 * 2816)


def init_params(key, num_classes=2):
    ks = jax.random.split(key, 10)
    s = 0.02
    w1 = jax.random.normal(ks[0], (6, 1, 5, 5), jnp.float32) * s
    b1 = jax.random.normal(ks[1], (6,), jnp.float32) * s
    w2 = jax.random.normal(ks[2], (16, 6, 5, 5), jnp.float32) * s
    b2 = jax.random.normal(ks[3], (16,), jnp.float32) * s
    fc1w = jax.random.normal(ks[4], (120, FC1_K), jnp.float32) * s
    fc1b = jax.random.normal(ks[5], (120,), jnp.float32) * s
    fc2w = jax.random.normal(ks[6], (60, 120), jnp.float32) * s
    fc2b = jax.random.normal(ks[7], (60,), jnp.float32) * s
    fc3w = jax.random.normal(ks[8], (num_classes, 60), jnp.float32) * s
    fc3b = jax.random.normal(ks[9], (num_classes,), jnp.float32) * s

    # Pre-reshape / pre-transpose / pre-pad / pre-cast once at init so the
    # forward path does no per-call weight transposes or pad copies.
    return {
        "w1m": w1.reshape(6, 25).astype(jnp.bfloat16),
        "b1": b1.reshape(6, 1),
        "w2m": w2.reshape(16, 150).astype(jnp.bfloat16),
        "b2": b2.reshape(16, 1),
        "fc1w_t": jnp.pad(fc1w.T, ((0, FC1_KP - FC1_K), (0, 0))
                          ).astype(jnp.bfloat16),          # (45056, 120)
        "fc1b": fc1b.reshape(1, -1),
        "fc2w_t": fc2w.T.astype(jnp.bfloat16),              # (120, 60)
        "fc2b": fc2b.reshape(1, -1),
        "fc3w_t": fc3w.T.astype(jnp.bfloat16),              # (60, num_classes)
        "fc3b": fc3b.reshape(1, -1),
    }


def net_forward(x, params):
    # x: (N, 1, 224, 224) float32, NCHW like PyTorch.
    N = x.shape[0]
    xc = x.astype(jnp.bfloat16).transpose(1, 0, 2, 3)        # (1, N, 224, 224)

    # conv1 -> relu -> pool : (1,N,224,224) -> (6,N,220,220) -> (6,N,110,110)
    a1 = conv2d_relu_cmajor(xc, params["w1m"], params["b1"])
    p1 = maxpool2x2_cmajor(a1)
    # conv2 -> relu -> pool : -> (16,N,106,106) -> (16,N,53,53)
    a2 = conv2d_relu_cmajor(p1, params["w2m"], params["b2"])
    p2 = maxpool2x2_cmajor(a2)

    # TODO(synk): Dropout2d(0.25) is identity in eval mode; no RNG mask applied.

    # Flatten in torch's view(-1, 16*53*53) order: per-sample (C, H, W).
    feat = p2.transpose(1, 0, 2, 3).reshape(N, FC1_K)        # (N, 44944) bf16
    Mp = _round_up(max(N, 1), 8)
    feat_p = jnp.pad(feat, ((0, Mp - N), (0, FC1_KP - FC1_K)))

    h1 = fc_multi_k(feat_p, params["fc1w_t"], params["fc1b"],
                    relu=True, out_dtype=jnp.bfloat16)       # (Mp, 120)
    h2 = fc_single_k(h1, params["fc2w_t"], params["fc2b"],
                     relu=True, out_dtype=jnp.bfloat16)      # (Mp, 60)
    h3 = fc_single_k(h2, params["fc3w_t"], params["fc3b"],
                     relu=False, out_dtype=jnp.float32)      # (Mp, num_classes)
    return h3[:N]


if __name__ == "__main__":
    key = jax.random.PRNGKey(0)
    k_x, k_p = jax.random.split(key)
    # batch=2, 1 channel, 224x224 — the spatial size implied by fc1 (16*53*53).
    x = jax.random.normal(k_x, (2, 1, 224, 224), jnp.float32)
    params = init_params(k_p, num_classes=2)

    forward = jax.jit(net_forward)
    out = forward(x, params)
    out = jax.block_until_ready(out)
    assert out.shape == (2, 2) and out.dtype == jnp.float32
    assert bool(jnp.all(jnp.isfinite(out)))
    print("KERNEL_OK")
</pallas_src>

<mosaic_0001>
module attributes {stable_mosaic.version = 11 : i64} {
  func.func @_mm_k1_kernel(%arg0: i32, %arg1: memref<6x25xbf16, #tpu.memory_space<vmem>>, %arg2: memref<25x2048xbf16, #tpu.memory_space<vmem>>, %arg3: memref<6x1xf32, #tpu.memory_space<vmem>>, %arg4: memref<6x2048xbf16, #tpu.memory_space<vmem>>) attributes {dimension_semantics = [#tpu.dimension_semantics<parallel>], iteration_bounds = array<i64: 48>, scalar_prefetch = 0 : i64, scratch_operands = 0 : i64, tpu.core_type = #tpu.core_type<tc>, window_params = [{pipeline_mode = #tpu.pipeline_mode<synchronous>, transform_indices = @transform_0, window_bounds = array<i64: 6, 25>}, {transform_indices = @transform_1, window_bounds = array<i64: 25, 2048>}, {pipeline_mode = #tpu.pipeline_mode<synchronous>, transform_indices = @transform_2, window_bounds = array<i64: 6, 1>}, {transform_indices = @transform_3, window_bounds = array<i64: 6, 2048>}]} {
    %c0 = arith.constant 0 : index
    %c0_0 = arith.constant 0 : index
    %0 = vector.load %arg1[%c0, %c0_0] : memref<6x25xbf16, #tpu.memory_space<vmem>>, vector<6x25xbf16>
    %c0_1 = arith.constant 0 : index
    %c0_2 = arith.constant 0 : index
    %1 = vector.load %arg2[%c0_1, %c0_2] : memref<25x2048xbf16, #tpu.memory_space<vmem>>, vector<25x2048xbf16>
    %cst = arith.constant dense<0.000000e+00> : vector<6x2048xf32>
    %2 = tpu.matmul %0, %1, %cst {dimension_numbers = #tpu.dot_dimension_numbers<[1], [0], [0], [1], [0, 0, 1, 1], [], []>} : vector<6x25xbf16>, vector<25x2048xbf16>, vector<6x2048xf32> -> vector<6x2048xf32>
    %c0_3 = arith.constant 0 : index
    %c0_4 = arith.constant 0 : index
    %3 = vector.load %arg3[%c0_3, %c0_4] : memref<6x1xf32, #tpu.memory_space<vmem>>, vector<6x1xf32>
    %4 = vector.broadcast %3 : vector<6x1xf32> to vector<6x2048xf32>
    %5 = arith.addf %2, %4 : vector<6x2048xf32>
    %cst_5 = arith.constant 0.000000e+00 : f32
    %6 = vector.broadcast %cst_5 : f32 to vector<6x2048xf32>
    %7 = arith.maximumf %5, %6 : vector<6x2048xf32>
    %8 = arith.truncf %7 : vector<6x2048xf32> to vector<6x2048xbf16>
    %c0_6 = arith.constant 0 : index
    %c0_7 = arith.constant 0 : index
    %9 = vector.load %arg4[%c0_6, %c0_7] : memref<6x2048xbf16, #tpu.memory_space<vmem>>, vector<6x2048xbf16>
    tpu.vector_store %arg4[%c0_6, %c0_7], %8 {strides = array<i32>} : memref<6x2048xbf16, #tpu.memory_space<vmem>>, vector<6x2048xbf16>,
    return
  }
  func.func @transform_0(%arg0: i32) -> (i32, i32) {
    %c0_i32 = arith.constant 0 : i32
    %c0_i32_0 = arith.constant 0 : i32
    %c0_i32_1 = arith.constant 0 : i32
    return %c0_i32, %c0_i32_0 : i32, i32
  }
  func.func @transform_1(%arg0: i32) -> (i32, i32) {
    %c0_i32 = arith.constant 0 : i32
    %c0_i32_0 = arith.constant 0 : i32
    return %c0_i32, %arg0 : i32, i32
  }
  func.func @transform_2(%arg0: i32) -> (i32, i32) {
    %c0_i32 = arith.constant 0 : i32
    %c0_i32_0 = arith.constant 0 : i32
    %c0_i32_1 = arith.constant 0 : i32
    return %c0_i32, %c0_i32_0 : i32, i32
  }
  func.func @transform_3(%arg0: i32) -> (i32, i32) {
    %c0_i32 = arith.constant 0 : i32
    %c0_i32_0 = arith.constant 0 : i32
    return %c0_i32, %arg0 : i32, i32
  }
}

module attributes {stable_mosaic.version = 11 : i64} {
  func.func @_max4_kernel(%arg0: i32, %arg1: memref<32x1024xbf16, #tpu.memory_space<vmem>>, %arg2: memref<32x1024xbf16, #tpu.memory_space<vmem>>, %arg3: memref<32x1024xbf16, #tpu.memory_space<vmem>>, %arg4: memref<32x1024xbf16, #tpu.memory_space<vmem>>, %arg5: memref<32x1024xbf16, #tpu.memory_space<vmem>>) attributes {dimension_semantics = [#tpu.dimension_semantics<parallel>], iteration_bounds = array<i64: 5>, scalar_prefetch = 0 : i64, scratch_operands = 0 : i64, tpu.core_type = #tpu.core_type<tc>, window_params = [{transform_indices = @transform_0, window_bounds = array<i64: 32, 1024>}, {transform_indices = @transform_1, window_bounds = array<i64: 32, 1024>}, {transform_indices = @transform_2, window_bounds = array<i64: 32, 1024>}, {transform_indices = @transform_3, window_bounds = array<i64: 32, 1024>}, {transform_indices = @transform_4, window_bounds = array<i64: 32, 1024>}]} {
    %c0 = arith.constant 0 : index
    %c0_0 = arith.constant 0 : index
    %0 = vector.load %arg1[%c0, %c0_0] : memref<32x1024xbf16, #tpu.memory_space<vmem>>, vector<32x1024xbf16>
    %c0_1 = arith.constant 0 : index
    %c0_2 = arith.constant 0 : index
    %1 = vector.load %arg2[%c0_1, %c0_2] : memref<32x1024xbf16, #tpu.memory_space<vmem>>, vector<32x1024xbf16>
    %2 = arith.maximumf %0, %1 : vector<32x1024xbf16>
    %c0_3 = arith.constant 0 : index
    %c0_4 = arith.constant 0 : index
    %3 = vector.load %arg3[%c0_3, %c0_4] : memref<32x1024xbf16, #tpu.memory_space<vmem>>, vector<32x1024xbf16>
    %c0_5 = arith.constant 0 : index
    %c0_6 = arith.constant 0 : index
    %4 = vector.load %arg4[%c0_5, %c0_6] : memref<32x1024xbf16, #tpu.memory_space<vmem>>, vector<32x1024xbf16>
    %5 = arith.maximumf %3, %4 : vector<32x1024xbf16>
    %6 = arith.maximumf %2, %5 : vector<32x1024xbf16>
    %c0_7 = arith.constant 0 : index
    %c0_8 = arith.constant 0 : index
    %7 = vector.load %arg5[%c0_7, %c0_8] : memref<32x1024xbf16, #tpu.memory_space<vmem>>, vector<32x1024xbf16>
    tpu.vector_store %arg5[%c0_7, %c0_8], %6 {strides = array<i32>} : memref<32x1024xbf16, #tpu.memory_space<vmem>>, vector<32x1024xbf16>,
    return
  }
  func.func @transform_0(%arg0: i32) -> (i32, i32) {
    %c0_i32 = arith.constant 0 : i32
    %c0_i32_0 = arith.constant 0 : i32
    return %arg0, %c0_i32 : i32, i32
  }
  func.func @transform_1(%arg0: i32) -> (i32, i32) {
    %c0_i32 = arith.constant 0 : i32
    %c0_i32_0 = arith.constant 0 : i32
    return %arg0, %c0_i32 : i32, i32
  }
  func.func @transform_2(%arg0: i32) -> (i32, i32) {
    %c0_i32 = arith.constant 0 : i32
    %c0_i32_0 = arith.constant 0 : i32
    return %arg0, %c0_i32 : i32, i32
  }
  func.func @transform_3(%arg0: i32) -> (i32, i32) {
    %c0_i32 = arith.constant 0 : i32
    %c0_i32_0 = arith.constant 0 : i32
    return %arg0, %c0_i32 : i32, i32
  }
  func.func @transform_4(%arg0: i32) -> (i32, i32) {
    %c0_i32 = arith.constant 0 : i32
    %c0_i32_0 = arith.constant 0 : i32
    return %arg0, %c0_i32 : i32, i32
  }
}

module attributes {stable_mosaic.version = 11 : i64} {
  func.func @_mm_k1_kernel(%arg0: i32, %arg1: memref<16x150xbf16, #tpu.memory_space<vmem>>, %arg2: memref<150x2048xbf16, #tpu.memory_space<vmem>>, %arg3: memref<16x1xf32, #tpu.memory_space<vmem>>, %arg4: memref<16x2048xbf16, #tpu.memory_space<vmem>>) attributes {dimension_semantics = [#tpu.dimension_semantics<parallel>], iteration_bounds = array<i64: 11>, scalar_prefetch = 0 : i64, scratch_operands = 0 : i64, tpu.core_type = #tpu.core_type<tc>, window_params = [{pipeline_mode = #tpu.pipeline_mode<synchronous>, transform_indices = @transform_0, window_bounds = array<i64: 16, 150>}, {transform_indices = @transform_1, window_bounds = array<i64: 150, 2048>}, {pipeline_mode = #tpu.pipeline_mode<synchronous>, transform_indices = @transform_2, window_bounds = array<i64: 16, 1>}, {transform_indices = @transform_3, window_bounds = array<i64: 16, 2048>}]} {
    %c0 = arith.constant 0 : index
    %c0_0 = arith.constant 0 : index
    %0 = vector.load %arg1[%c0, %c0_0] : memref<16x150xbf16, #tpu.memory_space<vmem>>, vector<16x150xbf16>
    %c0_1 = arith.constant 0 : index
    %c0_2 = arith.constant 0 : index
    %1 = vector.load %arg2[%c0_1, %c0_2] : memref<150x2048xbf16, #tpu.memory_space<vmem>>, vector<150x2048xbf16>
    %cst = arith.constant dense<0.000000e+00> : vector<16x2048xf32>
    %2 = tpu.matmul %0, %1, %cst {dimension_numbers = #tpu.dot_dimension_numbers<[1], [0], [0], [1], [0, 0, 1, 1], [], []>} : vector<16x150xbf16>, vector<150x2048xbf16>, vector<16x2048xf32> -> vector<16x2048xf32>
    %c0_3 = arith.constant 0 : index
    %c0_4 = arith.constant 0 : index
    %3 = vector.load %arg3[%c0_3, %c0_4] : memref<16x1xf32, #tpu.memory_space<vmem>>, vector<16x1xf32>
    %4 = vector.broadcast %3 : vector<16x1xf32> to vector<16x2048xf32>
    %5 = arith.addf %2, %4 : vector<16x2048xf32>
    %cst_5 = arith.constant 0.000000e+00 : f32
    %6 = vector.broadcast %cst_5 : f32 to vector<16x2048xf32>
    %7 = arith.maximumf %5, %6 : vector<16x2048xf32>
    %8 = arith.truncf %7 : vector<16x2048xf32> to vector<16x2048xbf16>
    %c0_6 = arith.constant 0 : index
    %c0_7 = arith.constant 0 : index
    %9 = vector.load %arg4[%c0_6, %c0_7] : memref<16x2048xbf16, #tpu.memory_space<vmem>>, vector<16x2048xbf16>
    tpu.vector_store %arg4[%c0_6, %c0_7], %8 {strides = array<i32>} : memref<16x2048xbf16, #tpu.memory_space<vmem>>, vector<16x2048xbf16>,
    return
  }
  func.func @transform_0(%arg0: i32) -> (i32, i32) {
    %c0_i32 = arith.constant 0 : i32
    %c0_i32_0 = arith.constant 0 : i32
    %c0_i32_1 = arith.constant 0 : i32
    return %c0_i32, %c0_i32_0 : i32, i32
  }
  func.func @transform_1(%arg0: i32) -> (i32, i32) {
    %c0_i32 = arith.constant 0 : i32
    %c0_i32_0 = arith.constant 0 : i32
    return %c0_i32, %arg0 : i32, i32
  }
  func.func @transform_2(%arg0: i32) -> (i32, i32) {
    %c0_i32 = arith.constant 0 : i32
    %c0_i32_0 = arith.constant 0 : i32
    %c0_i32_1 = arith.constant 0 : i32
    return %c0_i32, %c0_i32_0 : i32, i32
  }
  func.func @transform_3(%arg0: i32) -> (i32, i32) {
    %c0_i32 = arith.constant 0 : i32
    %c0_i32_0 = arith.constant 0 : i32
    return %c0_i32, %arg0 : i32, i32
  }
}

module attributes {stable_mosaic.version = 11 : i64} {
  func.func @_max4_kernel(%arg0: i32, %arg1: memref<32x1024xbf16, #tpu.memory_space<vmem>>, %arg2: memref<32x1024xbf16, #tpu.memory_space<vmem>>, %arg3: memref<32x1024xbf16, #tpu.memory_space<vmem>>, %arg4: memref<32x1024xbf16, #tpu.memory_space<vmem>>, %arg5: memref<32x1024xbf16, #tpu.memory_space<vmem>>) attributes {dimension_semantics = [#tpu.dimension_semantics<parallel>], iteration_bounds = array<i64: 3>, scalar_prefetch = 0 : i64, scratch_operands = 0 : i64, tpu.core_type = #tpu.core_type<tc>, window_params = [{transform_indices = @transform_0, window_bounds = array<i64: 32, 1024>}, {transform_indices = @transform_1, window_bounds = array<i64: 32, 1024>}, {transform_indices = @transform_2, window_bounds = array<i64: 32, 1024>}, {transform_indices = @transform_3, window_bounds = array<i64: 32, 1024>}, {transform_indices = @transform_4, window_bounds = array<i64: 32, 1024>}]} {
    %c0 = arith.constant 0 : index
    %c0_0 = arith.constant 0 : index
    %0 = vector.load %arg1[%c0, %c0_0] : memref<32x1024xbf16, #tpu.memory_space<vmem>>, vector<32x1024xbf16>
    %c0_1 = arith.constant 0 : index
    %c0_2 = arith.constant 0 : index
    %1 = vector.load %arg2[%c0_1, %c0_2] : memref<32x1024xbf16, #tpu.memory_space<vmem>>, vector<32x1024xbf16>
    %2 = arith.maximumf %0, %1 : vector<32x1024xbf16>
    %c0_3 = arith.constant 0 : index
    %c0_4 = arith.constant 0 : index
    %3 = vector.load %arg3[%c0_3, %c0_4] : memref<32x1024xbf16, #tpu.memory_space<vmem>>, vector<32x1024xbf16>
    %c0_5 = arith.constant 0 : index
    %c0_6 = arith.constant 0 : index
    %4 = vector.load %arg4[%c0_5, %c0_6] : memref<32x1024xbf16, #tpu.memory_space<vmem>>, vector<32x1024xbf16>
    %5 = arith.maximumf %3, %4 : vector<32x1024xbf16>
    %6 = arith.maximumf %2, %5 : vector<32x1024xbf16>
    %c0_7 = arith.constant 0 : index
    %c0_8 = arith.constant 0 : index
    %7 = vector.load %arg5[%c0_7, %c0_8] : memref<32x1024xbf16, #tpu.memory_space<vmem>>, vector<32x1024xbf16>
    tpu.vector_store %arg5[%c0_7, %c0_8], %6 {strides = array<i32>} : memref<32x1024xbf16, #tpu.memory_space<vmem>>, vector<32x1024xbf16>,
    return
  }
  func.func @transform_0(%arg0: i32) -> (i32, i32) {
    %c0_i32 = arith.constant 0 : i32
    %c0_i32_0 = arith.constant 0 : i32
    return %arg0, %c0_i32 : i32, i32
  }
  func.func @transform_1(%arg0: i32) -> (i32, i32) {
    %c0_i32 = arith.constant 0 : i32
    %c0_i32_0 = arith.constant 0 : i32
    return %arg0, %c0_i32 : i32, i32
  }
  func.func @transform_2(%arg0: i32) -> (i32, i32) {
    %c0_i32 = arith.constant 0 : i32
    %c0_i32_0 = arith.constant 0 : i32
    return %arg0, %c0_i32 : i32, i32
  }
  func.func @transform_3(%arg0: i32) -> (i32, i32) {
    %c0_i32 = arith.constant 0 : i32
    %c0_i32_0 = arith.constant 0 : i32
    return %arg0, %c0_i32 : i32, i32
  }
  func.func @transform_4(%arg0: i32) -> (i32, i32) {
    %c0_i32 = arith.constant 0 : i32
    %c0_i32_0 = arith.constant 0 : i32
    return %arg0, %c0_i32 : i32, i32
  }
}

module attributes {stable_mosaic.version = 11 : i64} {
  func.func @_mm_multi_k_kernel(%arg0: i32, %arg1: memref<8x2816xbf16, #tpu.memory_space<vmem>>, %arg2: memref<2816x120xbf16, #tpu.memory_space<vmem>>, %arg3: memref<1x120xf32, #tpu.memory_space<vmem>>, %arg4: memref<8x120xbf16, #tpu.memory_space<vmem>>, %arg5: memref<8x120xf32, #tpu.memory_space<vmem>>) attributes {dimension_semantics = [#tpu.dimension_semantics<arbitrary>], iteration_bounds = array<i64: 16>, scalar_prefetch = 0 : i64, scratch_operands = 1 : i64, tpu.core_type = #tpu.core_type<tc>, window_params = [{transform_indices = @transform_0, window_bounds = array<i64: 8, 2816>}, {transform_indices = @transform_1, window_bounds = array<i64: 2816, 120>}, {pipeline_mode = #tpu.pipeline_mode<synchronous>, transform_indices = @transform_2, window_bounds = array<i64: 1, 120>}, {pipeline_mode = #tpu.pipeline_mode<synchronous>, transform_indices = @transform_3, window_bounds = array<i64: 8, 120>}]} {
    %c0_i32 = arith.constant 0 : i32
    %0 = arith.cmpi eq, %arg0, %c0_i32 : i32
    %1 = arith.extui %0 : i1 to i32
    %c0_i32_0 = arith.constant 0 : i32
    %2 = arith.cmpi ne, %1, %c0_i32_0 : i32
    scf.if %2 {
      %cst_9 = arith.constant 0.000000e+00 : f32
      %12 = vector.broadcast %cst_9 : f32 to vector<8x120xf32>
      %c0_10 = arith.constant 0 : index
      %c0_11 = arith.constant 0 : index
      %13 = vector.load %arg5[%c0_10, %c0_11] : memref<8x120xf32, #tpu.memory_space<vmem>>, vector<8x120xf32>
      tpu.vector_store %arg5[%c0_10, %c0_11], %12 {strides = array<i32>} : memref<8x120xf32, #tpu.memory_space<vmem>>, vector<8x120xf32>,
    } else {
    }
    %c0 = arith.constant 0 : index
    %c0_1 = arith.constant 0 : index
    %3 = vector.load %arg5[%c0, %c0_1] : memref<8x120xf32, #tpu.memory_space<vmem>>, vector<8x120xf32>
    %c0_2 = arith.constant 0 : index
    %c0_3 = arith.constant 0 : index
    %4 = vector.load %arg1[%c0_2, %c0_3] : memref<8x2816xbf16, #tpu.memory_space<vmem>>, vector<8x2816xbf16>
    %c0_4 = arith.constant 0 : index
    %c0_5 = arith.constant 0 : index
    %5 = vector.load %arg2[%c0_4, %c0_5] : memref<2816x120xbf16, #tpu.memory_space<vmem>>, vector<2816x120xbf16>
    %cst = arith.constant dense<0.000000e+00> : vector<8x120xf32>
    %6 = tpu.matmul %4, %5, %cst {dimension_numbers = #tpu.dot_dimension_numbers<[1], [0], [0], [1], [0, 0, 1, 1], [], []>} : vector<8x2816xbf16>, vector<2816x120xbf16>, vector<8x120xf32> -> vector<8x120xf32>
    %7 = arith.addf %3, %6 : vector<8x120xf32>
    %c0_6 = arith.constant 0 : index
    %c0_7 = arith.constant 0 : index
    %8 = vector.load %arg5[%c0_6, %c0_7] : memref<8x120xf32, #tpu.memory_space<vmem>>, vector<8x120xf32>
    tpu.vector_store %arg5[%c0_6, %c0_7], %7 {strides = array<i32>} : memref<8x120xf32, #tpu.memory_space<vmem>>, vector<8x120xf32>,
    %c15_i32 = arith.constant 15 : i32
    %9 = arith.cmpi eq, %arg0, %c15_i32 : i32
    %10 = arith.extui %9 : i1 to i32
    %c0_i32_8 = arith.constant 0 : i32
    %11 = arith.cmpi ne, %10, %c0_i32_8 : i32
    scf.if %11 {
      %c0_9 = arith.constant 0 : index
      %c0_10 = arith.constant 0 : index
      %12 = vector.load %arg5[%c0_9, %c0_10] : memref<8x120xf32, #tpu.memory_space<vmem>>, vector<8x120xf32>
      %c0_11 = arith.constant 0 : index
      %c0_12 = arith.constant 0 : index
      %13 = vector.load %arg3[%c0_11, %c0_12] : memref<1x120xf32, #tpu.memory_space<vmem>>, vector<1x120xf32>
      %14 = vector.broadcast %13 : vector<1x120xf32> to vector<8x120xf32>
      %15 = arith.addf %12, %14 : vector<8x120xf32>
      %cst_13 = arith.constant 0.000000e+00 : f32
      %16 = vector.broadcast %cst_13 : f32 to vector<8x120xf32>
      %17 = arith.maximumf %15, %16 : vector<8x120xf32>
      %18 = arith.truncf %17 : vector<8x120xf32> to vector<8x120xbf16>
      %c0_14 = arith.constant 0 : index
      %c0_15 = arith.constant 0 : index
      %19 = vector.load %arg4[%c0_14, %c0_15] : memref<8x120xbf16, #tpu.memory_space<vmem>>, vector<8x120xbf16>
      tpu.vector_store %arg4[%c0_14, %c0_15], %18 {strides = array<i32>} : memref<8x120xbf16, #tpu.memory_space<vmem>>, vector<8x120xbf16>,
    } else {
    }
    return
  }
  func.func @transform_0(%arg0: i32) -> (i32, i32) {
    %c0_i32 = arith.constant 0 : i32
    %c0_i32_0 = arith.constant 0 : i32
    return %c0_i32, %arg0 : i32, i32
  }
  func.func @transform_1(%arg0: i32) -> (i32, i32) {
    %c0_i32 = arith.constant 0 : i32
    %c0_i32_0 = arith.constant 0 : i32
    return %arg0, %c0_i32 : i32, i32
  }
  func.func @transform_2(%arg0: i32) -> (i32, i32) {
    %c0_i32 = arith.constant 0 : i32
    %c0_i32_0 = arith.constant 0 : i32
    %c0_i32_1 = arith.constant 0 : i32
    return %c0_i32, %c0_i32_0 : i32, i32
  }
  func.func @transform_3(%arg0: i32) -> (i32, i32) {
    %c0_i32 = arith.constant 0 : i32
    %c0_i32_0 = arith.constant 0 : i32
    %c0_i32_1 = arith.constant 0 : i32
    return %c0_i32, %c0_i32_0 : i32, i32
  }
}

module attributes {stable_mosaic.version = 11 : i64} {
  func.func @_mm_k1_kernel(%arg0: i32, %arg1: memref<8x120xbf16, #tpu.memory_space<vmem>>, %arg2: memref<120x60xbf16, #tpu.memory_space<vmem>>, %arg3: memref<1x60xf32, #tpu.memory_space<vmem>>, %arg4: memref<8x60xbf16, #tpu.memory_space<vmem>>) attributes {dimension_semantics = [#tpu.dimension_semantics<arbitrary>], iteration_bounds = array<i64: 1>, scalar_prefetch = 0 : i64, scratch_operands = 0 : i64, tpu.core_type = #tpu.core_type<tc>, window_params = [{pipeline_mode = #tpu.pipeline_mode<synchronous>, transform_indices = @transform_0, window_bounds = array<i64: 8, 120>}, {pipeline_mode = #tpu.pipeline_mode<synchronous>, transform_indices = @transform_1, window_bounds = array<i64: 120, 60>}, {pipeline_mode = #tpu.pipeline_mode<synchronous>, transform_indices = @transform_2, window_bounds = array<i64: 1, 60>}, {pipeline_mode = #tpu.pipeline_mode<synchronous>, transform_indices = @transform_3, window_bounds = array<i64: 8, 60>}]} {
    %c0 = arith.constant 0 : index
    %c0_0 = arith.constant 0 : index
    %0 = vector.load %arg1[%c0, %c0_0] : memref<8x120xbf16, #tpu.memory_space<vmem>>, vector<8x120xbf16>
    %c0_1 = arith.constant 0 : index
    %c0_2 = arith.constant 0 : index
    %1 = vector.load %arg2[%c0_1, %c0_2] : memref<120x60xbf16, #tpu.memory_space<vmem>>, vector<120x60xbf16>
    %cst = arith.constant dense<0.000000e+00> : vector<8x60xf32>
    %2 = tpu.matmul %0, %1, %cst {dimension_numbers = #tpu.dot_dimension_numbers<[1], [0], [0], [1], [0, 0, 1, 1], [], []>} : vector<8x120xbf16>, vector<120x60xbf16>, vector<8x60xf32> -> vector<8x60xf32>
    %c0_3 = arith.constant 0 : index
    %c0_4 = arith.constant 0 : index
    %3 = vector.load %arg3[%c0_3, %c0_4] : memref<1x60xf32, #tpu.memory_space<vmem>>, vector<1x60xf32>
    %4 = vector.broadcast %3 : vector<1x60xf32> to vector<8x60xf32>
    %5 = arith.addf %2, %4 : vector<8x60xf32>
    %cst_5 = arith.constant 0.000000e+00 : f32
    %6 = vector.broadcast %cst_5 : f32 to vector<8x60xf32>
    %7 = arith.maximumf %5, %6 : vector<8x60xf32>
    %8 = arith.truncf %7 : vector<8x60xf32> to vector<8x60xbf16>
    %c0_6 = arith.constant 0 : index
    %c0_7 = arith.constant 0 : index
    %9 = vector.load %arg4[%c0_6, %c0_7] : memref<8x60xbf16, #tpu.memory_space<vmem>>, vector<8x60xbf16>
    tpu.vector_store %arg4[%c0_6, %c0_7], %8 {strides = array<i32>} : memref<8x60xbf16, #tpu.memory_space<vmem>>, vector<8x60xbf16>,
    return
  }
  func.func @transform_0(%arg0: i32) -> (i32, i32) {
    %c0_i32 = arith.constant 0 : i32
    %c0_i32_0 = arith.constant 0 : i32
    %c0_i32_1 = arith.constant 0 : i32
    return %c0_i32, %c0_i32_0 : i32, i32
  }
  func.func @transform_1(%arg0: i32) -> (i32, i32) {
    %c0_i32 = arith.constant 0 : i32
    %c0_i32_0 = arith.constant 0 : i32
    %c0_i32_1 = arith.constant 0 : i32
    return %c0_i32, %c0_i32_0 : i32, i32
  }
  func.func @transform_2(%arg0: i32) -> (i32, i32) {
    %c0_i32 = arith.constant 0 : i32
    %c0_i32_0 = arith.constant 0 : i32
    %c0_i32_1 = arith.constant 0 : i32
    return %c0_i32, %c0_i32_0 : i32, i32
  }
  func.func @transform_3(%arg0: i32) -> (i32, i32) {
    %c0_i32 = arith.constant 0 : i32
    %c0_i32_0 = arith.constant 0 : i32
    %c0_i32_1 = arith.constant 0 : i32
    return %c0_i32, %c0_i32_0 : i32, i32
  }
}

module attributes {stable_mosaic.version = 11 : i64} {
  func.func @_mm_k1_kernel(%arg0: i32, %arg1: memref<8x60xbf16, #tpu.memory_space<vmem>>, %arg2: memref<60x2xbf16, #tpu.memory_space<vmem>>, %arg3: memref<1x2xf32, #tpu.memory_space<vmem>>, %arg4: memref<8x2xf32, #tpu.memory_space<vmem>>) attributes {dimension_semantics = [#tpu.dimension_semantics<arbitrary>], iteration_bounds = array<i64: 1>, scalar_prefetch = 0 : i64, scratch_operands = 0 : i64, tpu.core_type = #tpu.core_type<tc>, window_params = [{pipeline_mode = #tpu.pipeline_mode<synchronous>, transform_indices = @transform_0, window_bounds = array<i64: 8, 60>}, {pipeline_mode = #tpu.pipeline_mode<synchronous>, transform_indices = @transform_1, window_bounds = array<i64: 60, 2>}, {pipeline_mode = #tpu.pipeline_mode<synchronous>, transform_indices = @transform_2, window_bounds = array<i64: 1, 2>}, {pipeline_mode = #tpu.pipeline_mode<synchronous>, transform_indices = @transform_3, window_bounds = array<i64: 8, 2>}]} {
    %c0 = arith.constant 0 : index
    %c0_0 = arith.constant 0 : index
    %0 = vector.load %arg1[%c0, %c0_0] : memref<8x60xbf16, #tpu.memory_space<vmem>>, vector<8x60xbf16>
    %c0_1 = arith.constant 0 : index
    %c0_2 = arith.constant 0 : index
    %1 = vector.load %arg2[%c0_1, %c0_2] : memref<60x2xbf16, #tpu.memory_space<vmem>>, vector<60x2xbf16>
    %cst = arith.constant dense<0.000000e+00> : vector<8x2xf32>
    %2 = tpu.matmul %0, %1, %cst {dimension_numbers = #tpu.dot_dimension_numbers<[1], [0], [0], [1], [0, 0, 1, 1], [], []>} : vector<8x60xbf16>, vector<60x2xbf16>, vector<8x2xf32> -> vector<8x2xf32>
    %c0_3 = arith.constant 0 : index
    %c0_4 = arith.constant 0 : index
    %3 = vector.load %arg3[%c0_3, %c0_4] : memref<1x2xf32, #tpu.memory_space<vmem>>, vector<1x2xf32>
    %4 = vector.broadcast %3 : vector<1x2xf32> to vector<8x2xf32>
    %5 = arith.addf %2, %4 : vector<8x2xf32>
    %c0_5 = arith.constant 0 : index
    %c0_6 = arith.constant 0 : index
    %6 = vector.load %arg4[%c0_5, %c0_6] : memref<8x2xf32, #tpu.memory_space<vmem>>, vector<8x2xf32>
    tpu.vector_store %arg4[%c0_5, %c0_6], %5 {strides = array<i32>} : memref<8x2xf32, #tpu.memory_space<vmem>>, vector<8x2xf32>,
    return
  }
  func.func @transform_0(%arg0: i32) -> (i32, i32) {
    %c0_i32 = arith.constant 0 : i32
    %c0_i32_0 = arith.constant 0 : i32
    %c0_i32_1 = arith.constant 0 : i32
    return %c0_i32, %c0_i32_0 : i32, i32
  }
  func.func @transform_1(%arg0: i32) -> (i32, i32) {
    %c0_i32 = arith.constant 0 : i32
    %c0_i32_0 = arith.constant 0 : i32
    %c0_i32_1 = arith.constant 0 : i32
    return %c0_i32, %c0_i32_0 : i32, i32
  }
  func.func @transform_2(%arg0: i32) -> (i32, i32) {
    %c0_i32 = arith.constant 0 : i32
    %c0_i32_0 = arith.constant 0 : i32
    %c0_i32_1 = arith.constant 0 : i32
    return %c0_i32, %c0_i32_0 : i32, i32
  }
  func.func @transform_3(%arg0: i32) -> (i32, i32) {
    %c0_i32 = arith.constant 0 : i32
    %c0_i32_0 = arith.constant 0 : i32
    %c0_i32_1 = arith.constant 0 : i32
    return %c0_i32, %c0_i32_0 : i32, i32
  }
}

</mosaic_0001>

<bundles_post_ra>
// kernel: net_forward.7
= control target key start
LH: loop header
LB: loop body
LE: loop exit
PB: predicated region body
PF: predicated region fallthrough
CT: control target
= control target key end

     0   :  { %s1116_s12 = smov 0   ;;  %s1118_s13 = smov 0   ;;  %s1349_s0 = inlined_call_operand.vmem [shape: bf16[6,25], index: 0, kind: input, shape index: {}]   ;;  %s1350_s1 = inlined_call_operand.vmem [shape: bf16[25,98304], index: 1, kind: input, shape index: {}]   ;;  %s1351_s2 = inlined_call_operand.vmem [shape: f32[6,1], index: 2, kind: input, shape index: {}]   ;;  %s1352_s3 = inlined_call_operand.vmem [shape: bf16[6,98304], index: 3, kind: output, shape index: {}]  }
   0x1   :  { %s1120_s14 = smov 0  }
   0x2 LB: > { %s973_s15 = sadd.s32 4294967295, %s1092_s14   ;;  %s1133_s16 = sadd.s32 1, %s1092_s14   ;;  %s1092_s14 = sphi %s1120_s14, %s1355_s14   ;;  %s1088_s13 = sphi %s1118_s13, %s1354_s13   ;;  %s1084_s12 = sphi %s1116_s12, %s1353_s12  }
   0x3   : > { %s38_s17 = ssub.s32 %s1092_s14, %s1133_s16  ;;  %s41_s18 = sadd.s32 1, %s1088_s13 }
   0x4   : > { %p39_p0 = scmp.eq.s32.totalorder %s38_s17, 0  ;;  %p48_p1 = scmp.ne.s32.totalorder %s1088_s13, %s1084_s12 }
   0x5   : > { %p49_p2 = scmp.eq.s32.totalorder %s1092_s14, 0  ;;  %p976_p4 = scmp.ge.s32.totalorder %s1092_s14, 48 }
   0x6   : > { %s1142_s19 = scalar_select %p39_p0, %s1088_s13, %s41_s18  }
   0x7   : > { %p50_p3 = por %p49_p2, %p48_p1  ;;  %127 = sbr.rel (%p976_p4) target bundleno = 32 (0x20), region = 24 }
   0xc   : > { %130 = sbr.rel (!%p50_p3) target bundleno = 32 (0x20), region = 28  ;;  %s132_s20 = sand.u32 (%p50_p3), 1, %s1088_s13  }
   0xd   : > { %s1034_s21 = sshll.u32 (%p50_p3), %s1092_s14, 6  ;;  %s977_s22 = sshll.u32 (%p50_p3), %s132_s20, 8 }
   0xe   : > { %s1150_s25 = scalar_lea.vmem (%p50_p3), %s1350_s1, %s1034_s21  ;;  %s1155_s26 = scalar_lea.vmem (%p50_p3), [#allocation2], %s977_s22 }
   0xf   : > { %v150_v0 = vld [vmem:[%s1150_s25] sm:$0xff] (%p50_p3)  ;;  %v152_v1 = vld [vmem:[%s1150_s25 + $0x8] sm:$0xff] (%p50_p3)  ;;  %v154_v2 = vld [vmem:[%s1150_s25 + $0x10] sm:$0xff] (%p50_p3) }
  0x10   : > { %151 = vst [vmem:[%s1155_s26] sm:$0xff] (%p50_p3), %v150_v0  ;;  %153 = vst [vmem:[%s1155_s26 + $0x8] sm:$0xff] (%p50_p3), %v152_v1  ;;  %v156_v3 = vld [vmem:[%s1150_s25 + $0x18] sm:$0xff] (%p50_p3)  ;;  %v158_v4 = vld [vmem:[%s1150_s25 + $0x20] sm:$0xff] (%p50_p3) }
  0x11   : > { %155 = vst [vmem:[%s1155_s26 + $0x10] sm:$0xff] %v154_v2  ;;  %v160_v5 = vld [vmem:[%s1150_s25 + $0x28] sm:$0xff]  ;;  %157 = vst [vmem:[%s1155_s26 + $0x18] sm:$0xff] %v156_v3  ;;  %v162_v6 = vld [vmem:[%s1150_s25 + $0x30] sm:$0xff] }
  0x12   : > { %159 = vst [vmem:[%s1155_s26 + $0x20] sm:$0xff] %v158_v4  ;;  %161 = vst [vmem:[%s1155_s26 + $0x28] sm:$0xff] %v160_v5  ;;  %v164_v7 = vld [vmem:[%s1150_s25 + $0x38] sm:$0xff]  ;;  %v166_v8 = vld [vmem:[%s1150_s25 + $0xc00] sm:$0xff] }
  0x13   : > { %163 = vst [vmem:[%s1155_s26 + $0x30] sm:$0xff] %v162_v6  ;;  %165 = vst [vmem:[%s1155_s26 + $0x38] sm:$0xff] %v164_v7  ;;  %v168_v9 = vld [vmem:[%s1150_s25 + $0xc08] sm:$0xff]  ;;  %v170_v10 = vld [vmem:[%s1150_s25 + $0xc10] sm:$0xff] }
  0x14   : > { %167 = vst [vmem:[%s1155_s26 + $0x40] sm:$0xff] %v166_v8  ;;  %v172_v11 = vld [vmem:[%s1150_s25 + $0xc18] sm:$0xff]  ;;  %169 = vst [vmem:[%s1155_s26 + $0x48] sm:$0xff] %v168_v9  ;;  %v174_v12 = vld [vmem:[%s1150_s25 + $0xc20] sm:$0xff] }
  0x15   : > { %171 = vst [vmem:[%s1155_s26 + $0x50] sm:$0xff] %v170_v10  ;;  %173 = vst [vmem:[%s1155_s26 + $0x58] sm:$0xff] %v172_v11  ;;  %v176_v13 = vld [vmem:[%s1150_s25 + $0xc28] sm:$0xff]  ;;  %v178_v14 = vld [vmem:[%s1150_s25 + $0xc30] sm:$0xff] }
  0x16   : > { %175 = vst [vmem:[%s1155_s26 + $0x60] sm:$0xff] %v174_v12  ;;  %177 = vst [vmem:[%s1155_s26 + $0x68] sm:$0xff] %v176_v13  ;;  %v180_v15 = vld [vmem:[%s1150_s25 + $0xc38] sm:$0xff]  ;;  %v182_v16 = vld [vmem:[%s1150_s25 + $0x1800] sm:$0xff] }
  0x17   : > { %179 = vst [vmem:[%s1155_s26 + $0x70] sm:$0xff] %v178_v14  ;;  %v184_v17 = vld [vmem:[%s1150_s25 + $0x1808] sm:$0xff]  ;;  %181 = vst [vmem:[%s1155_s26 + $0x78] sm:$0xff] %v180_v15  ;;  %v186_v18 = vld [vmem:[%s1150_s25 + $0x1810] sm:$0xff] }
  0x18   : > { %183 = vst [vmem:[%s1155_s26 + $0x80] sm:$0xff] %v182_v16  ;;  %185 = vst [vmem:[%s1155_s26 + $0x88] sm:$0xff] %v184_v17  ;;  %v188_v19 = vld [vmem:[%s1150_s25 + $0x1818] sm:$0xff]  ;;  %v190_v20 = vld [vmem:[%s1150_s25 + $0x1820] sm:$0xff] }
  0x19   : > { %187 = vst [vmem:[%s1155_s26 + $0x90] sm:$0xff] %v186_v18  ;;  %189 = vst [vmem:[%s1155_s26 + $0x98] sm:$0xff] %v188_v19  ;;  %v192_v21 = vld [vmem:[%s1150_s25 + $0x1828] sm:$0xff]  ;;  %v194_v22 = vld [vmem:[%s1150_s25 + $0x1830] sm:$0xff] }
  0x1a   : > { %191 = vst [vmem:[%s1155_s26 + $0xa0] sm:$0xff] %v190_v20  ;;  %v196_v23 = vld [vmem:[%s1150_s25 + $0x1838] sm:$0xff]  ;;  %193 = vst [vmem:[%s1155_s26 + $0xa8] sm:$0xff] %v192_v21  ;;  %v198_v24 = vld [vmem:[%s1150_s25 + $0x2400] sm:$0xff] }
  0x1b   : > { %195 = vst [vmem:[%s1155_s26 + $0xb0] sm:$0xff] %v194_v22  ;;  %197 = vst [vmem:[%s1155_s26 + $0xb8] sm:$0xff] %v196_v23  ;;  %v200_v25 = vld [vmem:[%s1150_s25 + $0x2408] sm:$0xff]  ;;  %v202_v26 = vld [vmem:[%s1150_s25 + $0x2410] sm:$0xff] }
  0x1c   : > { %199 = vst [vmem:[%s1155_s26 + $0xc0] sm:$0xff] %v198_v24  ;;  %201 = vst [vmem:[%s1155_s26 + $0xc8] sm:$0xff] %v200_v25  ;;  %v204_v27 = vld [vmem:[%s1150_s25 + $0x2418] sm:$0xff]  ;;  %v206_v28 = vld [vmem:[%s1150_s25 + $0x2420] sm:$0xff] }
  0x1d   : > { %203 = vst [vmem:[%s1155_s26 + $0xd0] sm:$0xff] %v202_v26  ;;  %v208_v29 = vld [vmem:[%s1150_s25 + $0x2428] sm:$0xff]  ;;  %205 = vst [vmem:[%s1155_s26 + $0xd8] sm:$0xff] %v204_v27  ;;  %v210_v30 = vld [vmem:[%s1150_s25 + $0x2430] sm:$0xff] }
  0x1e   : > { %207 = vst [vmem:[%s1155_s26 + $0xe0] sm:$0xff] %v206_v28  ;;  %209 = vst [vmem:[%s1155_s26 + $0xe8] sm:$0xff] %v208_v29  ;;  %v212_v31 = vld [vmem:[%s1150_s25 + $0x2438] sm:$0xff] }
  0x1f   : > { %211 = vst [vmem:[%s1155_s26 + $0xf0] sm:$0xff] %v210_v30  ;;  %213 = vst [vmem:[%s1155_s26 + $0xf8] sm:$0xff] %v212_v31 }
  0x20 PF: > { %p980_p5 = scmp.ge.s32.totalorder %s1092_s14, 1  ;;  %p218_p6 = scmp.lt.s32.totalorder %s1092_s14, 49 }
  0x22   : > { %p219_p7 = pnand %p980_p5, %p218_p6 }
  0x23   : > { %s225_s27 = sand.u32 (!%p219_p7), 1, %s1084_s12   ;;  %s982_s7 = sshll.u32 (!%p219_p7), %s973_s15, 4 }
  0x24   : > { %222 = sbr.rel (%p219_p7) target bundleno = 282 (0x11a), region = 51  ;;  %s981_s28 = sshll.u32 (!%p219_p7), %s225_s27, 8 }
  0x25   : > { %s1227_s4 = scalar_lea.vmem (!%p219_p7), [#allocation2], %s981_s28  ;;  %p250_p8 = scmp.lt.s32.totalorder (!%p219_p7), %s982_s7, 767 }
  0x29   : > { %vm443_vm0 = vcmask 1043456   ;;  %vm444_vm1 = vcmask 1044480   ;;  %v1094_v32 = vmov 65535   ;;  %v1095_v34 = vmov 0   ;;  %v289_v35 = vld [vmem:[%s1351_s2] sm:$0x3f] }
  0x2a   : > { %v445_v33 = vsel %vm443_vm0, 4294967295, %v1094_v32  ;;  %527 = vmatprep.mubr.bf16.mxu0 %v1095_v34  ;;  %568 = vmatprep.mubr.bf16.mxu1 %v1095_v34  ;;  %v273_v36 = vld [vmem:[%s1227_s4 + $0x80] sm:$0xff]  ;;  %v274_v39 = vld [vmem:[%s1227_s4 + $0x88] sm:$0xff]  ;;  %v275_v49 = vld [vmem:[%s1227_s4 + $0x90] sm:$0xff]  ;;  %vm439_vm2 = vcmask 203776   ;;  %s1357_s7 = smov (!%p250_p8, %s982_s7), 767 }
  0x2b   : > { %1069 = vset.pattern.permute.xlu0 %v1095_v34  ;;  %v281_v37 = vld [vmem:[%s1227_s4 + $0xc0] sm:$0x11]  ;;  %v1231_v38 = vsel %vm444_vm1, %v445_v33, 0  ;;  %v282_v41 = vld [vmem:[%s1227_s4 + $0xc8] sm:$0x11]  ;;  %v276_v54 = vld [vmem:[%s1227_s4 + $0x98] sm:$0xff] }
  0x2c   : > { %292 = vperm.xlu0 %1069, %v289_v35   ;;  %v1001_v40 = vcombine.high %v273_v36, %v281_v37  ;;  %v1000_v42 = vcombine.low %v273_v36, %v281_v37  ;;  %v257_v43 = vld [vmem:[%s1227_s4] sm:$0xff]  ;;  %v1003_v45 = vcombine.high %v274_v39, %v282_v41  ;;  %v1002_v46 = vcombine.low %v274_v39, %v282_v41  ;;  %v258_v47 = vld [vmem:[%s1227_s4 + $0x8] sm:$0xff]  ;;  %v283_v53 = vld [vmem:[%s1227_s4 + $0xd0] sm:$0x11]  ;;  %s983_s8 = sshll.u32 %s1357_s7, 2 }
  0x2d   : > { %v265_v44 = vld [vmem:[%s1227_s4 + $0x40] sm:$0xff]  ;;  %v266_v48 = vld [vmem:[%s1227_s4 + $0x48] sm:$0xff]  ;;  %v284_v55 = vld [vmem:[%s1227_s4 + $0xd8] sm:$0x11]  ;;  %v1005_v59 = vcombine.high %v275_v49, %v283_v53  ;;  %v1004_v62 = vcombine.low %v275_v49, %v283_v53  ;;  %s1317_s11 = scalar_lea.vmem %s1352_s3, %s983_s8 }
  0x2e   : > { %v451_v50 = vand.u32 %v1001_v40, %v1231_v38  ;;  %v448_v51 = vand.u32 %v1000_v42, %v1231_v38  ;;  %v985_v52 = vcombine.high %v257_v43, %v265_v44  ;;  %v457_v56 = vand.u32 %v1003_v45, %v1231_v38  ;;  %v259_v2 = vld [vmem:[%s1227_s4 + $0x10] sm:$0xff]  ;;  %v260_v5 = vld [vmem:[%s1227_s4 + $0x18] sm:$0xff]  ;;  %v277_v6 = vld [vmem:[%s1227_s4 + $0xa0] sm:$0xff] }
  0x2f   : > { %v454_v57 = vand.u32 %v1002_v46, %v1231_v38  ;;  %v987_v58 = vcombine.high %v258_v47, %v266_v48  ;;  %v1007_v60 = vcombine.high %v276_v54, %v284_v55  ;;  %v984_v61 = vcombine.low %v257_v43, %v265_v44  ;;  %v267_v3 = vld [vmem:[%s1227_s4 + $0x50] sm:$0xff]  ;;  %v285_v7 = vld [vmem:[%s1227_s4 + $0xe0] sm:$0x11]  ;;  %v268_v8 = vld [vmem:[%s1227_s4 + $0x58] sm:$0xff] }
  0x30   : > { %507 = vmatprep.subr.bf16.mxu0 %v451_v50  ;;  %548 = vmatprep.subr.bf16.mxu1 %v457_v56  ;;  %v986_v63 = vcombine.low %v258_v47, %v266_v48  ;;  %v463_v0 = vand.u32 %v1005_v59, %v1231_v38  ;;  %v1006_v1 = vcombine.low %v276_v54, %v284_v55  ;;  %v278_v9 = vld [vmem:[%s1227_s4 + $0xa8] sm:$0xff]  ;;  %v1260_v11 = vld [vmem:[%s1349_s0] sm:$0x7]  ;;  %v279_v27 = vld [vmem:[%s1227_s4 + $0xb0] sm:$0xff] }
  0x31   : > { %508 = vmatpush1.bf16.msra.mxu0 %v448_v51  ;;  %549 = vmatpush1.bf16.msra.mxu1 %v454_v57  ;;  %v469_v4 = vand.u32 %v1007_v60, %v1231_v38  ;;  %v286_v10 = vld [vmem:[%s1227_s4 + $0xe8] sm:$0x11]  ;;  %v460_v12 = vand.u32 %v1004_v62, %v1231_v38  ;;  %v989_v14 = vcombine.high %v259_v2, %v267_v3  ;;  %v261_v23 = vld [vmem:[%s1227_s4 + $0x20] sm:$0xff]  ;;  %v287_v28 = vld [vmem:[%s1227_s4 + $0xf0] sm:$0x11] }
  0x32   : > { %509 = vmatprep.subr.bf16.mxu0 %v985_v52  ;;  %550 = vmatprep.subr.bf16.mxu1 %v987_v58  ;;  %v466_v13 = vand.u32 %v1006_v1, %v1231_v38  ;;  %v1009_v15 = vcombine.high %v277_v6, %v285_v7  ;;  %v991_v16 = vcombine.high %v260_v5, %v268_v8  ;;  %v269_v24 = vld [vmem:[%s1227_s4 + $0x60] sm:$0xff]  ;;  %v262_v26 = vld [vmem:[%s1227_s4 + $0x28] sm:$0xff]  ;;  %v280_v30 = vld [vmem:[%s1227_s4 + $0xb8] sm:$0xff] }
  0x33   : > { %v1011_v17 = vcombine.high %v278_v9, %v286_v10  ;;  %v988_v18 = vcombine.low %v259_v2, %v267_v3  ;;  %v1008_v19 = vcombine.low %v277_v6, %v285_v7  ;;  %v990_v20 = vcombine.low %v260_v5, %v268_v8  ;;  %v270_v29 = vld [vmem:[%s1227_s4 + $0x68] sm:$0xff]  ;;  %v288_v31 = vld [vmem:[%s1227_s4 + $0xf8] sm:$0x11]  ;;  %v263_v46 = vld [vmem:[%s1227_s4 + $0x30] sm:$0xff] }
  0x34   : > { %v475_v21 = vand.u32 %v1009_v15, %v1231_v38  ;;  %v1010_v22 = vcombine.low %v278_v9, %v286_v10  ;;  %v993_v35 = vcombine.high %v261_v23, %v269_v24  ;;  %v1013_v36 = vcombine.high %v279_v27, %v287_v28  ;;  %v271_v47 = vld [vmem:[%s1227_s4 + $0x70] sm:$0xff]  ;;  %v264_v48 = vld [vmem:[%s1227_s4 + $0x38] sm:$0xff] }
  0x35   : > { %510 = vmatpush1.bf16.msra.mxu0 %v984_v61  ;;  %551 = vmatpush1.bf16.msra.mxu1 %v986_v63  ;;  %v481_v25 = vand.u32 %v1011_v17, %v1231_v38  ;;  %v472_v32 = vand.u32 %v1008_v19, %v1231_v38  ;;  %v995_v37 = vcombine.high %v262_v26, %v270_v29  ;;  %v272_v49 = vld [vmem:[%s1227_s4 + $0x78] sm:$0xff] }
  0x36   : > { %589 = vmatprep.subr.bf16.mxu0 %v463_v0  ;;  %630 = vmatprep.subr.bf16.mxu1 %v469_v4  ;;  %v478_v33 = vand.u32 %v1010_v22, %v1231_v38  ;;  %v1015_v39 = vcombine.high %v280_v30, %v288_v31  ;;  %v992_v40 = vcombine.low %v261_v23, %v269_v24 }
  0x37   : > { %v1012_v41 = vcombine.low %v279_v27, %v287_v28  ;;  %v994_v42 = vcombine.low %v262_v26, %v270_v29  ;;  %v487_v43 = vand.u32 %v1013_v36, %v1231_v38  ;;  %v1014_v44 = vcombine.low %v280_v30, %v288_v31 }
  0x38   : > { %1016 = vmatmul.mubr.msk.bf16.vlgmr.msra.gmra.mxu0 %vm439_vm2, %v1260_v11  ;;  %1017 = vmatmul.mubr.msk.bf16.vlgmr.msra.gmra.mxu1 %vm439_vm2, %v1260_v11  ;;  %v493_v45 = vand.u32 %v1015_v39, %v1231_v38  ;;  %v997_v52 = vcombine.high %v263_v46, %v271_v47  ;;  %v999_v53 = vcombine.high %v264_v48, %v272_v49 }
  0x39   : > { %590 = vmatpush1.bf16.msra.mxu0 %v460_v12  ;;  %631 = vmatpush1.bf16.msra.mxu1 %v466_v13  ;;  %v484_v50 = vand.u32 %v1012_v41, %v1231_v38  ;;  %v490_v51 = vand.u32 %v1014_v44, %v1231_v38  ;;  %v996_v54 = vcombine.low %v263_v46, %v271_v47 }
  0x3a   : > { %591 = vmatprep.subr.bf16.mxu0 %v989_v14  ;;  %632 = vmatprep.subr.bf16.mxu1 %v991_v16  ;;  %v998_v55 = vcombine.low %v264_v48, %v272_v49 }
  0x3b   : > { %609 = vmatprep.mubr.bf16.mxu0 %v1095_v34  ;;  %650 = vmatprep.mubr.bf16.mxu1 %v1095_v34 }
  0x3d   : > { %592 = vmatpush1.bf16.msra.mxu0 %v988_v18  ;;  %633 = vmatpush1.bf16.msra.mxu1 %v990_v20 }
  0x3e   : > { %671 = vmatprep.subr.bf16.mxu0 %v475_v21  ;;  %712 = vmatprep.subr.bf16.mxu1 %v481_v25 }
  0x40   : > { %1018 = vmatmul.mubr.msk.bf16.vlgmr.msra.gmra.mxu0 %vm439_vm2, %v1260_v11  ;;  %1019 = vmatmul.mubr.msk.bf16.vlgmr.msra.gmra.mxu1 %vm439_vm2, %v1260_v11 }
  0x41   : > { %672 = vmatpush1.bf16.msra.mxu0 %v472_v32  ;;  %713 = vmatpush1.bf16.msra.mxu1 %v478_v33 }
  0x42   : > { %673 = vmatprep.subr.bf16.mxu0 %v993_v35  ;;  %714 = vmatprep.subr.bf16.mxu1 %v995_v37 }
  0x43   : > { %691 = vmatprep.mubr.bf16.mxu0 %v1095_v34  ;;  %732 = vmatprep.mubr.bf16.mxu1 %v1095_v34 }
  0x45   : > { %674 = vmatpush1.bf16.msra.mxu0 %v992_v40  ;;  %715 = vmatpush1.bf16.msra.mxu1 %v994_v42 }
  0x46   : > { %753 = vmatprep.subr.bf16.mxu0 %v487_v43  ;;  %794 = vmatprep.subr.bf16.mxu1 %v493_v45 }
  0x48   : > { %1020 = vmatmul.mubr.msk.bf16.vlgmr.msra.gmra.mxu0 %vm439_vm2, %v1260_v11  ;;  %1021 = vmatmul.mubr.msk.bf16.vlgmr.msra.gmra.mxu1 %vm439_vm2, %v1260_v11 }
  0x49   : > { %754 = vmatpush1.bf16.msra.mxu0 %v484_v50  ;;  %795 = vmatpush1.bf16.msra.mxu1 %v490_v51 }
  0x4a   : > { %755 = vmatprep.subr.bf16.mxu0 %v997_v52  ;;  %796 = vmatprep.subr.bf16.mxu1 %v999_v53 }
  0x4b   : > { %773 = vmatprep.mubr.bf16.mxu0 %v1095_v34  ;;  %814 = vmatprep.mubr.bf16.mxu1 %v1095_v34 }
  0x4d   : > { %756 = vmatpush1.bf16.msra.mxu0 %v996_v54  ;;  %797 = vmatpush1.bf16.msra.mxu1 %v998_v55 }
  0x50   : > { %1022 = vmatmul.mubr.msk.bf16.vlgmr.msra.gmra.mxu0 %vm439_vm2, %v1260_v11  ;;  %1023 = vmatmul.mubr.msk.bf16.vlgmr.msra.gmra.mxu1 %vm439_vm2, %v1260_v11 }
  0xa7   : > { %v1308_v38 = vpop.permute.xlu0 %292 }
  0xf8   : > { %v529_v56 = vpop.f32.mrf.mxu0  ;;  %v570_v57 = vpop.f32.mrf.mxu1 }
  0xf9   : > { %v530_v58 = vadd.f32 %v529_v56, %v1308_v38  ;;  %v571_v34 = vadd.f32 %v570_v57, %v1308_v38 }
  0xfa   : > { %v531_v59 = vpop.f32.mrf.mxu0  ;;  %v572_v61 = vpop.f32.mrf.mxu1 }
  0xfb   : > { %v532_v60 = vadd.f32 %v531_v59, %v1308_v38  ;;  %v573_v62 = vadd.f32 %v572_v61, %v1308_v38  ;;  %v823_v0 = vmax.f32 %v530_v58, 0.0  ;;  %v825_v3 = vmax.f32 %v571_v34, 0.0 }
  0xfc   : > { %v533_v63 = vpop.f32.mrf.mxu0  ;;  %v574_v2 = vpop.f32.mrf.mxu1 }
  0xfd   : > { %v824_v1 = vmax.f32 %v532_v60, 0.0  ;;  %v826_v4 = vmax.f32 %v573_v62, 0.0 }
  0xfe   : > { %v534_v5 = vpop.f32.mrf.mxu0  ;;  %v575_v7 = vpop.f32.mrf.mxu1 }
  0xff   : > { %v1035_v6 = vpack.c.bf16 %v824_v1, %v823_v0  ;;  %v1036_v8 = vpack.c.bf16 %v826_v4, %v825_v3 }
 0x100   : > { %v611_v9 = vpop.f32.mrf.mxu0  ;;  %v652_v11 = vpop.f32.mrf.mxu1 }
 0x101   : > { %903 = vst [vmem:[%s1317_s11] sm:$0x77] %v1035_v6  ;;  %v612_v10 = vadd.f32 %v611_v9, %v1308_v38  ;;  %904 = vst [vmem:[%s1317_s11 + $0x8] sm:$0x77] %v1036_v8  ;;  %v653_v12 = vadd.f32 %v652_v11, %v1308_v38 }
 0x102   : > { %v613_v13 = vpop.f32.mrf.mxu0  ;;  %v654_v15 = vpop.f32.mrf.mxu1 }
 0x103   : > { %v614_v14 = vadd.f32 %v613_v13, %v1308_v38  ;;  %v655_v16 = vadd.f32 %v654_v15, %v1308_v38  ;;  %v827_v18 = vmax.f32 %v612_v10, 0.0  ;;  %v829_v21 = vmax.f32 %v653_v12, 0.0 }
 0x104   : > { %v615_v17 = vpop.f32.mrf.mxu0  ;;  %v656_v20 = vpop.f32.mrf.mxu1 }
 0x105   : > { %v828_v19 = vmax.f32 %v614_v14, 0.0  ;;  %v830_v22 = vmax.f32 %v655_v16, 0.0 }
 0x106   : > { %v616_v23 = vpop.f32.mrf.mxu0  ;;  %v657_v25 = vpop.f32.mrf.mxu1 }
 0x107   : > { %v1037_v24 = vpack.c.bf16 %v828_v19, %v827_v18  ;;  %v1038_v26 = vpack.c.bf16 %v830_v22, %v829_v21 }
 0x108   : > { %v693_v27 = vpop.f32.mrf.mxu0  ;;  %v734_v29 = vpop.f32.mrf.mxu1 }
 0x109   : > { %905 = vst [vmem:[%s1317_s11 + $0x10] sm:$0x77] %v1037_v24  ;;  %v694_v28 = vadd.f32 %v693_v27, %v1308_v38  ;;  %906 = vst [vmem:[%s1317_s11 + $0x18] sm:$0x77] %v1038_v26  ;;  %v735_v30 = vadd.f32 %v734_v29, %v1308_v38 }
 0x10a   : > { %v695_v31 = vpop.f32.mrf.mxu0  ;;  %v736_v33 = vpop.f32.mrf.mxu1 }
 0x10b   : > { %v696_v32 = vadd.f32 %v695_v31, %v1308_v38  ;;  %v737_v35 = vadd.f32 %v736_v33, %v1308_v38  ;;  %v831_v37 = vmax.f32 %v694_v28, 0.0  ;;  %v833_v41 = vmax.f32 %v735_v30, 0.0 }
 0x10c   : > { %v697_v36 = vpop.f32.mrf.mxu0  ;;  %v738_v40 = vpop.f32.mrf.mxu1 }
 0x10d   : > { %v832_v39 = vmax.f32 %v696_v32, 0.0  ;;  %v834_v42 = vmax.f32 %v737_v35, 0.0 }
 0x10e   : > { %v698_v43 = vpop.f32.mrf.mxu0  ;;  %v739_v45 = vpop.f32.mrf.mxu1 }
 0x10f   : > { %v1039_v44 = vpack.c.bf16 %v832_v39, %v831_v37  ;;  %v1040_v46 = vpack.c.bf16 %v834_v42, %v833_v41 }
 0x110   : > { %v775_v47 = vpop.f32.mrf.mxu0  ;;  %v816_v49 = vpop.f32.mrf.mxu1 }
 0x111   : > { %907 = vst [vmem:[%s1317_s11 + $0x20] sm:$0x77] %v1039_v44  ;;  %v776_v48 = vadd.f32 %v775_v47, %v1308_v38  ;;  %908 = vst [vmem:[%s1317_s11 + $0x28] sm:$0x77] %v1040_v46  ;;  %v817_v50 = vadd.f32 %v816_v49, %v1308_v38 }
 0x112   : > { %v777_v51 = vpop.f32.mrf.mxu0  ;;  %v818_v53 = vpop.f32.mrf.mxu1 }
 0x113   : > { %v778_v52 = vadd.f32 %v777_v51, %v1308_v38  ;;  %v819_v54 = vadd.f32 %v818_v53, %v1308_v38  ;;  %v835_v56 = vmax.f32 %v776_v48, 0.0  ;;  %v837_v59 = vmax.f32 %v817_v50, 0.0 }
 0x114   : > { %v779_v55 = vpop.f32.mrf.mxu0  ;;  %v820_v58 = vpop.f32.mrf.mxu1 }
 0x115   : > { %v836_v57 = vmax.f32 %v778_v52, 0.0  ;;  %v838_v34 = vmax.f32 %v819_v54, 0.0 }
 0x116   : > { %v780_v60 = vpop.f32.mrf.mxu0  ;;  %v821_v62 = vpop.f32.mrf.mxu1 }
 0x117   : > { %v1041_v61 = vpack.c.bf16 %v836_v57, %v835_v56  ;;  %v1042_v63 = vpack.c.bf16 %v838_v34, %v837_v59 }
 0x119   : > { %909 = vst [vmem:[%s1317_s11 + $0x30] sm:$0x77] %v1041_v61  ;;  %910 = vst [vmem:[%s1317_s11 + $0x38] sm:$0x77] %v1042_v63 }
 0x11a PF: > { %p10_p9 = scmp.ge.s32.totalorder %s1133_s16, 50   ;;  %s1353_s12 = smov %s1088_s13 }
 0x11b   : > { %s1354_s13 = smov %s1142_s19  ;;  %s1355_s14 = smov %s1133_s16 }
 0x11c   :  { %12 = sbr.rel (!%p10_p9) target bundleno = 2 (0x2), region = 90 }

// kernel: net_forward.8
= control target key start
LH: loop header
LB: loop body
LE: loop exit
PB: predicated region body
PF: predicated region fallthrough
CT: control target
= control target key end

     0   :  { %s571_s15 = smov 0   ;;  %s687_s0 = inlined_call_operand.vmem [shape: bf16[160,1024], index: 0, kind: input, shape index: {}]   ;;  %s688_s1 = inlined_call_operand.vmem [shape: bf16[160,1024], index: 1, kind: input, shape index: {}]   ;;  %s689_s2 = inlined_call_operand.vmem [shape: bf16[160,1024], index: 2, kind: input, shape index: {}]   ;;  %s690_s3 = inlined_call_operand.vmem [shape: bf16[160,1024], index: 3, kind: input, shape index: {}]   ;;  %s691_s4 = inlined_call_operand.vmem [shape: bf16[160,1024], index: 4, kind: output, shape index: {}]  }
   0x1 LB: > { %s503_s16 = sadd.s32 4294967295, %s544_s15   ;;  %p507_p0 = scmp.ge.s32.totalorder %s544_s15, 1  ;;  %s544_s15 = sphi %s571_s15, %s14_s15  }
   0x2   : > { %p200_p1 = scmp.lt.s32.totalorder %s544_s15, 6 }
   0x4   : > { %p201_p2 = pnand %p507_p0, %p200_p1 }
   0x5   : > { %s508_s17 = sshll.u32 (!%p201_p2), %s503_s16, 2 }
   0x6   : > { %204 = sbr.rel (%p201_p2) target bundleno = 44 (0x2c), region = 36  ;;  %p247_p3 = scmp.lt.s32.totalorder (!%p201_p2), %s508_s17, 19 }
   0xb   : > { %s693_s17 = smov (!%p247_p3, %s508_s17), 19 }
   0xc   : > { %s525_s18 = sshll.u32 %s693_s17, 5 }
   0xd   : > { %s582_s21 = scalar_lea.vmem %s687_s0, %s525_s18  ;;  %s587_s24 = scalar_lea.vmem %s688_s1, %s525_s18 }
   0xe   : > { %s592_s27 = scalar_lea.vmem %s689_s2, %s525_s18  ;;  %s597_s30 = scalar_lea.vmem %s690_s3, %s525_s18  ;;  %v281_v0 = vld [vmem:[%s582_s21] sm:$0xff]  ;;  %v282_v2 = vld [vmem:[%s582_s21 + $0x8] sm:$0xff]  ;;  %v283_v11 = vld [vmem:[%s582_s21 + $0x10] sm:$0xff] }
   0xf   : > { %v297_v1 = vld [vmem:[%s587_s24] sm:$0xff]  ;;  %v298_v6 = vld [vmem:[%s587_s24 + $0x8] sm:$0xff]  ;;  %s611_s7 = scalar_lea.vmem %s691_s4, %s525_s18  ;;  %v299_v13 = vld [vmem:[%s587_s24 + $0x10] sm:$0xff] }
  0x10   : > { %v313_v3 = vmax.bf16 %v297_v1, %v281_v0  ;;  %v329_v4 = vld [vmem:[%s592_s27] sm:$0xff]  ;;  %v314_v8 = vmax.bf16 %v298_v6, %v282_v2  ;;  %v330_v9 = vld [vmem:[%s592_s27 + $0x8] sm:$0xff]  ;;  %v331_v14 = vld [vmem:[%s592_s27 + $0x10] sm:$0xff]  ;;  %v315_v17 = vmax.bf16 %v299_v13, %v283_v11 }
  0x11   : > { %v345_v5 = vld [vmem:[%s597_s30] sm:$0xff]  ;;  %v346_v10 = vld [vmem:[%s597_s30 + $0x8] sm:$0xff]  ;;  %v347_v15 = vld [vmem:[%s597_s30 + $0x10] sm:$0xff] }
  0x12   : > { %v361_v7 = vmax.bf16 %v345_v5, %v329_v4  ;;  %v362_v12 = vmax.bf16 %v346_v10, %v330_v9  ;;  %v363_v18 = vmax.bf16 %v347_v15, %v331_v14  ;;  %v284_v19 = vld [vmem:[%s582_s21 + $0x18] sm:$0xff]  ;;  %v285_v25 = vld [vmem:[%s582_s21 + $0x20] sm:$0xff]  ;;  %v286_v32 = vld [vmem:[%s582_s21 + $0x28] sm:$0xff] }
  0x13   : > { %v300_v20 = vld [vmem:[%s587_s24 + $0x18] sm:$0xff]  ;;  %v301_v26 = vld [vmem:[%s587_s24 + $0x20] sm:$0xff]  ;;  %v302_v34 = vld [vmem:[%s587_s24 + $0x28] sm:$0xff] }
  0x14   : > { %v377_v16 = vmax.bf16 %v361_v7, %v313_v3  ;;  %v332_v21 = vld [vmem:[%s592_s27 + $0x18] sm:$0xff]  ;;  %v378_v22 = vmax.bf16 %v362_v12, %v314_v8  ;;  %v316_v23 = vmax.bf16 %v300_v20, %v284_v19  ;;  %v379_v27 = vmax.bf16 %v363_v18, %v315_v17  ;;  %v333_v30 = vld [vmem:[%s592_s27 + $0x20] sm:$0xff]  ;;  %v334_v35 = vld [vmem:[%s592_s27 + $0x28] sm:$0xff] }
  0x15   : > { %v348_v24 = vld [vmem:[%s597_s30 + $0x18] sm:$0xff]  ;;  %v317_v29 = vmax.bf16 %v301_v26, %v285_v25  ;;  %v349_v31 = vld [vmem:[%s597_s30 + $0x20] sm:$0xff]  ;;  %v350_v36 = vld [vmem:[%s597_s30 + $0x28] sm:$0xff]  ;;  %v318_v38 = vmax.bf16 %v302_v34, %v286_v32 }
  0x16   : > { %393 = vst [vmem:[%s611_s7] sm:$0xff] %v377_v16  ;;  %v364_v28 = vmax.bf16 %v348_v24, %v332_v21  ;;  %394 = vst [vmem:[%s611_s7 + $0x8] sm:$0xff] %v378_v22  ;;  %v365_v33 = vmax.bf16 %v349_v31, %v333_v30  ;;  %v366_v39 = vmax.bf16 %v350_v36, %v334_v35  ;;  %v287_v40 = vld [vmem:[%s582_s21 + $0x30] sm:$0xff]  ;;  %v288_v46 = vld [vmem:[%s582_s21 + $0x38] sm:$0xff] }
  0x17   : > { %395 = vst [vmem:[%s611_s7 + $0x10] sm:$0xff] %v379_v27  ;;  %v303_v41 = vld [vmem:[%s587_s24 + $0x30] sm:$0xff]  ;;  %v304_v47 = vld [vmem:[%s587_s24 + $0x38] sm:$0xff]  ;;  %v289_v53 = vld [vmem:[%s582_s21 + $0x40] sm:$0xff] }
  0x18   : > { %v380_v37 = vmax.bf16 %v364_v28, %v316_v23  ;;  %v335_v42 = vld [vmem:[%s592_s27 + $0x30] sm:$0xff]  ;;  %v381_v43 = vmax.bf16 %v365_v33, %v317_v29  ;;  %v319_v44 = vmax.bf16 %v303_v41, %v287_v40  ;;  %v382_v48 = vmax.bf16 %v366_v39, %v318_v38  ;;  %v336_v51 = vld [vmem:[%s592_s27 + $0x38] sm:$0xff]  ;;  %v305_v55 = vld [vmem:[%s587_s24 + $0x40] sm:$0xff] }
  0x19   : > { %v351_v45 = vld [vmem:[%s597_s30 + $0x30] sm:$0xff]  ;;  %v320_v50 = vmax.bf16 %v304_v47, %v288_v46  ;;  %v352_v52 = vld [vmem:[%s597_s30 + $0x38] sm:$0xff]  ;;  %v337_v56 = vld [vmem:[%s592_s27 + $0x40] sm:$0xff]  ;;  %v321_v59 = vmax.bf16 %v305_v55, %v289_v53 }
  0x1a   : > { %396 = vst [vmem:[%s611_s7 + $0x18] sm:$0xff] %v380_v37  ;;  %v367_v49 = vmax.bf16 %v351_v45, %v335_v42  ;;  %397 = vst [vmem:[%s611_s7 + $0x20] sm:$0xff] %v381_v43  ;;  %v368_v54 = vmax.bf16 %v352_v52, %v336_v51  ;;  %v353_v57 = vld [vmem:[%s597_s30 + $0x40] sm:$0xff]  ;;  %v290_v61 = vld [vmem:[%s582_s21 + $0x48] sm:$0xff] }
  0x1b   : > { %398 = vst [vmem:[%s611_s7 + $0x28] sm:$0xff] %v382_v48  ;;  %v369_v60 = vmax.bf16 %v353_v57, %v337_v56  ;;  %v306_v62 = vld [vmem:[%s587_s24 + $0x48] sm:$0xff]  ;;  %v291_v3 = vld [vmem:[%s582_s21 + $0x50] sm:$0xff]  ;;  %v292_v10 = vld [vmem:[%s582_s21 + $0x58] sm:$0xff] }
  0x1c   : > { %v383_v58 = vmax.bf16 %v367_v49, %v319_v44  ;;  %v338_v63 = vld [vmem:[%s592_s27 + $0x48] sm:$0xff]  ;;  %v384_v0 = vmax.bf16 %v368_v54, %v320_v50  ;;  %v322_v1 = vmax.bf16 %v306_v62, %v290_v61  ;;  %v307_v4 = vld [vmem:[%s587_s24 + $0x50] sm:$0xff]  ;;  %v308_v12 = vld [vmem:[%s587_s24 + $0x58] sm:$0xff] }
  0x1d   : > { %v354_v2 = vld [vmem:[%s597_s30 + $0x48] sm:$0xff]  ;;  %v385_v5 = vmax.bf16 %v369_v60, %v321_v59  ;;  %v323_v7 = vmax.bf16 %v307_v4, %v291_v3  ;;  %v339_v8 = vld [vmem:[%s592_s27 + $0x50] sm:$0xff]  ;;  %v340_v13 = vld [vmem:[%s592_s27 + $0x58] sm:$0xff]  ;;  %v324_v16 = vmax.bf16 %v308_v12, %v292_v10 }
  0x1e   : > { %399 = vst [vmem:[%s611_s7 + $0x30] sm:$0xff] %v383_v58  ;;  %v370_v6 = vmax.bf16 %v354_v2, %v338_v63  ;;  %v355_v9 = vld [vmem:[%s597_s30 + $0x50] sm:$0xff]  ;;  %400 = vst [vmem:[%s611_s7 + $0x38] sm:$0xff] %v384_v0  ;;  %v356_v14 = vld [vmem:[%s597_s30 + $0x58] sm:$0xff] }
  0x1f   : > { %v371_v11 = vmax.bf16 %v355_v9, %v339_v8  ;;  %401 = vst [vmem:[%s611_s7 + $0x40] sm:$0xff] %v385_v5  ;;  %v372_v17 = vmax.bf16 %v356_v14, %v340_v13  ;;  %v293_v18 = vld [vmem:[%s582_s21 + $0x60] sm:$0xff]  ;;  %v294_v24 = vld [vmem:[%s582_s21 + $0x68] sm:$0xff]  ;;  %v295_v31 = vld [vmem:[%s582_s21 + $0x70] sm:$0xff] }
  0x20   : > { %v386_v15 = vmax.bf16 %v370_v6, %v322_v1  ;;  %v309_v19 = vld [vmem:[%s587_s24 + $0x60] sm:$0xff]  ;;  %v310_v25 = vld [vmem:[%s587_s24 + $0x68] sm:$0xff]  ;;  %v311_v33 = vld [vmem:[%s587_s24 + $0x70] sm:$0xff] }
  0x21   : > { %v341_v20 = vld [vmem:[%s592_s27 + $0x60] sm:$0xff]  ;;  %v387_v21 = vmax.bf16 %v371_v11, %v323_v7  ;;  %v325_v22 = vmax.bf16 %v309_v19, %v293_v18  ;;  %v388_v26 = vmax.bf16 %v372_v17, %v324_v16  ;;  %v326_v28 = vmax.bf16 %v310_v25, %v294_v24  ;;  %v342_v29 = vld [vmem:[%s592_s27 + $0x68] sm:$0xff]  ;;  %v343_v34 = vld [vmem:[%s592_s27 + $0x70] sm:$0xff] }
  0x22   : > { %v357_v23 = vld [vmem:[%s597_s30 + $0x60] sm:$0xff]  ;;  %402 = vst [vmem:[%s611_s7 + $0x48] sm:$0xff] %v386_v15  ;;  %v358_v30 = vld [vmem:[%s597_s30 + $0x68] sm:$0xff]  ;;  %v359_v35 = vld [vmem:[%s597_s30 + $0x70] sm:$0xff]  ;;  %v327_v37 = vmax.bf16 %v311_v33, %v295_v31 }
  0x23   : > { %v373_v27 = vmax.bf16 %v357_v23, %v341_v20  ;;  %403 = vst [vmem:[%s611_s7 + $0x50] sm:$0xff] %v387_v21  ;;  %v374_v32 = vmax.bf16 %v358_v30, %v342_v29  ;;  %404 = vst [vmem:[%s611_s7 + $0x58] sm:$0xff] %v388_v26  ;;  %v375_v38 = vmax.bf16 %v359_v35, %v343_v34  ;;  %v296_v39 = vld [vmem:[%s582_s21 + $0x78] sm:$0xff] }
  0x24   : > { %v312_v40 = vld [vmem:[%s587_s24 + $0x78] sm:$0xff] }
  0x25   : > { %v389_v36 = vmax.bf16 %v373_v27, %v325_v22  ;;  %v344_v41 = vld [vmem:[%s592_s27 + $0x78] sm:$0xff]  ;;  %v390_v42 = vmax.bf16 %v374_v32, %v326_v28  ;;  %v328_v43 = vmax.bf16 %v312_v40, %v296_v39  ;;  %v391_v45 = vmax.bf16 %v375_v38, %v327_v37 }
  0x26   : > { %v360_v44 = vld [vmem:[%s597_s30 + $0x78] sm:$0xff] }
  0x27   : > { %405 = vst [vmem:[%s611_s7 + $0x60] sm:$0xff] %v389_v36  ;;  %v376_v46 = vmax.bf16 %v360_v44, %v344_v41  ;;  %406 = vst [vmem:[%s611_s7 + $0x68] sm:$0xff] %v390_v42 }
  0x28   : > { %407 = vst [vmem:[%s611_s7 + $0x70] sm:$0xff] %v391_v45 }
  0x29   : > { %v392_v47 = vmax.bf16 %v376_v46, %v328_v43 }
  0x2b   : > { %408 = vst [vmem:[%s611_s7 + $0x78] sm:$0xff] %v392_v47 }
  0x2c PF: > { %s14_s15 = sadd.s32 1, %s544_s15  }
  0x2d   : > { %p11_p4 = scmp.ge.s32.totalorder %s14_s15, 7  }
  0x2f   :  { %13 = sbr.rel (!%p11_p4) target bundleno = 1 (0x1), region = 75 }

// kernel: net_forward.9
= control target key start
LH: loop header
LB: loop body
LE: loop exit
PB: predicated region body
PF: predicated region fallthrough
CT: control target
= control target key end

     0   :  { %s2396_s12 = smov 0   ;;  %s2398_s13 = smov 0   ;;  %s3048_s0 = inlined_call_operand.vmem [shape: bf16[16,150], index: 0, kind: input, shape index: {}]   ;;  %s3049_s1 = inlined_call_operand.vmem [shape: bf16[150,22528], index: 1, kind: input, shape index: {}]   ;;  %s3050_s2 = inlined_call_operand.vmem [shape: f32[16,1], index: 2, kind: input, shape index: {}]   ;;  %s3051_s3 = inlined_call_operand.vmem [shape: bf16[16,22528], index: 3, kind: output, shape index: {}]  }
   0x1   :  { %s2400_s14 = smov 0  }
   0x2 LB: > { %s2079_s15 = sadd.s32 4294967295, %s2373_s14   ;;  %s2413_s16 = sadd.s32 1, %s2373_s14   ;;  %s2373_s14 = sphi %s2400_s14, %s3055_s14   ;;  %s2369_s13 = sphi %s2398_s13, %s3054_s13   ;;  %s2365_s12 = sphi %s2396_s12, %s3053_s12  }
   0x3   : > { %s38_s17 = ssub.s32 %s2373_s14, %s2413_s16  ;;  %s41_s18 = sadd.s32 1, %s2369_s13 }
   0x4   : > { %p39_p0 = scmp.eq.s32.totalorder %s38_s17, 0  ;;  %p48_p1 = scmp.ne.s32.totalorder %s2369_s13, %s2365_s12 }
   0x5   : > { %p49_p2 = scmp.eq.s32.totalorder %s2373_s14, 0  ;;  %p99_p3 = scmp.eq.s32.totalorder %s2079_s15, 10 }
   0x6   : > { %s2424_s19 = scalar_select %p39_p0, %s2369_s13, %s41_s18  }
   0x7   : > { %p50_p4 = por %p49_p2, %p48_p1  ;;  %p2426_p5 = por %p99_p3, %p48_p1 }
   0x8   : > { %p2082_p6 = scmp.ge.s32.totalorder %s2373_s14, 11 }
   0xa   : > { %127 = sbr.rel (%p2082_p6) target bundleno = 96 (0x60), region = 24 }
   0xf   : > { %130 = sbr.rel (!%p50_p4) target bundleno = 96 (0x60), region = 28  ;;  %s132_s21 = sand.u32 (%p50_p4), 1, %s2369_s13  }
  0x10   : > { %s2286_s22 = sshll.u32 (%p50_p4), %s2373_s14, 6  ;;  %s2304_s23 = smul.u32 (%p50_p4), 1216, %s132_s21 }
  0x11   : > { %s2436_s26 = scalar_lea.vmem (%p50_p4), %s3049_s1, %s2286_s22 }
  0x12   : > { %v150_v0 = vld [vmem:[%s2436_s26] sm:$0xff] (%p50_p4)  ;;  %v152_v1 = vld [vmem:[%s2436_s26 + $0x8] sm:$0xff] (%p50_p4)  ;;  %v154_v2 = vld [vmem:[%s2436_s26 + $0x10] sm:$0xff] (%p50_p4)  ;;  %s2444_s27 = scalar_lea.vmem (%p50_p4), [#allocation2], %s2304_s23 }
  0x13   : > { %v156_v3 = vld [vmem:[%s2436_s26 + $0x18] sm:$0xff] (%p50_p4)  ;;  %v158_v4 = vld [vmem:[%s2436_s26 + $0x20] sm:$0xff] (%p50_p4)  ;;  %v160_v5 = vld [vmem:[%s2436_s26 + $0x28] sm:$0xff] (%p50_p4)  ;;  %151 = vst [vmem:[%s2444_s27] sm:$0xff] (%p50_p4), %v150_v0 }
  0x14   : > { %153 = vst [vmem:[%s2444_s27 + $0x8] sm:$0xff] %v152_v1  ;;  %155 = vst [vmem:[%s2444_s27 + $0x10] sm:$0xff] %v154_v2  ;;  %v162_v6 = vld [vmem:[%s2436_s26 + $0x30] sm:$0xff]  ;;  %v164_v7 = vld [vmem:[%s2436_s26 + $0x38] sm:$0xff] }
  0x15   : > { %157 = vst [vmem:[%s2444_s27 + $0x18] sm:$0xff] %v156_v3  ;;  %159 = vst [vmem:[%s2444_s27 + $0x20] sm:$0xff] %v158_v4  ;;  %v166_v8 = vld [vmem:[%s2436_s26 + $0x2c0] sm:$0xff]  ;;  %v168_v9 = vld [vmem:[%s2436_s26 + $0x2c8] sm:$0xff] }
  0x16   : > { %161 = vst [vmem:[%s2444_s27 + $0x28] sm:$0xff] %v160_v5  ;;  %163 = vst [vmem:[%s2444_s27 + $0x30] sm:$0xff] %v162_v6  ;;  %v170_v10 = vld [vmem:[%s2436_s26 + $0x2d0] sm:$0xff]  ;;  %v172_v11 = vld [vmem:[%s2436_s26 + $0x2d8] sm:$0xff] }
  0x17   : > { %165 = vst [vmem:[%s2444_s27 + $0x38] sm:$0xff] %v164_v7  ;;  %167 = vst [vmem:[%s2444_s27 + $0x40] sm:$0xff] %v166_v8  ;;  %v174_v12 = vld [vmem:[%s2436_s26 + $0x2e0] sm:$0xff]  ;;  %v176_v13 = vld [vmem:[%s2436_s26 + $0x2e8] sm:$0xff] }
  0x18   : > { %169 = vst [vmem:[%s2444_s27 + $0x48] sm:$0xff] %v168_v9  ;;  %171 = vst [vmem:[%s2444_s27 + $0x50] sm:$0xff] %v170_v10  ;;  %v178_v14 = vld [vmem:[%s2436_s26 + $0x2f0] sm:$0xff]  ;;  %v180_v15 = vld [vmem:[%s2436_s26 + $0x2f8] sm:$0xff] }
  0x19   : > { %173 = vst [vmem:[%s2444_s27 + $0x58] sm:$0xff] %v172_v11  ;;  %175 = vst [vmem:[%s2444_s27 + $0x60] sm:$0xff] %v174_v12  ;;  %v182_v16 = vld [vmem:[%s2436_s26 + $0x580] sm:$0xff]  ;;  %v184_v17 = vld [vmem:[%s2436_s26 + $0x588] sm:$0xff] }
  0x1a   : > { %177 = vst [vmem:[%s2444_s27 + $0x68] sm:$0xff] %v176_v13  ;;  %179 = vst [vmem:[%s2444_s27 + $0x70] sm:$0xff] %v178_v14  ;;  %v186_v18 = vld [vmem:[%s2436_s26 + $0x590] sm:$0xff]  ;;  %v188_v19 = vld [vmem:[%s2436_s26 + $0x598] sm:$0xff] }
  0x1b   : > { %181 = vst [vmem:[%s2444_s27 + $0x78] sm:$0xff] %v180_v15  ;;  %183 = vst [vmem:[%s2444_s27 + $0x80] sm:$0xff] %v182_v16  ;;  %v190_v20 = vld [vmem:[%s2436_s26 + $0x5a0] sm:$0xff]  ;;  %v192_v21 = vld [vmem:[%s2436_s26 + $0x5a8] sm:$0xff] }
  0x1c   : > { %185 = vst [vmem:[%s2444_s27 + $0x88] sm:$0xff] %v184_v17  ;;  %187 = vst [vmem:[%s2444_s27 + $0x90] sm:$0xff] %v186_v18  ;;  %v194_v22 = vld [vmem:[%s2436_s26 + $0x5b0] sm:$0xff]  ;;  %v196_v23 = vld [vmem:[%s2436_s26 + $0x5b8] sm:$0xff] }
  0x1d   : > { %189 = vst [vmem:[%s2444_s27 + $0x98] sm:$0xff] %v188_v19  ;;  %191 = vst [vmem:[%s2444_s27 + $0xa0] sm:$0xff] %v190_v20  ;;  %v198_v24 = vld [vmem:[%s2436_s26 + $0x840] sm:$0xff]  ;;  %v200_v25 = vld [vmem:[%s2436_s26 + $0x848] sm:$0xff] }
  0x1e   : > { %193 = vst [vmem:[%s2444_s27 + $0xa8] sm:$0xff] %v192_v21  ;;  %195 = vst [vmem:[%s2444_s27 + $0xb0] sm:$0xff] %v194_v22  ;;  %v202_v26 = vld [vmem:[%s2436_s26 + $0x850] sm:$0xff]  ;;  %v204_v27 = vld [vmem:[%s2436_s26 + $0x858] sm:$0xff] }
  0x1f   : > { %197 = vst [vmem:[%s2444_s27 + $0xb8] sm:$0xff] %v196_v23  ;;  %199 = vst [vmem:[%s2444_s27 + $0xc0] sm:$0xff] %v198_v24  ;;  %v206_v28 = vld [vmem:[%s2436_s26 + $0x860] sm:$0xff]  ;;  %v208_v29 = vld [vmem:[%s2436_s26 + $0x868] sm:$0xff] }
  0x20   : > { %201 = vst [vmem:[%s2444_s27 + $0xc8] sm:$0xff] %v200_v25  ;;  %203 = vst [vmem:[%s2444_s27 + $0xd0] sm:$0xff] %v202_v26  ;;  %v210_v30 = vld [vmem:[%s2436_s26 + $0x870] sm:$0xff]  ;;  %v212_v31 = vld [vmem:[%s2436_s26 + $0x878] sm:$0xff] }
  0x21   : > { %205 = vst [vmem:[%s2444_s27 + $0xd8] sm:$0xff] %v204_v27  ;;  %207 = vst [vmem:[%s2444_s27 + $0xe0] sm:$0xff] %v206_v28  ;;  %v214_v32 = vld [vmem:[%s2436_s26 + $0xb00] sm:$0xff]  ;;  %v216_v33 = vld [vmem:[%s2436_s26 + $0xb08] sm:$0xff] }
  0x22   : > { %209 = vst [vmem:[%s2444_s27 + $0xe8] sm:$0xff] %v208_v29  ;;  %211 = vst [vmem:[%s2444_s27 + $0xf0] sm:$0xff] %v210_v30  ;;  %v218_v34 = vld [vmem:[%s2436_s26 + $0xb10] sm:$0xff]  ;;  %v220_v35 = vld [vmem:[%s2436_s26 + $0xb18] sm:$0xff] }
  0x23   : > { %213 = vst [vmem:[%s2444_s27 + $0xf8] sm:$0xff] %v212_v31  ;;  %215 = vst [vmem:[%s2444_s27 + $0x100] sm:$0xff] %v214_v32  ;;  %v222_v36 = vld [vmem:[%s2436_s26 + $0xb20] sm:$0xff]  ;;  %v224_v37 = vld [vmem:[%s2436_s26 + $0xb28] sm:$0xff] }
  0x24   : > { %217 = vst [vmem:[%s2444_s27 + $0x108] sm:$0xff] %v216_v33  ;;  %219 = vst [vmem:[%s2444_s27 + $0x110] sm:$0xff] %v218_v34  ;;  %v226_v38 = vld [vmem:[%s2436_s26 + $0xb30] sm:$0xff]  ;;  %v228_v39 = vld [vmem:[%s2436_s26 + $0xb38] sm:$0xff] }
  0x25   : > { %221 = vst [vmem:[%s2444_s27 + $0x118] sm:$0xff] %v220_v35  ;;  %223 = vst [vmem:[%s2444_s27 + $0x120] sm:$0xff] %v222_v36  ;;  %v230_v40 = vld [vmem:[%s2436_s26 + $0xdc0] sm:$0xff]  ;;  %v232_v41 = vld [vmem:[%s2436_s26 + $0xdc8] sm:$0xff] }
  0x26   : > { %225 = vst [vmem:[%s2444_s27 + $0x128] sm:$0xff] %v224_v37  ;;  %227 = vst [vmem:[%s2444_s27 + $0x130] sm:$0xff] %v226_v38  ;;  %v234_v42 = vld [vmem:[%s2436_s26 + $0xdd0] sm:$0xff]  ;;  %v236_v43 = vld [vmem:[%s2436_s26 + $0xdd8] sm:$0xff] }
  0x27   : > { %229 = vst [vmem:[%s2444_s27 + $0x138] sm:$0xff] %v228_v39  ;;  %231 = vst [vmem:[%s2444_s27 + $0x140] sm:$0xff] %v230_v40  ;;  %v238_v44 = vld [vmem:[%s2436_s26 + $0xde0] sm:$0xff]  ;;  %v240_v45 = vld [vmem:[%s2436_s26 + $0xde8] sm:$0xff] }
  0x28   : > { %233 = vst [vmem:[%s2444_s27 + $0x148] sm:$0xff] %v232_v41  ;;  %235 = vst [vmem:[%s2444_s27 + $0x150] sm:$0xff] %v234_v42  ;;  %v242_v46 = vld [vmem:[%s2436_s26 + $0xdf0] sm:$0xff]  ;;  %v244_v47 = vld [vmem:[%s2436_s26 + $0xdf8] sm:$0xff] }
  0x29   : > { %237 = vst [vmem:[%s2444_s27 + $0x158] sm:$0xff] %v236_v43  ;;  %239 = vst [vmem:[%s2444_s27 + $0x160] sm:$0xff] %v238_v44  ;;  %v246_v48 = vld [vmem:[%s2436_s26 + $0x1080] sm:$0xff]  ;;  %v248_v49 = vld [vmem:[%s2436_s26 + $0x1088] sm:$0xff] }
  0x2a   : > { %241 = vst [vmem:[%s2444_s27 + $0x168] sm:$0xff] %v240_v45  ;;  %243 = vst [vmem:[%s2444_s27 + $0x170] sm:$0xff] %v242_v46  ;;  %v250_v50 = vld [vmem:[%s2436_s26 + $0x1090] sm:$0xff]  ;;  %v252_v51 = vld [vmem:[%s2436_s26 + $0x1098] sm:$0xff] }
  0x2b   : > { %245 = vst [vmem:[%s2444_s27 + $0x178] sm:$0xff] %v244_v47  ;;  %247 = vst [vmem:[%s2444_s27 + $0x180] sm:$0xff] %v246_v48  ;;  %v254_v52 = vld [vmem:[%s2436_s26 + $0x10a0] sm:$0xff]  ;;  %v256_v53 = vld [vmem:[%s2436_s26 + $0x10a8] sm:$0xff] }
  0x2c   : > { %249 = vst [vmem:[%s2444_s27 + $0x188] sm:$0xff] %v248_v49  ;;  %251 = vst [vmem:[%s2444_s27 + $0x190] sm:$0xff] %v250_v50  ;;  %v258_v54 = vld [vmem:[%s2436_s26 + $0x10b0] sm:$0xff]  ;;  %v260_v55 = vld [vmem:[%s2436_s26 + $0x10b8] sm:$0xff] }
  0x2d   : > { %253 = vst [vmem:[%s2444_s27 + $0x198] sm:$0xff] %v252_v51  ;;  %255 = vst [vmem:[%s2444_s27 + $0x1a0] sm:$0xff] %v254_v52  ;;  %v262_v56 = vld [vmem:[%s2436_s26 + $0x1340] sm:$0xff]  ;;  %v264_v57 = vld [vmem:[%s2436_s26 + $0x1348] sm:$0xff] }
  0x2e   : > { %257 = vst [vmem:[%s2444_s27 + $0x1a8] sm:$0xff] %v256_v53  ;;  %259 = vst [vmem:[%s2444_s27 + $0x1b0] sm:$0xff] %v258_v54  ;;  %v266_v58 = vld [vmem:[%s2436_s26 + $0x1350] sm:$0xff]  ;;  %v268_v59 = vld [vmem:[%s2436_s26 + $0x1358] sm:$0xff] }
  0x2f   : > { %261 = vst [vmem:[%s2444_s27 + $0x1b8] sm:$0xff] %v260_v55  ;;  %263 = vst [vmem:[%s2444_s27 + $0x1c0] sm:$0xff] %v262_v56  ;;  %v270_v60 = vld [vmem:[%s2436_s26 + $0x1360] sm:$0xff]  ;;  %v272_v61 = vld [vmem:[%s2436_s26 + $0x1368] sm:$0xff] }
  0x30   : > { %265 = vst [vmem:[%s2444_s27 + $0x1c8] sm:$0xff] %v264_v57  ;;  %267 = vst [vmem:[%s2444_s27 + $0x1d0] sm:$0xff] %v266_v58  ;;  %v274_v62 = vld [vmem:[%s2436_s26 + $0x1370] sm:$0xff]  ;;  %v276_v63 = vld [vmem:[%s2436_s26 + $0x1378] sm:$0xff] }
  0x31   : > { %269 = vst [vmem:[%s2444_s27 + $0x1d8] sm:$0xff] %v268_v59  ;;  %271 = vst [vmem:[%s2444_s27 + $0x1e0] sm:$0xff] %v270_v60  ;;  %v278_v0 = vld [vmem:[%s2436_s26 + $0x1600] sm:$0xff]  ;;  %v280_v1 = vld [vmem:[%s2436_s26 + $0x1608] sm:$0xff] }
  0x32   : > { %273 = vst [vmem:[%s2444_s27 + $0x1e8] sm:$0xff] %v272_v61  ;;  %275 = vst [vmem:[%s2444_s27 + $0x1f0] sm:$0xff] %v274_v62  ;;  %v282_v2 = vld [vmem:[%s2436_s26 + $0x1610] sm:$0xff]  ;;  %v284_v3 = vld [vmem:[%s2436_s26 + $0x1618] sm:$0xff] }
  0x33   : > { %277 = vst [vmem:[%s2444_s27 + $0x1f8] sm:$0xff] %v276_v63  ;;  %279 = vst [vmem:[%s2444_s27 + $0x200] sm:$0xff] %v278_v0  ;;  %v286_v4 = vld [vmem:[%s2436_s26 + $0x1620] sm:$0xff]  ;;  %v288_v5 = vld [vmem:[%s2436_s26 + $0x1628] sm:$0xff] }
  0x34   : > { %281 = vst [vmem:[%s2444_s27 + $0x208] sm:$0xff] %v280_v1  ;;  %283 = vst [vmem:[%s2444_s27 + $0x210] sm:$0xff] %v282_v2  ;;  %v290_v6 = vld [vmem:[%s2436_s26 + $0x1630] sm:$0xff]  ;;  %v292_v7 = vld [vmem:[%s2436_s26 + $0x1638] sm:$0xff] }
  0x35   : > { %285 = vst [vmem:[%s2444_s27 + $0x218] sm:$0xff] %v284_v3  ;;  %287 = vst [vmem:[%s2444_s27 + $0x220] sm:$0xff] %v286_v4  ;;  %v294_v8 = vld [vmem:[%s2436_s26 + $0x18c0] sm:$0xff]  ;;  %v296_v9 = vld [vmem:[%s2436_s26 + $0x18c8] sm:$0xff] }
  0x36   : > { %289 = vst [vmem:[%s2444_s27 + $0x228] sm:$0xff] %v288_v5  ;;  %291 = vst [vmem:[%s2444_s27 + $0x230] sm:$0xff] %v290_v6  ;;  %v298_v10 = vld [vmem:[%s2436_s26 + $0x18d0] sm:$0xff]  ;;  %v300_v11 = vld [vmem:[%s2436_s26 + $0x18d8] sm:$0xff] }
  0x37   : > { %293 = vst [vmem:[%s2444_s27 + $0x238] sm:$0xff] %v292_v7  ;;  %295 = vst [vmem:[%s2444_s27 + $0x240] sm:$0xff] %v294_v8  ;;  %v302_v12 = vld [vmem:[%s2436_s26 + $0x18e0] sm:$0xff]  ;;  %v304_v13 = vld [vmem:[%s2436_s26 + $0x18e8] sm:$0xff] }
  0x38   : > { %297 = vst [vmem:[%s2444_s27 + $0x248] sm:$0xff] %v296_v9  ;;  %299 = vst [vmem:[%s2444_s27 + $0x250] sm:$0xff] %v298_v10  ;;  %v306_v14 = vld [vmem:[%s2436_s26 + $0x18f0] sm:$0xff]  ;;  %v308_v15 = vld [vmem:[%s2436_s26 + $0x18f8] sm:$0xff] }
  0x39   : > { %301 = vst [vmem:[%s2444_s27 + $0x258] sm:$0xff] %v300_v11  ;;  %303 = vst [vmem:[%s2444_s27 + $0x260] sm:$0xff] %v302_v12  ;;  %v310_v16 = vld [vmem:[%s2436_s26 + $0x1b80] sm:$0xff]  ;;  %v312_v17 = vld [vmem:[%s2436_s26 + $0x1b88] sm:$0xff] }
  0x3a   : > { %305 = vst [vmem:[%s2444_s27 + $0x268] sm:$0xff] %v304_v13  ;;  %307 = vst [vmem:[%s2444_s27 + $0x270] sm:$0xff] %v306_v14  ;;  %v314_v18 = vld [vmem:[%s2436_s26 + $0x1b90] sm:$0xff]  ;;  %v316_v19 = vld [vmem:[%s2436_s26 + $0x1b98] sm:$0xff] }
  0x3b   : > { %309 = vst [vmem:[%s2444_s27 + $0x278] sm:$0xff] %v308_v15  ;;  %311 = vst [vmem:[%s2444_s27 + $0x280] sm:$0xff] %v310_v16  ;;  %v318_v20 = vld [vmem:[%s2436_s26 + $0x1ba0] sm:$0xff]  ;;  %v320_v21 = vld [vmem:[%s2436_s26 + $0x1ba8] sm:$0xff] }
  0x3c   : > { %313 = vst [vmem:[%s2444_s27 + $0x288] sm:$0xff] %v312_v17  ;;  %315 = vst [vmem:[%s2444_s27 + $0x290] sm:$0xff] %v314_v18  ;;  %v322_v22 = vld [vmem:[%s2436_s26 + $0x1bb0] sm:$0xff]  ;;  %v324_v23 = vld [vmem:[%s2436_s26 + $0x1bb8] sm:$0xff] }
  0x3d   : > { %317 = vst [vmem:[%s2444_s27 + $0x298] sm:$0xff] %v316_v19  ;;  %319 = vst [vmem:[%s2444_s27 + $0x2a0] sm:$0xff] %v318_v20  ;;  %v326_v24 = vld [vmem:[%s2436_s26 + $0x1e40] sm:$0xff]  ;;  %v328_v25 = vld [vmem:[%s2436_s26 + $0x1e48] sm:$0xff] }
  0x3e   : > { %321 = vst [vmem:[%s2444_s27 + $0x2a8] sm:$0xff] %v320_v21  ;;  %323 = vst [vmem:[%s2444_s27 + $0x2b0] sm:$0xff] %v322_v22  ;;  %v330_v26 = vld [vmem:[%s2436_s26 + $0x1e50] sm:$0xff]  ;;  %v332_v27 = vld [vmem:[%s2436_s26 + $0x1e58] sm:$0xff] }
  0x3f   : > { %325 = vst [vmem:[%s2444_s27 + $0x2b8] sm:$0xff] %v324_v23  ;;  %327 = vst [vmem:[%s2444_s27 + $0x2c0] sm:$0xff] %v326_v24  ;;  %v334_v28 = vld [vmem:[%s2436_s26 + $0x1e60] sm:$0xff]  ;;  %v336_v29 = vld [vmem:[%s2436_s26 + $0x1e68] sm:$0xff] }
  0x40   : > { %329 = vst [vmem:[%s2444_s27 + $0x2c8] sm:$0xff] %v328_v25  ;;  %331 = vst [vmem:[%s2444_s27 + $0x2d0] sm:$0xff] %v330_v26  ;;  %v338_v30 = vld [vmem:[%s2436_s26 + $0x1e70] sm:$0xff]  ;;  %v340_v31 = vld [vmem:[%s2436_s26 + $0x1e78] sm:$0xff] }
  0x41   : > { %333 = vst [vmem:[%s2444_s27 + $0x2d8] sm:$0xff] %v332_v27  ;;  %335 = vst [vmem:[%s2444_s27 + $0x2e0] sm:$0xff] %v334_v28  ;;  %v342_v32 = vld [vmem:[%s2436_s26 + $0x2100] sm:$0xff]  ;;  %v344_v33 = vld [vmem:[%s2436_s26 + $0x2108] sm:$0xff] }
  0x42   : > { %337 = vst [vmem:[%s2444_s27 + $0x2e8] sm:$0xff] %v336_v29  ;;  %339 = vst [vmem:[%s2444_s27 + $0x2f0] sm:$0xff] %v338_v30  ;;  %v346_v34 = vld [vmem:[%s2436_s26 + $0x2110] sm:$0xff]  ;;  %v348_v35 = vld [vmem:[%s2436_s26 + $0x2118] sm:$0xff] }
  0x43   : > { %341 = vst [vmem:[%s2444_s27 + $0x2f8] sm:$0xff] %v340_v31  ;;  %343 = vst [vmem:[%s2444_s27 + $0x300] sm:$0xff] %v342_v32  ;;  %v350_v36 = vld [vmem:[%s2436_s26 + $0x2120] sm:$0xff]  ;;  %v352_v37 = vld [vmem:[%s2436_s26 + $0x2128] sm:$0xff] }
  0x44   : > { %345 = vst [vmem:[%s2444_s27 + $0x308] sm:$0xff] %v344_v33  ;;  %347 = vst [vmem:[%s2444_s27 + $0x310] sm:$0xff] %v346_v34  ;;  %v354_v38 = vld [vmem:[%s2436_s26 + $0x2130] sm:$0xff]  ;;  %v356_v39 = vld [vmem:[%s2436_s26 + $0x2138] sm:$0xff] }
  0x45   : > { %349 = vst [vmem:[%s2444_s27 + $0x318] sm:$0xff] %v348_v35  ;;  %351 = vst [vmem:[%s2444_s27 + $0x320] sm:$0xff] %v350_v36  ;;  %v358_v40 = vld [vmem:[%s2436_s26 + $0x23c0] sm:$0xff]  ;;  %v360_v41 = vld [vmem:[%s2436_s26 + $0x23c8] sm:$0xff] }
  0x46   : > { %353 = vst [vmem:[%s2444_s27 + $0x328] sm:$0xff] %v352_v37  ;;  %355 = vst [vmem:[%s2444_s27 + $0x330] sm:$0xff] %v354_v38  ;;  %v362_v42 = vld [vmem:[%s2436_s26 + $0x23d0] sm:$0xff]  ;;  %v364_v43 = vld [vmem:[%s2436_s26 + $0x23d8] sm:$0xff] }
  0x47   : > { %357 = vst [vmem:[%s2444_s27 + $0x338] sm:$0xff] %v356_v39  ;;  %359 = vst [vmem:[%s2444_s27 + $0x340] sm:$0xff] %v358_v40  ;;  %v366_v44 = vld [vmem:[%s2436_s26 + $0x23e0] sm:$0xff]  ;;  %v368_v45 = vld [vmem:[%s2436_s26 + $0x23e8] sm:$0xff] }
  0x48   : > { %361 = vst [vmem:[%s2444_s27 + $0x348] sm:$0xff] %v360_v41  ;;  %363 = vst [vmem:[%s2444_s27 + $0x350] sm:$0xff] %v362_v42  ;;  %v370_v46 = vld [vmem:[%s2436_s26 + $0x23f0] sm:$0xff]  ;;  %v372_v47 = vld [vmem:[%s2436_s26 + $0x23f8] sm:$0xff] }
  0x49   : > { %365 = vst [vmem:[%s2444_s27 + $0x358] sm:$0xff] %v364_v43  ;;  %367 = vst [vmem:[%s2444_s27 + $0x360] sm:$0xff] %v366_v44  ;;  %v374_v48 = vld [vmem:[%s2436_s26 + $0x2680] sm:$0xff]  ;;  %v376_v49 = vld [vmem:[%s2436_s26 + $0x2688] sm:$0xff] }
  0x4a   : > { %369 = vst [vmem:[%s2444_s27 + $0x368] sm:$0xff] %v368_v45  ;;  %371 = vst [vmem:[%s2444_s27 + $0x370] sm:$0xff] %v370_v46  ;;  %v378_v50 = vld [vmem:[%s2436_s26 + $0x2690] sm:$0xff]  ;;  %v380_v51 = vld [vmem:[%s2436_s26 + $0x2698] sm:$0xff] }
  0x4b   : > { %373 = vst [vmem:[%s2444_s27 + $0x378] sm:$0xff] %v372_v47  ;;  %375 = vst [vmem:[%s2444_s27 + $0x380] sm:$0xff] %v374_v48  ;;  %v382_v52 = vld [vmem:[%s2436_s26 + $0x26a0] sm:$0xff]  ;;  %v384_v53 = vld [vmem:[%s2436_s26 + $0x26a8] sm:$0xff] }
  0x4c   : > { %377 = vst [vmem:[%s2444_s27 + $0x388] sm:$0xff] %v376_v49  ;;  %379 = vst [vmem:[%s2444_s27 + $0x390] sm:$0xff] %v378_v50  ;;  %v386_v54 = vld [vmem:[%s2436_s26 + $0x26b0] sm:$0xff]  ;;  %v388_v55 = vld [vmem:[%s2436_s26 + $0x26b8] sm:$0xff] }
  0x4d   : > { %381 = vst [vmem:[%s2444_s27 + $0x398] sm:$0xff] %v380_v51  ;;  %383 = vst [vmem:[%s2444_s27 + $0x3a0] sm:$0xff] %v382_v52  ;;  %v390_v56 = vld [vmem:[%s2436_s26 + $0x2940] sm:$0xff]  ;;  %v392_v57 = vld [vmem:[%s2436_s26 + $0x2948] sm:$0xff] }
  0x4e   : > { %385 = vst [vmem:[%s2444_s27 + $0x3a8] sm:$0xff] %v384_v53  ;;  %387 = vst [vmem:[%s2444_s27 + $0x3b0] sm:$0xff] %v386_v54  ;;  %v394_v58 = vld [vmem:[%s2436_s26 + $0x2950] sm:$0xff]  ;;  %v396_v59 = vld [vmem:[%s2436_s26 + $0x2958] sm:$0xff] }
  0x4f   : > { %389 = vst [vmem:[%s2444_s27 + $0x3b8] sm:$0xff] %v388_v55  ;;  %391 = vst [vmem:[%s2444_s27 + $0x3c0] sm:$0xff] %v390_v56  ;;  %v398_v60 = vld [vmem:[%s2436_s26 + $0x2960] sm:$0xff]  ;;  %v400_v61 = vld [vmem:[%s2436_s26 + $0x2968] sm:$0xff] }
  0x50   : > { %393 = vst [vmem:[%s2444_s27 + $0x3c8] sm:$0xff] %v392_v57  ;;  %395 = vst [vmem:[%s2444_s27 + $0x3d0] sm:$0xff] %v394_v58  ;;  %v402_v62 = vld [vmem:[%s2436_s26 + $0x2970] sm:$0xff]  ;;  %v404_v63 = vld [vmem:[%s2436_s26 + $0x2978] sm:$0xff] }
  0x51   : > { %397 = vst [vmem:[%s2444_s27 + $0x3d8] sm:$0xff] %v396_v59  ;;  %399 = vst [vmem:[%s2444_s27 + $0x3e0] sm:$0xff] %v398_v60  ;;  %v406_v0 = vld [vmem:[%s2436_s26 + $0x2c00] sm:$0xff]  ;;  %v408_v1 = vld [vmem:[%s2436_s26 + $0x2c08] sm:$0xff] }
  0x52   : > { %401 = vst [vmem:[%s2444_s27 + $0x3e8] sm:$0xff] %v400_v61  ;;  %403 = vst [vmem:[%s2444_s27 + $0x3f0] sm:$0xff] %v402_v62  ;;  %v410_v2 = vld [vmem:[%s2436_s26 + $0x2c10] sm:$0xff]  ;;  %v412_v3 = vld [vmem:[%s2436_s26 + $0x2c18] sm:$0xff] }
  0x53   : > { %405 = vst [vmem:[%s2444_s27 + $0x3f8] sm:$0xff] %v404_v63  ;;  %407 = vst [vmem:[%s2444_s27 + $0x400] sm:$0xff] %v406_v0  ;;  %v414_v4 = vld [vmem:[%s2436_s26 + $0x2c20] sm:$0xff]  ;;  %v416_v5 = vld [vmem:[%s2436_s26 + $0x2c28] sm:$0xff] }
  0x54   : > { %409 = vst [vmem:[%s2444_s27 + $0x408] sm:$0xff] %v408_v1  ;;  %411 = vst [vmem:[%s2444_s27 + $0x410] sm:$0xff] %v410_v2  ;;  %v418_v6 = vld [vmem:[%s2436_s26 + $0x2c30] sm:$0xff]  ;;  %v420_v7 = vld [vmem:[%s2436_s26 + $0x2c38] sm:$0xff] }
  0x55   : > { %413 = vst [vmem:[%s2444_s27 + $0x418] sm:$0xff] %v412_v3  ;;  %415 = vst [vmem:[%s2444_s27 + $0x420] sm:$0xff] %v414_v4  ;;  %v422_v8 = vld [vmem:[%s2436_s26 + $0x2ec0] sm:$0xff]  ;;  %v424_v9 = vld [vmem:[%s2436_s26 + $0x2ec8] sm:$0xff] }
  0x56   : > { %417 = vst [vmem:[%s2444_s27 + $0x428] sm:$0xff] %v416_v5  ;;  %419 = vst [vmem:[%s2444_s27 + $0x430] sm:$0xff] %v418_v6  ;;  %v426_v10 = vld [vmem:[%s2436_s26 + $0x2ed0] sm:$0xff]  ;;  %v428_v11 = vld [vmem:[%s2436_s26 + $0x2ed8] sm:$0xff] }
  0x57   : > { %421 = vst [vmem:[%s2444_s27 + $0x438] sm:$0xff] %v420_v7  ;;  %423 = vst [vmem:[%s2444_s27 + $0x440] sm:$0xff] %v422_v8  ;;  %v430_v12 = vld [vmem:[%s2436_s26 + $0x2ee0] sm:$0xff]  ;;  %v432_v13 = vld [vmem:[%s2436_s26 + $0x2ee8] sm:$0xff] }
  0x58   : > { %425 = vst [vmem:[%s2444_s27 + $0x448] sm:$0xff] %v424_v9  ;;  %427 = vst [vmem:[%s2444_s27 + $0x450] sm:$0xff] %v426_v10  ;;  %v434_v14 = vld [vmem:[%s2436_s26 + $0x2ef0] sm:$0xff]  ;;  %v436_v15 = vld [vmem:[%s2436_s26 + $0x2ef8] sm:$0xff] }
  0x59   : > { %429 = vst [vmem:[%s2444_s27 + $0x458] sm:$0xff] %v428_v11  ;;  %431 = vst [vmem:[%s2444_s27 + $0x460] sm:$0xff] %v430_v12  ;;  %v438_v16 = vld [vmem:[%s2436_s26 + $0x3180] sm:$0xff]  ;;  %v440_v17 = vld [vmem:[%s2436_s26 + $0x3188] sm:$0xff] }
  0x5a   : > { %433 = vst [vmem:[%s2444_s27 + $0x468] sm:$0xff] %v432_v13  ;;  %435 = vst [vmem:[%s2444_s27 + $0x470] sm:$0xff] %v434_v14  ;;  %v442_v18 = vld [vmem:[%s2436_s26 + $0x3190] sm:$0xff]  ;;  %v444_v19 = vld [vmem:[%s2436_s26 + $0x3198] sm:$0xff] }
  0x5b   : > { %437 = vst [vmem:[%s2444_s27 + $0x478] sm:$0xff] %v436_v15  ;;  %439 = vst [vmem:[%s2444_s27 + $0x480] sm:$0xff] %v438_v16  ;;  %v446_v20 = vld [vmem:[%s2436_s26 + $0x31a0] sm:$0xff]  ;;  %v448_v21 = vld [vmem:[%s2436_s26 + $0x31a8] sm:$0xff] }
  0x5c   : > { %441 = vst [vmem:[%s2444_s27 + $0x488] sm:$0xff] %v440_v17  ;;  %443 = vst [vmem:[%s2444_s27 + $0x490] sm:$0xff] %v442_v18  ;;  %v450_v22 = vld [vmem:[%s2436_s26 + $0x31b0] sm:$0xff]  ;;  %v452_v23 = vld [vmem:[%s2436_s26 + $0x31b8] sm:$0xff] }
  0x5d   : > { %445 = vst [vmem:[%s2444_s27 + $0x498] sm:$0xff] %v444_v19  ;;  %447 = vst [vmem:[%s2444_s27 + $0x4a0] sm:$0xff] %v446_v20 }
  0x5e   : > { %449 = vst [vmem:[%s2444_s27 + $0x4a8] sm:$0xff] %v448_v21  ;;  %451 = vst [vmem:[%s2444_s27 + $0x4b0] sm:$0xff] %v450_v22 }
  0x5f   : > { %453 = vst [vmem:[%s2444_s27 + $0x4b8] sm:$0xff] %v452_v23 }
  0x60 PF: > { %p2085_p7 = scmp.ge.s32.totalorder %s2373_s14, 1  ;;  %p458_p8 = scmp.lt.s32.totalorder %s2373_s14, 12 }
  0x62   : > { %p459_p9 = pnand %p2085_p7, %p458_p8 }
  0x63   : > { %s465_s28 = sand.u32 (!%p459_p9), 1, %s2365_s12  }
  0x64   : > { %462 = sbr.rel (%p459_p9) target bundleno = 485 (0x1e5), region = 51  ;;  %s2086_s17 = sshll.u32 (!%p459_p9), %s465_s28, 7 }
  0x65   : > { %s2305_s4 = smul.u32 (!%p459_p9), 1216, %s465_s28  ;;  %s2973_s12 = scalar_lea.vmem (!%p459_p9), [#allocation3], %s2086_s17 }
  0x67   : > { %s2761_s7 = scalar_lea.vmem (!%p459_p9), [#allocation2], %s2305_s4 }
  0x69   : > { %v2750_v24 = vld [vmem:[%s3048_s0 + $0x4] ss:$8 sps:$4 sm:$0xff]   ;;  %vm1425_vm0 = vcmask 179200   ;;  %v2375_v26 = vmov 0   ;;  %vm1429_vm1 = vcmask 1042432   ;;  %s2303_s18 = sshll.u32 (%p2426_p5), %s2079_s15, 6 }
  0x6a   : > { %v644_v25 = vld [vmem:[%s3050_s2] sm:$0xff]  ;;  %2250 = vmatprep.mubr.msk.bf16.mxu0 %vm1425_vm0, %v2750_v24  ;;  %2252 = vmatprep.mubr.msk.bf16.mxu1 %vm1425_vm0, %v2750_v24  ;;  %v605_v29 = vld [vmem:[%s2761_s7 + $0x388] sm:$0xff]  ;;  %s1975_s20 = scalar_lea.vmem (%p2426_p5), %s3051_s3, %s2303_s18 }
  0x6b   : > { %2331 = vset.pattern.permute.xlu0 %v2375_v26  ;;  %v604_v27 = vld [vmem:[%s2761_s7 + $0x380] sm:$0xff]  ;;  %v613_v31 = vld [vmem:[%s2761_s7 + $0x3c8] sm:$0xff] }
  0x6c   : > { %v612_v28 = vld [vmem:[%s2761_s7 + $0x3c0] sm:$0xff]  ;;  %648 = vperm.xlu0 %2331, %v644_v25   ;;  %v2204_v35 = vcombine.high %v605_v29, %v613_v31  ;;  %v2203_v36 = vcombine.low %v605_v29, %v613_v31  ;;  %v589_v38 = vld [vmem:[%s2761_s7 + $0x308] sm:$0xff] }
  0x6d   : > { %v2202_v30 = vcombine.high %v604_v27, %v612_v28  ;;  %v2201_v32 = vcombine.low %v604_v27, %v612_v28  ;;  %v588_v33 = vld [vmem:[%s2761_s7 + $0x300] sm:$0xff]  ;;  %v597_v39 = vld [vmem:[%s2761_s7 + $0x348] sm:$0xff] }
  0x6e   : > { %v596_v34 = vld [vmem:[%s2761_s7 + $0x340] sm:$0xff]  ;;  %v2188_v41 = vcombine.high %v589_v38, %v597_v39  ;;  %v573_v43 = vld [vmem:[%s2761_s7 + $0x288] sm:$0xff]  ;;  %1521 = vmatprep.subr.bf16.mxu1 %v2204_v35  ;;  %v2187_v47 = vcombine.low %v589_v38, %v597_v39 }
  0x6f   : > { %v2186_v37 = vcombine.high %v588_v33, %v596_v34  ;;  %v572_v40 = vld [vmem:[%s2761_s7 + $0x280] sm:$0xff]  ;;  %1478 = vmatprep.subr.bf16.mxu0 %v2202_v30  ;;  %v581_v44 = vld [vmem:[%s2761_s7 + $0x2c8] sm:$0xff]  ;;  %v2185_v45 = vcombine.low %v588_v33, %v596_v34  ;;  %1522 = vmatpush1.bf16.msra.mxu1 %v2203_v36 }
  0x70   : > { %v580_v42 = vld [vmem:[%s2761_s7 + $0x2c0] sm:$0xff]  ;;  %1479 = vmatpush1.bf16.msra.mxu0 %v2201_v32  ;;  %v645_v46 = vld [vmem:[%s3050_s2 + $0x8] sm:$0xff]  ;;  %1523 = vmatprep.subr.bf16.mxu1 %v2188_v41  ;;  %v2172_v49 = vcombine.high %v573_v43, %v581_v44  ;;  %v2171_v55 = vcombine.low %v573_v43, %v581_v44  ;;  %v606_v43 = vld [vmem:[%s2761_s7 + $0x390] sm:$0xff] }
  0x71   : > { %1480 = vmatprep.subr.bf16.mxu0 %v2186_v37  ;;  %v2170_v48 = vcombine.high %v572_v40, %v580_v42  ;;  %v556_v50 = vld [vmem:[%s2761_s7 + $0x200] sm:$0xff]  ;;  %v557_v52 = vld [vmem:[%s2761_s7 + $0x208] sm:$0xff]  ;;  %653 = vperm.xlu0 %2331, %v645_v46   ;;  %v2169_v54 = vcombine.low %v572_v40, %v580_v42  ;;  %v614_v44 = vld [vmem:[%s2761_s7 + $0x3d0] sm:$0xff] }
  0x72   : > { %v564_v51 = vld [vmem:[%s2761_s7 + $0x240] sm:$0xff]  ;;  %v565_v53 = vld [vmem:[%s2761_s7 + $0x248] sm:$0xff]  ;;  %v615_v46 = vld [vmem:[%s2761_s7 + $0x3d8] sm:$0xff] }
  0x73   : > { %1524 = vmatpush1.bf16.msra.mxu1 %v2187_v47  ;;  %v2154_v56 = vcombine.high %v556_v50, %v564_v51  ;;  %v2156_v57 = vcombine.high %v557_v52, %v565_v53  ;;  %v540_v58 = vld [vmem:[%s2761_s7 + $0x180] sm:$0xff]  ;;  %v541_v60 = vld [vmem:[%s2761_s7 + $0x188] sm:$0xff]  ;;  %v2153_v62 = vcombine.low %v556_v50, %v564_v51  ;;  %v2155_v63 = vcombine.low %v557_v52, %v565_v53  ;;  %v590_v51 = vld [vmem:[%s2761_s7 + $0x310] sm:$0xff] }
  0x74   : > { %1481 = vmatpush1.bf16.msra.mxu0 %v2185_v45  ;;  %1525 = vmatprep.subr.bf16.mxu1 %v2172_v49  ;;  %v548_v59 = vld [vmem:[%s2761_s7 + $0x1c0] sm:$0xff]  ;;  %v549_v61 = vld [vmem:[%s2761_s7 + $0x1c8] sm:$0xff]  ;;  %v607_v45 = vld [vmem:[%s2761_s7 + $0x398] sm:$0xff]  ;;  %v2206_v49 = vcombine.high %v606_v43, %v614_v44 }
  0x75   : > { %1482 = vmatprep.subr.bf16.mxu0 %v2170_v48  ;;  %v2138_v0 = vcombine.high %v540_v58, %v548_v59  ;;  %v2140_v1 = vcombine.high %v541_v60, %v549_v61  ;;  %v524_v2 = vld [vmem:[%s2761_s7 + $0x100] sm:$0xff]  ;;  %v525_v4 = vld [vmem:[%s2761_s7 + $0x108] sm:$0xff]  ;;  %v2137_v6 = vcombine.low %v540_v58, %v548_v59  ;;  %v2139_v7 = vcombine.low %v541_v60, %v549_v61  ;;  %v598_v52 = vld [vmem:[%s2761_s7 + $0x350] sm:$0xff] }
  0x76   : > { %v532_v3 = vld [vmem:[%s2761_s7 + $0x140] sm:$0xff]  ;;  %v533_v5 = vld [vmem:[%s2761_s7 + $0x148] sm:$0xff]  ;;  %v2208_v50 = vcombine.high %v607_v45, %v615_v46  ;;  %v2190_v58 = vcombine.high %v590_v51, %v598_v52  ;;  %v574_v60 = vld [vmem:[%s2761_s7 + $0x290] sm:$0xff] }
  0x77   : > { %1526 = vmatpush1.bf16.msra.mxu1 %v2171_v55  ;;  %v2122_v8 = vcombine.high %v524_v2, %v532_v3  ;;  %v2124_v9 = vcombine.high %v525_v4, %v533_v5  ;;  %v508_v10 = vld [vmem:[%s2761_s7 + $0x80] sm:$0xff]  ;;  %v509_v12 = vld [vmem:[%s2761_s7 + $0x88] sm:$0xff]  ;;  %v2121_v14 = vcombine.low %v524_v2, %v532_v3  ;;  %v2123_v15 = vcombine.low %v525_v4, %v533_v5  ;;  %v599_v55 = vld [vmem:[%s2761_s7 + $0x358] sm:$0xff] }
  0x78   : > { %1483 = vmatpush1.bf16.msra.mxu0 %v2169_v54  ;;  %1527 = vmatprep.subr.bf16.mxu1 %v2156_v57  ;;  %v516_v11 = vld [vmem:[%s2761_s7 + $0xc0] sm:$0xff]  ;;  %v517_v13 = vld [vmem:[%s2761_s7 + $0xc8] sm:$0xff]  ;;  %v591_v54 = vld [vmem:[%s2761_s7 + $0x318] sm:$0xff]  ;;  %v2207_v57 = vcombine.low %v607_v45, %v615_v46 }
  0x79   : > { %1484 = vmatprep.subr.bf16.mxu0 %v2154_v56  ;;  %v2106_v16 = vcombine.high %v508_v10, %v516_v11  ;;  %v2108_v17 = vcombine.high %v509_v12, %v517_v13  ;;  %v492_v18 = vld [vmem:[%s2761_s7] sm:$0xff]  ;;  %v493_v20 = vld [vmem:[%s2761_s7 + $0x8] sm:$0xff]  ;;  %v2105_v22 = vcombine.low %v508_v10, %v516_v11  ;;  %v2107_v23 = vcombine.low %v509_v12, %v517_v13  ;;  %v582_v61 = vld [vmem:[%s2761_s7 + $0x2d0] sm:$0xff] }
  0x7a   : > { %v500_v19 = vld [vmem:[%s2761_s7 + $0x40] sm:$0xff]  ;;  %v501_v21 = vld [vmem:[%s2761_s7 + $0x48] sm:$0xff]  ;;  %v2205_v56 = vcombine.low %v606_v43, %v614_v44  ;;  %v2192_v59 = vcombine.high %v591_v54, %v599_v55  ;;  %v2174_v2 = vcombine.high %v574_v60, %v582_v61  ;;  %v558_v4 = vld [vmem:[%s2761_s7 + $0x210] sm:$0xff] }
  0x7b   : > { %1528 = vmatpush1.bf16.msra.mxu1 %v2155_v63  ;;  %v2090_v25 = vcombine.high %v492_v18, %v500_v19  ;;  %v2092_v26 = vcombine.high %v493_v20, %v501_v21  ;;  %v636_v27 = vld [vmem:[%s2761_s7 + $0x480] sm:$0x77]  ;;  %v637_v28 = vld [vmem:[%s2761_s7 + $0x488] sm:$0x77]  ;;  %v2089_v29 = vcombine.low %v492_v18, %v500_v19  ;;  %v2091_v30 = vcombine.low %v493_v20, %v501_v21  ;;  %v583_v63 = vld [vmem:[%s2761_s7 + $0x2d8] sm:$0xff] }
  0x7c   : > { %1485 = vmatpush1.bf16.msra.mxu0 %v2153_v62  ;;  %1529 = vmatprep.subr.bf16.mxu1 %v2140_v1  ;;  %v2234_v31 = vcombine.high %v636_v27, %v636_v27  ;;  %v2233_v32 = vcombine.low %v636_v27, %v636_v27  ;;  %v2236_v33 = vcombine.high %v637_v28, %v637_v28  ;;  %v620_v35 = vld [vmem:[%s2761_s7 + $0x400] sm:$0xff]  ;;  %v621_v37 = vld [vmem:[%s2761_s7 + $0x408] sm:$0xff]  ;;  %v575_v62 = vld [vmem:[%s2761_s7 + $0x298] sm:$0xff] }
  0x7d   : > { %1486 = vmatprep.subr.bf16.mxu0 %v2138_v0  ;;  %v2235_v34 = vcombine.low %v637_v28, %v637_v28  ;;  %v628_v36 = vld [vmem:[%s2761_s7 + $0x440] sm:$0xff]  ;;  %v629_v38 = vld [vmem:[%s2761_s7 + $0x448] sm:$0xff]  ;;  %v2189_v0 = vcombine.low %v590_v51, %v598_v52  ;;  %v2191_v1 = vcombine.low %v591_v54, %v599_v55  ;;  %v2176_v3 = vcombine.high %v575_v62, %v583_v63  ;;  %v566_v5 = vld [vmem:[%s2761_s7 + $0x250] sm:$0xff] }
  0x7e   : > { %v1431_v39 = vsel %vm1429_vm1, %v2233_v32, 0  ;;  %v2218_v40 = vcombine.high %v620_v35, %v628_v36  ;;  %v2220_v42 = vcombine.high %v621_v37, %v629_v38  ;;  %v2217_v47 = vcombine.low %v620_v35, %v628_v36  ;;  %v2817_v53 = vld [vmem:[%s3048_s0] ss:$8 sps:$4 sm:$0xff]   ;;  %v542_v12 = vld [vmem:[%s2761_s7 + $0x190] sm:$0xff]  ;;  %v519_v32 = vld [vmem:[%s2761_s7 + $0xd8] sm:$0xff] }
  0x7f   : > { %1530 = vmatpush1.bf16.msra.mxu1 %v2139_v7  ;;  %v1437_v41 = vsel %vm1429_vm1, %v2235_v34, 0  ;;  %v2219_v48 = vcombine.low %v621_v37, %v629_v38  ;;  %v567_v7 = vld [vmem:[%s2761_s7 + $0x258] sm:$0xff]  ;;  %v2158_v10 = vcombine.high %v558_v4, %v566_v5  ;;  %v550_v13 = vld [vmem:[%s2761_s7 + $0x1d0] sm:$0xff] }
  0x80   : > { %1487 = vmatpush1.bf16.msra.mxu0 %v2137_v6  ;;  %1531 = vmatprep.subr.bf16.mxu1 %v2124_v9  ;;  %v559_v6 = vld [vmem:[%s2761_s7 + $0x218] sm:$0xff]  ;;  %v2175_v9 = vcombine.low %v575_v62, %v583_v63  ;;  %v2142_v18 = vcombine.high %v542_v12, %v550_v13  ;;  %v526_v20 = vld [vmem:[%s2761_s7 + $0x110] sm:$0xff]  ;;  %v608_v62 = vld [vmem:[%s2761_s7 + $0x3a0] sm:$0xff] }
  0x81   : > { %1488 = vmatprep.subr.bf16.mxu0 %v2122_v8  ;;  %v2173_v8 = vcombine.low %v574_v60, %v582_v61  ;;  %v2160_v11 = vcombine.high %v559_v6, %v567_v7  ;;  %v534_v21 = vld [vmem:[%s2761_s7 + $0x150] sm:$0xff]  ;;  %v639_v46 = vld [vmem:[%s2761_s7 + $0x498] sm:$0x77]  ;;  %v616_v63 = vld [vmem:[%s2761_s7 + $0x3e0] sm:$0xff] }
  0x82   : > { %v2126_v27 = vcombine.high %v526_v20, %v534_v21  ;;  %v494_v37 = vld [vmem:[%s2761_s7 + $0x10] sm:$0xff]  ;;  %v2240_v51 = vcombine.high %v639_v46, %v639_v46  ;;  %v2239_v52 = vcombine.low %v639_v46, %v639_v46 }
  0x83   : > { %1532 = vmatpush1.bf16.msra.mxu1 %v2123_v15  ;;  %v551_v15 = vld [vmem:[%s2761_s7 + $0x1d8] sm:$0xff]  ;;  %v502_v38 = vld [vmem:[%s2761_s7 + $0x50] sm:$0xff] }
  0x84   : > { %1489 = vmatpush1.bf16.msra.mxu0 %v2121_v14  ;;  %1533 = vmatprep.subr.bf16.mxu1 %v2108_v17  ;;  %v543_v14 = vld [vmem:[%s2761_s7 + $0x198] sm:$0xff]  ;;  %v2159_v17 = vcombine.low %v559_v6, %v567_v7  ;;  %v2094_v43 = vcombine.high %v494_v37, %v502_v38  ;;  %v638_v45 = vld [vmem:[%s2761_s7 + $0x490] sm:$0x77]  ;;  %v1449_v60 = vsel %vm1429_vm1, %v2239_v52, 0  ;;  %v592_v6 = vld [vmem:[%s2761_s7 + $0x320] sm:$0xff] }
  0x85   : > { %1490 = vmatprep.subr.bf16.mxu0 %v2106_v16  ;;  %v2157_v16 = vcombine.low %v558_v4, %v566_v5  ;;  %v2144_v19 = vcombine.high %v543_v14, %v551_v15  ;;  %v622_v54 = vld [vmem:[%s2761_s7 + $0x410] sm:$0xff]  ;;  %v2210_v4 = vcombine.high %v608_v62, %v616_v63  ;;  %v600_v7 = vld [vmem:[%s2761_s7 + $0x360] sm:$0xff] }
  0x86   : > { %v630_v55 = vld [vmem:[%s2761_s7 + $0x450] sm:$0xff] }
  0x87   : > { %1534 = vmatpush1.bf16.msra.mxu1 %v2107_v23  ;;  %v535_v23 = vld [vmem:[%s2761_s7 + $0x158] sm:$0xff] }
  0x88   : > { %1491 = vmatpush1.bf16.msra.mxu0 %v2105_v22  ;;  %1535 = vmatprep.subr.bf16.mxu1 %v2092_v26  ;;  %v527_v22 = vld [vmem:[%s2761_s7 + $0x118] sm:$0xff]  ;;  %v2143_v26 = vcombine.low %v543_v14, %v551_v15  ;;  %v576_v14 = vld [vmem:[%s2761_s7 + $0x2a0] sm:$0xff] }
  0x89   : > { %1492 = vmatprep.subr.bf16.mxu0 %v2090_v25  ;;  %v2141_v25 = vcombine.low %v542_v12, %v550_v13  ;;  %v2128_v28 = vcombine.high %v527_v22, %v535_v23  ;;  %v2127_v34 = vcombine.low %v527_v22, %v535_v23  ;;  %v2194_v12 = vcombine.high %v592_v6, %v600_v7  ;;  %v584_v15 = vld [vmem:[%s2761_s7 + $0x2e0] sm:$0xff] }
  0x8a   : > { %v560_v22 = vld [vmem:[%s2761_s7 + $0x220] sm:$0xff] }
  0x8b   : > { %1536 = vmatpush1.bf16.msra.mxu1 %v2091_v30  ;;  %v518_v30 = vld [vmem:[%s2761_s7 + $0xd0] sm:$0xff]  ;;  %v568_v23 = vld [vmem:[%s2761_s7 + $0x260] sm:$0xff] }
  0x8c   : > { %1493 = vmatpush1.bf16.msra.mxu0 %v2089_v29  ;;  %2251 = vmatprep.subr.msk.bf16.mxu1 %vm1429_vm1, %v2236_v33  ;;  %v510_v29 = vld [vmem:[%s2761_s7 + $0x90] sm:$0xff]  ;;  %v2125_v33 = vcombine.low %v526_v20, %v534_v21  ;;  %v2178_v20 = vcombine.high %v576_v14, %v584_v15 }
  0x8d   : > { %2249 = vmatprep.subr.msk.bf16.mxu0 %vm1429_vm1, %v2234_v31  ;;  %v511_v31 = vld [vmem:[%s2761_s7 + $0x98] sm:$0xff]  ;;  %v2110_v35 = vcombine.high %v510_v29, %v518_v30 }
  0x8e   : > { %v2112_v36 = vcombine.high %v511_v31, %v519_v32 }
  0x8f   : > { %1550 = vmatpush2.bf16.msra.mxu1 %v1437_v41  ;;  %v2109_v41 = vcombine.low %v510_v29, %v518_v30  ;;  %v2162_v29 = vcombine.high %v560_v22, %v568_v23 }
  0x90   : > { %1507 = vmatpush2.bf16.msra.mxu0 %v1431_v39  ;;  %1551 = vmatprep.subr.bf16.mxu1 %v2220_v42  ;;  %v495_v39 = vld [vmem:[%s2761_s7 + $0x18] sm:$0xff]  ;;  %v2111_v42 = vcombine.low %v511_v31, %v519_v32  ;;  %v544_v31 = vld [vmem:[%s2761_s7 + $0x1a0] sm:$0xff] }
  0x91   : > { %1508 = vmatprep.subr.bf16.mxu0 %v2218_v40  ;;  %v503_v40 = vld [vmem:[%s2761_s7 + $0x58] sm:$0xff]  ;;  %v552_v32 = vld [vmem:[%s2761_s7 + $0x1e0] sm:$0xff] }
  0x92   : > { %v2096_v44 = vcombine.high %v495_v39, %v503_v40 }
  0x93   : > { %1552 = vmatpush2.bf16.msra.mxu1 %v2219_v48  ;;  %v2095_v48 = vcombine.low %v495_v39, %v503_v40  ;;  %v528_v39 = vld [vmem:[%s2761_s7 + $0x120] sm:$0xff] }
  0x94   : > { %1509 = vmatpush2.bf16.msra.mxu0 %v2217_v47  ;;  %1607 = vmatprep.subr.bf16.mxu1 %v2208_v50  ;;  %v2093_v47 = vcombine.low %v494_v37, %v502_v38  ;;  %v2237_v50 = vcombine.low %v638_v45, %v638_v45  ;;  %v2146_v37 = vcombine.high %v544_v31, %v552_v32  ;;  %v536_v40 = vld [vmem:[%s2761_s7 + $0x160] sm:$0xff] }
  0x95   : > { %1564 = vmatprep.subr.bf16.mxu0 %v2206_v49  ;;  %v2238_v49 = vcombine.high %v638_v45, %v638_v45  ;;  %v2130_v45 = vcombine.high %v528_v39, %v536_v40 }
  0x96   : > { %1554 = vmatmul.mubr.bf16.vlgmr.msra.gmra.mxu1 %v2817_v53 }
  0x97   : > { %1511 = vmatmul.mubr.bf16.vlgmr.msra.gmra.mxu0 %v2817_v53  ;;  %1608 = vmatpush1.bf16.msra.mxu1 %v2207_v57  ;;  %v631_v57 = vld [vmem:[%s2761_s7 + $0x458] sm:$0xff] }
  0x98   : > { %1565 = vmatpush1.bf16.msra.mxu0 %v2205_v56  ;;  %1609 = vmatprep.subr.bf16.mxu1 %v2192_v59  ;;  %v623_v56 = vld [vmem:[%s2761_s7 + $0x418] sm:$0xff]  ;;  %v2222_v59 = vcombine.high %v622_v54, %v630_v55 }
  0x99   : > { %1566 = vmatprep.subr.bf16.mxu0 %v2190_v58  ;;  %2254 = vmatprep.mubr.msk.bf16.mxu0 %vm1425_vm0, %v2750_v24  ;;  %v1443_v58 = vsel %vm1429_vm1, %v2237_v50, 0  ;;  %v2224_v61 = vcombine.high %v623_v56, %v631_v57  ;;  %v521_v50 = vld [vmem:[%s2761_s7 + $0xe8] sm:$0xff] }
  0x9a   : > { %2256 = vmatprep.mubr.msk.bf16.mxu1 %vm1425_vm0, %v2750_v24 }
  0x9b   : > { %1610 = vmatpush1.bf16.msra.mxu1 %v2191_v1  ;;  %v617_v1 = vld [vmem:[%s2761_s7 + $0x3e8] sm:$0xff] }
  0x9c   : > { %1567 = vmatpush1.bf16.msra.mxu0 %v2189_v0  ;;  %1611 = vmatprep.subr.bf16.mxu1 %v2176_v3  ;;  %v609_v0 = vld [vmem:[%s2761_s7 + $0x3a8] sm:$0xff]  ;;  %v2223_v3 = vcombine.low %v623_v56, %v631_v57  ;;  %v496_v56 = vld [vmem:[%s2761_s7 + $0x20] sm:$0xff] }
  0x9d   : > { %1568 = vmatprep.subr.bf16.mxu0 %v2174_v2  ;;  %v2221_v2 = vcombine.low %v622_v54, %v630_v55  ;;  %v2212_v5 = vcombine.high %v609_v0, %v617_v1  ;;  %v504_v57 = vld [vmem:[%s2761_s7 + $0x60] sm:$0xff] }
  0x9f   : > { %1612 = vmatpush1.bf16.msra.mxu1 %v2175_v9  ;;  %v601_v9 = vld [vmem:[%s2761_s7 + $0x368] sm:$0xff] }
  0xa0   : > { %1569 = vmatpush1.bf16.msra.mxu0 %v2173_v8  ;;  %1613 = vmatprep.subr.bf16.mxu1 %v2160_v11  ;;  %v593_v8 = vld [vmem:[%s2761_s7 + $0x328] sm:$0xff]  ;;  %v2211_v11 = vcombine.low %v609_v0, %v617_v1  ;;  %v640_v0 = vld [vmem:[%s2761_s7 + $0x4a0] sm:$0x77] }
  0xa1   : > { %1570 = vmatprep.subr.bf16.mxu0 %v2158_v10  ;;  %v2209_v10 = vcombine.low %v608_v62, %v616_v63  ;;  %v2196_v13 = vcombine.high %v593_v8, %v601_v9  ;;  %v2098_v62 = vcombine.high %v496_v56, %v504_v57  ;;  %v641_v1 = vld [vmem:[%s2761_s7 + $0x4a8] sm:$0x77] }
  0xa3   : > { %1614 = vmatpush1.bf16.msra.mxu1 %v2159_v17  ;;  %v585_v17 = vld [vmem:[%s2761_s7 + $0x2e8] sm:$0xff] }
  0xa4   : > { %1571 = vmatpush1.bf16.msra.mxu0 %v2157_v16  ;;  %1615 = vmatprep.subr.bf16.mxu1 %v2144_v19  ;;  %v577_v16 = vld [vmem:[%s2761_s7 + $0x2a8] sm:$0xff]  ;;  %v2195_v19 = vcombine.low %v593_v8, %v601_v9  ;;  %v624_v8 = vld [vmem:[%s2761_s7 + $0x420] sm:$0xff] }
  0xa5   : > { %1572 = vmatprep.subr.bf16.mxu0 %v2142_v18  ;;  %v2193_v18 = vcombine.low %v592_v6, %v600_v7  ;;  %v2180_v21 = vcombine.high %v577_v16, %v585_v17  ;;  %v2244_v6 = vcombine.high %v641_v1, %v641_v1  ;;  %v2243_v7 = vcombine.low %v641_v1, %v641_v1  ;;  %v632_v9 = vld [vmem:[%s2761_s7 + $0x460] sm:$0xff]  ;;  %v514_v1 = vld [vmem:[%s2761_s7 + $0xb0] sm:$0xff] }
  0xa7   : > { %1616 = vmatpush1.bf16.msra.mxu1 %v2143_v26  ;;  %v569_v26 = vld [vmem:[%s2761_s7 + $0x268] sm:$0xff] }
  0xa8   : > { %1573 = vmatpush1.bf16.msra.mxu0 %v2141_v25  ;;  %1617 = vmatprep.subr.bf16.mxu1 %v2128_v28  ;;  %v561_v25 = vld [vmem:[%s2761_s7 + $0x228] sm:$0xff]  ;;  %v2179_v28 = vcombine.low %v577_v16, %v585_v17  ;;  %v610_v16 = vld [vmem:[%s2761_s7 + $0x3b0] sm:$0xff] }
  0xa9   : > { %1574 = vmatprep.subr.bf16.mxu0 %v2126_v27  ;;  %v2177_v27 = vcombine.low %v576_v14, %v584_v15  ;;  %v2164_v30 = vcombine.high %v561_v25, %v569_v26  ;;  %v1461_v14 = vsel %vm1429_vm1, %v2243_v7, 0  ;;  %v618_v17 = vld [vmem:[%s2761_s7 + $0x3f0] sm:$0xff] }
  0xab   : > { %1618 = vmatpush1.bf16.msra.mxu1 %v2127_v34  ;;  %v553_v34 = vld [vmem:[%s2761_s7 + $0x1e8] sm:$0xff] }
  0xac   : > { %1575 = vmatpush1.bf16.msra.mxu0 %v2125_v33  ;;  %1619 = vmatprep.subr.bf16.mxu1 %v2112_v36  ;;  %v545_v33 = vld [vmem:[%s2761_s7 + $0x1a8] sm:$0xff]  ;;  %v2163_v36 = vcombine.low %v561_v25, %v569_v26  ;;  %v594_v25 = vld [vmem:[%s2761_s7 + $0x330] sm:$0xff] }
  0xad   : > { %1576 = vmatprep.subr.bf16.mxu0 %v2110_v35  ;;  %v2161_v35 = vcombine.low %v560_v22, %v568_v23  ;;  %v2148_v38 = vcombine.high %v545_v33, %v553_v34  ;;  %v2214_v22 = vcombine.high %v610_v16, %v618_v17  ;;  %v602_v26 = vld [vmem:[%s2761_s7 + $0x370] sm:$0xff] }
  0xaf   : > { %1620 = vmatpush1.bf16.msra.mxu1 %v2111_v42  ;;  %v537_v42 = vld [vmem:[%s2761_s7 + $0x168] sm:$0xff] }
  0xb0   : > { %1577 = vmatpush1.bf16.msra.mxu0 %v2109_v41  ;;  %1621 = vmatprep.subr.bf16.mxu1 %v2096_v44  ;;  %v529_v41 = vld [vmem:[%s2761_s7 + $0x128] sm:$0xff]  ;;  %v2147_v44 = vcombine.low %v545_v33, %v553_v34  ;;  %v578_v33 = vld [vmem:[%s2761_s7 + $0x2b0] sm:$0xff] }
  0xb1   : > { %1578 = vmatprep.subr.bf16.mxu0 %v2094_v43  ;;  %v2145_v43 = vcombine.low %v544_v31, %v552_v32  ;;  %v2132_v46 = vcombine.high %v529_v41, %v537_v42  ;;  %v2131_v52 = vcombine.low %v529_v41, %v537_v42  ;;  %v2198_v31 = vcombine.high %v594_v25, %v602_v26  ;;  %v586_v34 = vld [vmem:[%s2761_s7 + $0x2f0] sm:$0xff] }
  0xb2   : > { %v562_v41 = vld [vmem:[%s2761_s7 + $0x230] sm:$0xff] }
  0xb3   : > { %1622 = vmatpush1.bf16.msra.mxu1 %v2095_v48  ;;  %v520_v48 = vld [vmem:[%s2761_s7 + $0xe0] sm:$0xff]  ;;  %v570_v42 = vld [vmem:[%s2761_s7 + $0x270] sm:$0xff] }
  0xb4   : > { %1579 = vmatpush1.bf16.msra.mxu0 %v2093_v47  ;;  %2255 = vmatprep.subr.msk.bf16.mxu1 %vm1429_vm1, %v2240_v51  ;;  %v512_v47 = vld [vmem:[%s2761_s7 + $0xa0] sm:$0xff]  ;;  %v2129_v51 = vcombine.low %v528_v39, %v536_v40  ;;  %v2182_v39 = vcombine.high %v578_v33, %v586_v34 }
  0xb5   : > { %2253 = vmatprep.subr.msk.bf16.mxu0 %vm1429_vm1, %v2238_v49  ;;  %v513_v49 = vld [vmem:[%s2761_s7 + $0xa8] sm:$0xff]  ;;  %v2114_v54 = vcombine.high %v512_v47, %v520_v48 }
  0xb6   : > { %v2116_v55 = vcombine.high %v513_v49, %v521_v50 }
  0xb7   : > { %1636 = vmatpush2.bf16.msra.mxu1 %v1449_v60  ;;  %v2113_v60 = vcombine.low %v512_v47, %v520_v48  ;;  %v2166_v47 = vcombine.high %v562_v41, %v570_v42 }
  0xb8   : > { %1593 = vmatpush2.bf16.msra.mxu0 %v1443_v58  ;;  %1637 = vmatprep.subr.bf16.mxu1 %v2224_v61  ;;  %v497_v58 = vld [vmem:[%s2761_s7 + $0x28] sm:$0xff]  ;;  %v2115_v61 = vcombine.low %v513_v49, %v521_v50  ;;  %v546_v49 = vld [vmem:[%s2761_s7 + $0x1b0] sm:$0xff] }
  0xb9   : > { %1594 = vmatprep.subr.bf16.mxu0 %v2222_v59  ;;  %v505_v59 = vld [vmem:[%s2761_s7 + $0x68] sm:$0xff]  ;;  %v554_v50 = vld [vmem:[%s2761_s7 + $0x1f0] sm:$0xff] }
  0xba   : > { %v2100_v63 = vcombine.high %v497_v58, %v505_v59 }
  0xbb   : > { %1638 = vmatpush2.bf16.msra.mxu1 %v2223_v3  ;;  %v2099_v3 = vcombine.low %v497_v58, %v505_v59  ;;  %v538_v58 = vld [vmem:[%s2761_s7 + $0x170] sm:$0xff]  ;;  %v531_v59 = vld [vmem:[%s2761_s7 + $0x138] sm:$0xff] }
  0xbc   : > { %1595 = vmatpush2.bf16.msra.mxu0 %v2221_v2  ;;  %1693 = vmatprep.subr.bf16.mxu1 %v2212_v5  ;;  %v2097_v2 = vcombine.low %v496_v56, %v504_v57  ;;  %v2241_v5 = vcombine.low %v640_v0, %v640_v0  ;;  %v530_v57 = vld [vmem:[%s2761_s7 + $0x130] sm:$0xff] }
  0xbd   : > { %1650 = vmatprep.subr.bf16.mxu0 %v2210_v4  ;;  %v2242_v4 = vcombine.high %v640_v0, %v640_v0 }
  0xbe   : > { %1640 = vmatmul.mubr.bf16.vlgmr.msra.gmra.mxu1 %v2817_v53 }
  0xbf   : > { %1597 = vmatmul.mubr.bf16.vlgmr.msra.gmra.mxu0 %v2817_v53  ;;  %1694 = vmatpush1.bf16.msra.mxu1 %v2211_v11  ;;  %v633_v11 = vld [vmem:[%s2761_s7 + $0x468] sm:$0xff] }
  0xc0   : > { %1651 = vmatpush1.bf16.msra.mxu0 %v2209_v10  ;;  %1695 = vmatprep.subr.bf16.mxu1 %v2196_v13  ;;  %v625_v10 = vld [vmem:[%s2761_s7 + $0x428] sm:$0xff]  ;;  %v2226_v13 = vcombine.high %v624_v8, %v632_v9 }
  0xc1   : > { %1652 = vmatprep.subr.bf16.mxu0 %v2194_v12  ;;  %2258 = vmatprep.mubr.msk.bf16.mxu0 %vm1425_vm0, %v2750_v24  ;;  %v1455_v12 = vsel %vm1429_vm1, %v2241_v5, 0  ;;  %v2228_v15 = vcombine.high %v625_v10, %v633_v11  ;;  %v2133_v5 = vcombine.low %v530_v57, %v538_v58 }
  0xc2   : > { %2260 = vmatprep.mubr.msk.bf16.mxu1 %vm1425_vm0, %v2750_v24 }
  0xc3   : > { %1696 = vmatpush1.bf16.msra.mxu1 %v2195_v19  ;;  %v619_v19 = vld [vmem:[%s2761_s7 + $0x3f8] sm:$0xff] }
  0xc4   : > { %1653 = vmatpush1.bf16.msra.mxu0 %v2193_v18  ;;  %1697 = vmatprep.subr.bf16.mxu1 %v2180_v21  ;;  %v611_v18 = vld [vmem:[%s2761_s7 + $0x3b8] sm:$0xff]  ;;  %v2227_v21 = vcombine.low %v625_v10, %v633_v11  ;;  %v506_v10 = vld [vmem:[%s2761_s7 + $0x70] sm:$0xff] }
  0xc5   : > { %1654 = vmatprep.subr.bf16.mxu0 %v2178_v20  ;;  %v2225_v20 = vcombine.low %v624_v8, %v632_v9  ;;  %v2216_v23 = vcombine.high %v611_v18, %v619_v19  ;;  %v498_v9 = vld [vmem:[%s2761_s7 + $0x30] sm:$0xff]  ;;  %v499_v11 = vld [vmem:[%s2761_s7 + $0x38] sm:$0xff] }
  0xc7   : > { %1698 = vmatpush1.bf16.msra.mxu1 %v2179_v28  ;;  %v603_v28 = vld [vmem:[%s2761_s7 + $0x378] sm:$0xff] }
  0xc8   : > { %1655 = vmatpush1.bf16.msra.mxu0 %v2177_v27  ;;  %1699 = vmatprep.subr.bf16.mxu1 %v2164_v30  ;;  %v595_v27 = vld [vmem:[%s2761_s7 + $0x338] sm:$0xff]  ;;  %v2215_v30 = vcombine.low %v611_v18, %v619_v19  ;;  %v2101_v19 = vcombine.low %v498_v9, %v506_v10 }
  0xc9   : > { %1656 = vmatprep.subr.bf16.mxu0 %v2162_v29  ;;  %v2213_v29 = vcombine.low %v610_v16, %v618_v17  ;;  %v2200_v32 = vcombine.high %v595_v27, %v603_v28  ;;  %v642_v17 = vld [vmem:[%s2761_s7 + $0x4b0] sm:$0x77]  ;;  %v643_v18 = vld [vmem:[%s2761_s7 + $0x4b8] sm:$0x77] }
  0xcb   : > { %1700 = vmatpush1.bf16.msra.mxu1 %v2163_v36  ;;  %v587_v36 = vld [vmem:[%s2761_s7 + $0x2f8] sm:$0xff] }
  0xcc   : > { %1657 = vmatpush1.bf16.msra.mxu0 %v2161_v35  ;;  %1701 = vmatprep.subr.bf16.mxu1 %v2148_v38  ;;  %v579_v35 = vld [vmem:[%s2761_s7 + $0x2b8] sm:$0xff]  ;;  %v2199_v38 = vcombine.low %v595_v27, %v603_v28  ;;  %v634_v27 = vld [vmem:[%s2761_s7 + $0x470] sm:$0xff] }
  0xcd   : > { %1658 = vmatprep.subr.bf16.mxu0 %v2146_v37  ;;  %v2197_v37 = vcombine.low %v594_v25, %v602_v26  ;;  %v2184_v40 = vcombine.high %v579_v35, %v587_v36  ;;  %v2247_v25 = vcombine.low %v643_v18, %v643_v18  ;;  %v626_v26 = vld [vmem:[%s2761_s7 + $0x430] sm:$0xff]  ;;  %v627_v28 = vld [vmem:[%s2761_s7 + $0x438] sm:$0xff] }
  0xcf   : > { %1702 = vmatpush1.bf16.msra.mxu1 %v2147_v44  ;;  %v571_v44 = vld [vmem:[%s2761_s7 + $0x278] sm:$0xff] }
  0xd0   : > { %1659 = vmatpush1.bf16.msra.mxu0 %v2145_v43  ;;  %1703 = vmatprep.subr.bf16.mxu1 %v2132_v46  ;;  %v563_v43 = vld [vmem:[%s2761_s7 + $0x238] sm:$0xff]  ;;  %v2183_v46 = vcombine.low %v579_v35, %v587_v36 }
  0xd1   : > { %1660 = vmatprep.subr.bf16.mxu0 %v2130_v45  ;;  %v2181_v45 = vcombine.low %v578_v33, %v586_v34  ;;  %v2168_v48 = vcombine.high %v563_v43, %v571_v44  ;;  %v2229_v34 = vcombine.low %v626_v26, %v634_v27 }
  0xd3   : > { %1704 = vmatpush1.bf16.msra.mxu1 %v2131_v52  ;;  %v555_v52 = vld [vmem:[%s2761_s7 + $0x1f8] sm:$0xff] }
  0xd4   : > { %1661 = vmatpush1.bf16.msra.mxu0 %v2129_v51  ;;  %1705 = vmatprep.subr.bf16.mxu1 %v2116_v55  ;;  %v547_v51 = vld [vmem:[%s2761_s7 + $0x1b8] sm:$0xff]  ;;  %v2150_v55 = vcombine.high %v546_v49, %v554_v50 }
  0xd5   : > { %1662 = vmatprep.subr.bf16.mxu0 %v2114_v54  ;;  %v2165_v54 = vcombine.low %v562_v41, %v570_v42  ;;  %v2152_v56 = vcombine.high %v547_v51, %v555_v52 }
  0xd7   : > { %1706 = vmatpush1.bf16.msra.mxu1 %v2115_v61  ;;  %v2149_v61 = vcombine.low %v546_v49, %v554_v50 }
  0xd8   : > { %1663 = vmatpush1.bf16.msra.mxu0 %v2113_v60  ;;  %1707 = vmatprep.subr.bf16.mxu1 %v2100_v63  ;;  %v539_v60 = vld [vmem:[%s2761_s7 + $0x178] sm:$0xff]  ;;  %v2134_v63 = vcombine.high %v530_v57, %v538_v58 }
  0xd9   : > { %1664 = vmatprep.subr.bf16.mxu0 %v2098_v62  ;;  %v2151_v62 = vcombine.low %v547_v51, %v555_v52  ;;  %v2136_v0 = vcombine.high %v531_v59, %v539_v60 }
  0xdb   : > { %1708 = vmatpush1.bf16.msra.mxu1 %v2099_v3  ;;  %v515_v3 = vld [vmem:[%s2761_s7 + $0xb8] sm:$0xff] }
  0xdc   : > { %1665 = vmatpush1.bf16.msra.mxu0 %v2097_v2  ;;  %2259 = vmatprep.subr.msk.bf16.mxu1 %vm1429_vm1, %v2244_v6  ;;  %v522_v2 = vld [vmem:[%s2761_s7 + $0xf0] sm:$0xff]  ;;  %v2135_v6 = vcombine.low %v531_v59, %v539_v60 }
  0xdd   : > { %2257 = vmatprep.subr.msk.bf16.mxu0 %vm1429_vm1, %v2242_v4  ;;  %v523_v4 = vld [vmem:[%s2761_s7 + $0xf8] sm:$0xff]  ;;  %v2118_v7 = vcombine.high %v514_v1, %v522_v2 }
  0xde   : > { %v2120_v8 = vcombine.high %v515_v3, %v523_v4 }
  0xdf   : > { %1722 = vmatpush2.bf16.msra.mxu1 %v1461_v14  ;;  %v2119_v14 = vcombine.low %v515_v3, %v523_v4 }
  0xe0   : > { %1679 = vmatpush2.bf16.msra.mxu0 %v1455_v12  ;;  %1723 = vmatprep.subr.bf16.mxu1 %v2228_v15  ;;  %v507_v12 = vld [vmem:[%s2761_s7 + $0x78] sm:$0xff]  ;;  %v2102_v15 = vcombine.high %v498_v9, %v506_v10 }
  0xe1   : > { %1680 = vmatprep.subr.bf16.mxu0 %v2226_v13  ;;  %v2117_v13 = vcombine.low %v514_v1, %v522_v2  ;;  %v2104_v16 = vcombine.high %v499_v11, %v507_v12 }
  0xe3   : > { %1724 = vmatpush2.bf16.msra.mxu1 %v2227_v21  ;;  %v2246_v21 = vcombine.high %v642_v17, %v642_v17 }
  0xe4   : > { %1681 = vmatpush2.bf16.msra.mxu0 %v2225_v20  ;;  %1779 = vmatprep.subr.bf16.mxu1 %v2216_v23  ;;  %v2103_v20 = vcombine.low %v499_v11, %v507_v12  ;;  %v2248_v23 = vcombine.high %v643_v18, %v643_v18 }
  0xe5   : > { %1736 = vmatprep.subr.bf16.mxu0 %v2214_v22  ;;  %v2245_v22 = vcombine.low %v642_v17, %v642_v17 }
  0xe6   : > { %1726 = vmatmul.mubr.bf16.vlgmr.msra.gmra.mxu1 %v2817_v53 }
  0xe7   : > { %1683 = vmatmul.mubr.bf16.vlgmr.msra.gmra.mxu0 %v2817_v53  ;;  %1780 = vmatpush1.bf16.msra.mxu1 %v2215_v30  ;;  %v1467_v30 = vsel %vm1429_vm1, %v2245_v22, 0  ;;  %v2959_v36 = vpop.permute.xlu0 %648 }
  0xe8   : > { %1737 = vmatpush1.bf16.msra.mxu0 %v2213_v29  ;;  %1781 = vmatprep.subr.bf16.mxu1 %v2200_v32  ;;  %v635_v29 = vld [vmem:[%s2761_s7 + $0x478] sm:$0xff]  ;;  %v1473_v32 = vsel %vm1429_vm1, %v2247_v25, 0 }
  0xe9   : > { %1738 = vmatprep.subr.bf16.mxu0 %v2198_v31  ;;  %2262 = vmatprep.mubr.msk.bf16.mxu0 %vm1425_vm0, %v2750_v24  ;;  %v2230_v31 = vcombine.high %v626_v26, %v634_v27  ;;  %v2232_v33 = vcombine.high %v627_v28, %v635_v29  ;;  %v2231_v35 = vcombine.low %v627_v28, %v635_v29 }
  0xea   : > { %2264 = vmatprep.mubr.msk.bf16.mxu1 %vm1425_vm0, %v2750_v24  ;;  %v2167_v24 = vcombine.low %v563_v43, %v571_v44 }
  0xeb   : > { %1782 = vmatpush1.bf16.msra.mxu1 %v2199_v38 }
  0xec   : > { %1739 = vmatpush1.bf16.msra.mxu0 %v2197_v37  ;;  %1783 = vmatprep.subr.bf16.mxu1 %v2184_v40  ;;  %v2963_v42 = vpop.permute.xlu0 %653 }
  0xed   : > { %1740 = vmatprep.subr.bf16.mxu0 %v2182_v39 }
  0xef   : > { %1784 = vmatpush1.bf16.msra.mxu1 %v2183_v46 }
  0xf0   : > { %1741 = vmatpush1.bf16.msra.mxu0 %v2181_v45  ;;  %1785 = vmatprep.subr.bf16.mxu1 %v2168_v48 }
  0xf1   : > { %1742 = vmatprep.subr.bf16.mxu0 %v2166_v47 }
  0xf3   : > { %1786 = vmatpush1.bf16.msra.mxu1 %v2167_v24 }
  0xf4   : > { %1743 = vmatpush1.bf16.msra.mxu0 %v2165_v54  ;;  %1787 = vmatprep.subr.bf16.mxu1 %v2152_v56 }
  0xf5   : > { %1744 = vmatprep.subr.bf16.mxu0 %v2150_v55 }
  0xf7   : > { %1788 = vmatpush1.bf16.msra.mxu1 %v2151_v62 }
  0xf8   : > { %1745 = vmatpush1.bf16.msra.mxu0 %v2149_v61  ;;  %1789 = vmatprep.subr.bf16.mxu1 %v2136_v0 }
  0xf9   : > { %1746 = vmatprep.subr.bf16.mxu0 %v2134_v63 }
  0xfb   : > { %1790 = vmatpush1.bf16.msra.mxu1 %v2135_v6 }
  0xfc   : > { %1747 = vmatpush1.bf16.msra.mxu0 %v2133_v5  ;;  %1791 = vmatprep.subr.bf16.mxu1 %v2120_v8 }
  0xfd   : > { %1748 = vmatprep.subr.bf16.mxu0 %v2118_v7 }
  0xff   : > { %1792 = vmatpush1.bf16.msra.mxu1 %v2119_v14 }
 0x100   : > { %1749 = vmatpush1.bf16.msra.mxu0 %v2117_v13  ;;  %1793 = vmatprep.subr.bf16.mxu1 %v2104_v16 }
 0x101   : > { %1750 = vmatprep.subr.bf16.mxu0 %v2102_v15 }
 0x103   : > { %1794 = vmatpush1.bf16.msra.mxu1 %v2103_v20 }
 0x104   : > { %1751 = vmatpush1.bf16.msra.mxu0 %v2101_v19  ;;  %2263 = vmatprep.subr.msk.bf16.mxu1 %vm1429_vm1, %v2248_v23 }
 0x105   : > { %2261 = vmatprep.subr.msk.bf16.mxu0 %vm1429_vm1, %v2246_v21 }
 0x107   : > { %1808 = vmatpush2.bf16.msra.mxu1 %v1473_v32 }
 0x108   : > { %1765 = vmatpush2.bf16.msra.mxu0 %v1467_v30  ;;  %1809 = vmatprep.subr.bf16.mxu1 %v2232_v33 }
 0x109   : > { %1766 = vmatprep.subr.bf16.mxu0 %v2230_v31 }
 0x10b   : > { %1810 = vmatpush2.bf16.msra.mxu1 %v2231_v35 }
 0x10c   : > { %1767 = vmatpush2.bf16.msra.mxu0 %v2229_v34 }
 0x10e   : > { %1812 = vmatmul.mubr.bf16.vlgmr.msra.gmra.mxu1 %v2817_v53 }
 0x10f   : > { %1769 = vmatmul.mubr.bf16.vlgmr.msra.gmra.mxu0 %v2817_v53 }
 0x156   : > { %v1555_v39 = vpop.f32.mrf.mxu1 }
 0x157   : > { %v1512_v37 = vpop.f32.mrf.mxu0  ;;  %v1556_v40 = vadd.f32 %v1555_v39, %v2959_v36 }
 0x158   : > { %v1513_v38 = vadd.f32 %v1512_v37, %v2959_v36  ;;  %v1557_v45 = vpop.f32.mrf.mxu1 }
 0x159   : > { %v1514_v41 = vpop.f32.mrf.mxu0  ;;  %v1824_v46 = vmax.f32 %v1556_v40, 0.0  ;;  %v1558_v53 = vadd.f32 %v1557_v45, %v2959_v36 }
 0x15a   : > { %v1822_v43 = vmax.f32 %v1513_v38, 0.0  ;;  %v1515_v44 = vadd.f32 %v1514_v41, %v2959_v36  ;;  %v1559_v50 = vpop.f32.mrf.mxu1 }
 0x15b   : > { %v1516_v47 = vpop.f32.mrf.mxu0  ;;  %v1825_v51 = vmax.f32 %v1558_v53, 0.0  ;;  %v1560_v52 = vadd.f32 %v1559_v50, %v2963_v42 }
 0x15c   : > { %v1823_v48 = vmax.f32 %v1515_v44, 0.0  ;;  %v1517_v49 = vadd.f32 %v1516_v47, %v2963_v42  ;;  %v1561_v56 = vpop.f32.mrf.mxu1 }
 0x15d   : > { %v1518_v54 = vpop.f32.mrf.mxu0  ;;  %v2288_v57 = vpack.c.bf16 %v1825_v51, %v1824_v46  ;;  %v1562_v58 = vadd.f32 %v1561_v56, %v2963_v42  ;;  %v1840_v61 = vmax.f32 %v1560_v52, 0.0 }
 0x15e   : > { %v2287_v24 = vpack.c.bf16 %v1823_v48, %v1822_v43  ;;  %v1519_v55 = vadd.f32 %v1518_v54, %v2963_v42  ;;  %v1838_v59 = vmax.f32 %v1517_v49, 0.0 }
 0x15f   : > { %1951 = vst [vmem:[%s2973_s12 + $0x8] sm:$0xff] %v2288_v57  ;;  %v1841_v62 = vmax.f32 %v1562_v58, 0.0 }
 0x160   : > { %1950 = vst [vmem:[%s2973_s12] sm:$0xff] %v2287_v24  ;;  %v1839_v60 = vmax.f32 %v1519_v55, 0.0 }
 0x161   : > { %v2296_v0 = vpack.c.bf16 %v1841_v62, %v1840_v61 }
 0x162   : > { %v2295_v63 = vpack.c.bf16 %v1839_v60, %v1838_v59 }
 0x163   : > { %1959 = vst [vmem:[%s2973_s12 + $0x48] sm:$0xff] %v2296_v0 }
 0x164   : > { %1958 = vst [vmem:[%s2973_s12 + $0x40] sm:$0xff] %v2295_v63 }
 0x17e   : > { %v1641_v3 = vpop.f32.mrf.mxu1 }
 0x17f   : > { %v1598_v1 = vpop.f32.mrf.mxu0  ;;  %v1642_v4 = vadd.f32 %v1641_v3, %v2959_v36 }
 0x180   : > { %v1599_v2 = vadd.f32 %v1598_v1, %v2959_v36  ;;  %v1643_v8 = vpop.f32.mrf.mxu1 }
 0x181   : > { %v1600_v5 = vpop.f32.mrf.mxu0  ;;  %v1828_v9 = vmax.f32 %v1642_v4, 0.0  ;;  %v1644_v10 = vadd.f32 %v1643_v8, %v2959_v36 }
 0x182   : > { %v1826_v6 = vmax.f32 %v1599_v2, 0.0  ;;  %v1601_v7 = vadd.f32 %v1600_v5, %v2959_v36  ;;  %v1645_v14 = vpop.f32.mrf.mxu1 }
 0x183   : > { %v1602_v11 = vpop.f32.mrf.mxu0  ;;  %v1829_v15 = vmax.f32 %v1644_v10, 0.0  ;;  %v1646_v16 = vadd.f32 %v1645_v14, %v2963_v42 }
 0x184   : > { %v1827_v12 = vmax.f32 %v1601_v7, 0.0  ;;  %v1603_v13 = vadd.f32 %v1602_v11, %v2963_v42  ;;  %v1647_v20 = vpop.f32.mrf.mxu1 }
 0x185   : > { %v1604_v17 = vpop.f32.mrf.mxu0  ;;  %v2290_v21 = vpack.c.bf16 %v1829_v15, %v1828_v9  ;;  %v1648_v22 = vadd.f32 %v1647_v20, %v2963_v42  ;;  %v1844_v26 = vmax.f32 %v1646_v16, 0.0 }
 0x186   : > { %v2289_v18 = vpack.c.bf16 %v1827_v12, %v1826_v6  ;;  %v1605_v19 = vadd.f32 %v1604_v17, %v2963_v42  ;;  %v1842_v23 = vmax.f32 %v1603_v13, 0.0 }
 0x187   : > { %1953 = vst [vmem:[%s2973_s12 + $0x18] sm:$0xff] %v2290_v21  ;;  %v1845_v27 = vmax.f32 %v1648_v22, 0.0  ;;  %v1990_v22 = vld [vmem:[%s2973_s12 + $0x8] sm:$0xff] (%p2426_p5) }
 0x188   : > { %1952 = vst [vmem:[%s2973_s12 + $0x10] sm:$0xff] %v2289_v18  ;;  %v1843_v25 = vmax.f32 %v1605_v19, 0.0  ;;  %1991 = vst [vmem:[%s1975_s20 + $0x8] sm:$0xff] (%p2426_p5), %v1990_v22 }
 0x189   : > { %v2298_v29 = vpack.c.bf16 %v1845_v27, %v1844_v26 }
 0x18a   : > { %v2297_v28 = vpack.c.bf16 %v1843_v25, %v1842_v23 }
 0x18b   : > { %1961 = vst [vmem:[%s2973_s12 + $0x58] sm:$0xff] %v2298_v29 }
 0x18c   : > { %1960 = vst [vmem:[%s2973_s12 + $0x50] sm:$0xff] %v2297_v28 }
 0x18e   : > { %v1994_v25 = vld [vmem:[%s2973_s12 + $0x18] sm:$0xff] (%p2426_p5) }
 0x18f   : > { %v1992_v23 = vld [vmem:[%s2973_s12 + $0x10] sm:$0xff] (%p2426_p5)  ;;  %1995 = vst [vmem:[%s1975_s20 + $0x18] sm:$0xff] (%p2426_p5), %v1994_v25 }
 0x190   : > { %1993 = vst [vmem:[%s1975_s20 + $0x10] sm:$0xff] (%p2426_p5), %v1992_v23 }
 0x1a6   : > { %v1727_v32 = vpop.f32.mrf.mxu1 }
 0x1a7   : > { %v1684_v30 = vpop.f32.mrf.mxu0  ;;  %v1728_v33 = vadd.f32 %v1727_v32, %v2959_v36  ;;  %v2008_v32 = vld [vmem:[%s2973_s12 + $0x50] sm:$0xff] (%p2426_p5) }
 0x1a8   : > { %v1685_v31 = vadd.f32 %v1684_v30, %v2959_v36  ;;  %v1729_v38 = vpop.f32.mrf.mxu1  ;;  %v2004_v30 = vld [vmem:[%s2973_s12 + $0x40] sm:$0xff] (%p2426_p5)  ;;  %2009 = vst [vmem:[%s1975_s20 + $0x2d0] sm:$0xff] (%p2426_p5), %v2008_v32 }
 0x1a9   : > { %v1686_v34 = vpop.f32.mrf.mxu0  ;;  %v1832_v39 = vmax.f32 %v1728_v33, 0.0  ;;  %v1730_v40 = vadd.f32 %v1729_v38, %v2959_v36  ;;  %2005 = vst [vmem:[%s1975_s20 + $0x2c0] sm:$0xff] (%p2426_p5), %v2004_v30  ;;  %v2010_v33 = vld [vmem:[%s2973_s12 + $0x58] sm:$0xff] (%p2426_p5) }
 0x1aa   : > { %v1830_v35 = vmax.f32 %v1685_v31, 0.0  ;;  %v1687_v37 = vadd.f32 %v1686_v34, %v2959_v36  ;;  %v1731_v45 = vpop.f32.mrf.mxu1  ;;  %v2006_v31 = vld [vmem:[%s2973_s12 + $0x48] sm:$0xff] (%p2426_p5)  ;;  %2011 = vst [vmem:[%s1975_s20 + $0x2d8] sm:$0xff] (%p2426_p5), %v2010_v33 }
 0x1ab   : > { %v1688_v41 = vpop.f32.mrf.mxu0  ;;  %v1833_v46 = vmax.f32 %v1730_v40, 0.0  ;;  %v1732_v53 = vadd.f32 %v1731_v45, %v2963_v42  ;;  %2007 = vst [vmem:[%s1975_s20 + $0x2c8] sm:$0xff] (%p2426_p5), %v2006_v31 }
 0x1ac   : > { %v1831_v43 = vmax.f32 %v1687_v37, 0.0  ;;  %v1689_v44 = vadd.f32 %v1688_v41, %v2963_v42  ;;  %v1733_v50 = vpop.f32.mrf.mxu1 }
 0x1ad   : > { %v1690_v47 = vpop.f32.mrf.mxu0  ;;  %v2292_v51 = vpack.c.bf16 %v1833_v46, %v1832_v39  ;;  %v1734_v52 = vadd.f32 %v1733_v50, %v2963_v42  ;;  %v1848_v55 = vmax.f32 %v1732_v53, 0.0 }
 0x1ae   : > { %v2291_v48 = vpack.c.bf16 %v1831_v43, %v1830_v35  ;;  %v1691_v49 = vadd.f32 %v1690_v47, %v2963_v42  ;;  %v1846_v54 = vmax.f32 %v1689_v44, 0.0 }
 0x1af   : > { %1955 = vst [vmem:[%s2973_s12 + $0x28] sm:$0xff] %v2292_v51  ;;  %v1849_v56 = vmax.f32 %v1734_v52, 0.0 }
 0x1b0   : > { %1954 = vst [vmem:[%s2973_s12 + $0x20] sm:$0xff] %v2291_v48  ;;  %v1847_v24 = vmax.f32 %v1691_v49, 0.0 }
 0x1b1   : > { %v2300_v58 = vpack.c.bf16 %v1849_v56, %v1848_v55 }
 0x1b2   : > { %v2299_v57 = vpack.c.bf16 %v1847_v24, %v1846_v54 }
 0x1b3   : > { %1963 = vst [vmem:[%s2973_s12 + $0x68] sm:$0xff] %v2300_v58 }
 0x1b4   : > { %1962 = vst [vmem:[%s2973_s12 + $0x60] sm:$0xff] %v2299_v57 }
 0x1b6   : > { %v1998_v27 = vld [vmem:[%s2973_s12 + $0x28] sm:$0xff] (%p2426_p5) }
 0x1b7   : > { %v1996_v26 = vld [vmem:[%s2973_s12 + $0x20] sm:$0xff] (%p2426_p5)  ;;  %1999 = vst [vmem:[%s1975_s20 + $0x28] sm:$0xff] (%p2426_p5), %v1998_v27 }
 0x1b8   : > { %1997 = vst [vmem:[%s1975_s20 + $0x20] sm:$0xff] (%p2426_p5), %v1996_v26 }
 0x1ba   : > { %v2014_v35 = vld [vmem:[%s2973_s12 + $0x68] sm:$0xff] (%p2426_p5) }
 0x1bb   : > { %v2012_v34 = vld [vmem:[%s2973_s12 + $0x60] sm:$0xff] (%p2426_p5)  ;;  %2015 = vst [vmem:[%s1975_s20 + $0x2e8] sm:$0xff] (%p2426_p5), %v2014_v35 }
 0x1bc   : > { %2013 = vst [vmem:[%s1975_s20 + $0x2e0] sm:$0xff] (%p2426_p5), %v2012_v34 }
 0x1ce   : > { %v1813_v61 = vpop.f32.mrf.mxu1 }
 0x1cf   : > { %v1770_v59 = vpop.f32.mrf.mxu0  ;;  %v1814_v62 = vadd.f32 %v1813_v61, %v2959_v36 }
 0x1d0   : > { %v1771_v60 = vadd.f32 %v1770_v59, %v2959_v36  ;;  %v1815_v1 = vpop.f32.mrf.mxu1 }
 0x1d1   : > { %v1772_v63 = vpop.f32.mrf.mxu0  ;;  %v1816_v2 = vadd.f32 %v1815_v1, %v2959_v36  ;;  %v1836_v8 = vmax.f32 %v1814_v62, 0.0 }
 0x1d2   : > { %v1773_v0 = vadd.f32 %v1772_v63, %v2959_v36  ;;  %v1834_v4 = vmax.f32 %v1771_v60, 0.0  ;;  %v1817_v7 = vpop.f32.mrf.mxu1 }
 0x1d3   : > { %v1774_v3 = vpop.f32.mrf.mxu0  ;;  %v1837_v9 = vmax.f32 %v1816_v2, 0.0  ;;  %v1818_v10 = vadd.f32 %v1817_v7, %v2963_v42 }
 0x1d4   : > { %v1835_v5 = vmax.f32 %v1773_v0, 0.0  ;;  %v1775_v6 = vadd.f32 %v1774_v3, %v2963_v42  ;;  %v1819_v14 = vpop.f32.mrf.mxu1 }
 0x1d5   : > { %v1776_v11 = vpop.f32.mrf.mxu0  ;;  %v2294_v15 = vpack.c.bf16 %v1837_v9, %v1836_v8  ;;  %v1820_v36 = vadd.f32 %v1819_v14, %v2963_v42  ;;  %v1852_v18 = vmax.f32 %v1818_v10, 0.0 }
 0x1d6   : > { %v2293_v12 = vpack.c.bf16 %v1835_v5, %v1834_v4  ;;  %v1777_v13 = vadd.f32 %v1776_v11, %v2963_v42  ;;  %v1850_v16 = vmax.f32 %v1775_v6, 0.0  ;;  %v1988_v42 = vld [vmem:[%s2973_s12] sm:$0xff] (%p2426_p5) }
 0x1d7   : > { %1957 = vst [vmem:[%s2973_s12 + $0x38] sm:$0xff] %v2294_v15  ;;  %v1853_v19 = vmax.f32 %v1820_v36, 0.0  ;;  %1989 = vst [vmem:[%s1975_s20] sm:$0xff] (%p2426_p5), %v1988_v42 }
 0x1d8   : > { %1956 = vst [vmem:[%s2973_s12 + $0x30] sm:$0xff] %v2293_v12  ;;  %v1851_v17 = vmax.f32 %v1777_v13, 0.0  ;;  %1972 = sbr.rel (!%p2426_p5) target bundleno = 485 (0x1e5), region = 59 }
 0x1d9   : > { %v2302_v21 = vpack.c.bf16 %v1853_v19, %v1852_v18 }
 0x1da   : > { %v2301_v20 = vpack.c.bf16 %v1851_v17, %v1850_v16 }
 0x1db   : > { %1965 = vst [vmem:[%s2973_s12 + $0x78] sm:$0xff] %v2302_v21 }
 0x1dc   : > { %1964 = vst [vmem:[%s2973_s12 + $0x70] sm:$0xff] %v2301_v20 }
 0x1de   : > { %v2002_v29 = vld [vmem:[%s2973_s12 + $0x38] sm:$0xff] }
 0x1df   : > { %v2000_v28 = vld [vmem:[%s2973_s12 + $0x30] sm:$0xff]  ;;  %2003 = vst [vmem:[%s1975_s20 + $0x38] sm:$0xff] %v2002_v29 }
 0x1e0   : > { %2001 = vst [vmem:[%s1975_s20 + $0x30] sm:$0xff] %v2000_v28 }
 0x1e2   : > { %v2018_v38 = vld [vmem:[%s2973_s12 + $0x78] sm:$0xff] }
 0x1e3   : > { %v2016_v37 = vld [vmem:[%s2973_s12 + $0x70] sm:$0xff]  ;;  %2019 = vst [vmem:[%s1975_s20 + $0x2f8] sm:$0xff] %v2018_v38 }
 0x1e4   : > { %2017 = vst [vmem:[%s1975_s20 + $0x2f0] sm:$0xff] %v2016_v37 }
 0x1e5 PF: > { %p10_p10 = scmp.ge.s32.totalorder %s2413_s16, 13   ;;  %s3053_s12 = smov %s2369_s13 }
 0x1e6   : > { %s3054_s13 = smov %s2424_s19  ;;  %s3055_s14 = smov %s2413_s16 }
 0x1e7   :  { %12 = sbr.rel (!%p10_p10) target bundleno = 2 (0x2), region = 113 }

// kernel: net_forward.10
= control target key start
LH: loop header
LB: loop body
LE: loop exit
PB: predicated region body
PF: predicated region fallthrough
CT: control target
= control target key end

     0   :  { %s571_s15 = smov 0   ;;  %s687_s0 = inlined_call_operand.vmem [shape: bf16[96,1024], index: 0, kind: input, shape index: {}]   ;;  %s688_s1 = inlined_call_operand.vmem [shape: bf16[96,1024], index: 1, kind: input, shape index: {}]   ;;  %s689_s2 = inlined_call_operand.vmem [shape: bf16[96,1024], index: 2, kind: input, shape index: {}]   ;;  %s690_s3 = inlined_call_operand.vmem [shape: bf16[96,1024], index: 3, kind: input, shape index: {}]   ;;  %s691_s4 = inlined_call_operand.vmem [shape: bf16[96,1024], index: 4, kind: output, shape index: {}]  }
   0x1 LB: > { %s503_s16 = sadd.s32 4294967295, %s544_s15   ;;  %p507_p0 = scmp.ge.s32.totalorder %s544_s15, 1  ;;  %s544_s15 = sphi %s571_s15, %s14_s15  }
   0x2   : > { %p200_p1 = scmp.lt.s32.totalorder %s544_s15, 4 }
   0x4   : > { %p201_p2 = pnand %p507_p0, %p200_p1 }
   0x5   : > { %s508_s17 = sshll.u32 (!%p201_p2), %s503_s16, 2 }
   0x6   : > { %204 = sbr.rel (%p201_p2) target bundleno = 44 (0x2c), region = 36  ;;  %p247_p3 = scmp.lt.s32.totalorder (!%p201_p2), %s508_s17, 11 }
   0xb   : > { %s693_s17 = smov (!%p247_p3, %s508_s17), 11 }
   0xc   : > { %s525_s18 = sshll.u32 %s693_s17, 5 }
   0xd   : > { %s582_s21 = scalar_lea.vmem %s687_s0, %s525_s18  ;;  %s587_s24 = scalar_lea.vmem %s688_s1, %s525_s18 }
   0xe   : > { %s592_s27 = scalar_lea.vmem %s689_s2, %s525_s18  ;;  %s597_s30 = scalar_lea.vmem %s690_s3, %s525_s18  ;;  %v281_v0 = vld [vmem:[%s582_s21] sm:$0xff]  ;;  %v282_v2 = vld [vmem:[%s582_s21 + $0x8] sm:$0xff]  ;;  %v283_v11 = vld [vmem:[%s582_s21 + $0x10] sm:$0xff] }
   0xf   : > { %v297_v1 = vld [vmem:[%s587_s24] sm:$0xff]  ;;  %v298_v6 = vld [vmem:[%s587_s24 + $0x8] sm:$0xff]  ;;  %s611_s7 = scalar_lea.vmem %s691_s4, %s525_s18  ;;  %v299_v13 = vld [vmem:[%s587_s24 + $0x10] sm:$0xff] }
  0x10   : > { %v313_v3 = vmax.bf16 %v297_v1, %v281_v0  ;;  %v329_v4 = vld [vmem:[%s592_s27] sm:$0xff]  ;;  %v314_v8 = vmax.bf16 %v298_v6, %v282_v2  ;;  %v330_v9 = vld [vmem:[%s592_s27 + $0x8] sm:$0xff]  ;;  %v331_v14 = vld [vmem:[%s592_s27 + $0x10] sm:$0xff]  ;;  %v315_v17 = vmax.bf16 %v299_v13, %v283_v11 }
  0x11   : > { %v345_v5 = vld [vmem:[%s597_s30] sm:$0xff]  ;;  %v346_v10 = vld [vmem:[%s597_s30 + $0x8] sm:$0xff]  ;;  %v347_v15 = vld [vmem:[%s597_s30 + $0x10] sm:$0xff] }
  0x12   : > { %v361_v7 = vmax.bf16 %v345_v5, %v329_v4  ;;  %v362_v12 = vmax.bf16 %v346_v10, %v330_v9  ;;  %v363_v18 = vmax.bf16 %v347_v15, %v331_v14  ;;  %v284_v19 = vld [vmem:[%s582_s21 + $0x18] sm:$0xff]  ;;  %v285_v25 = vld [vmem:[%s582_s21 + $0x20] sm:$0xff]  ;;  %v286_v32 = vld [vmem:[%s582_s21 + $0x28] sm:$0xff] }
  0x13   : > { %v300_v20 = vld [vmem:[%s587_s24 + $0x18] sm:$0xff]  ;;  %v301_v26 = vld [vmem:[%s587_s24 + $0x20] sm:$0xff]  ;;  %v302_v34 = vld [vmem:[%s587_s24 + $0x28] sm:$0xff] }
  0x14   : > { %v377_v16 = vmax.bf16 %v361_v7, %v313_v3  ;;  %v332_v21 = vld [vmem:[%s592_s27 + $0x18] sm:$0xff]  ;;  %v378_v22 = vmax.bf16 %v362_v12, %v314_v8  ;;  %v316_v23 = vmax.bf16 %v300_v20, %v284_v19  ;;  %v379_v27 = vmax.bf16 %v363_v18, %v315_v17  ;;  %v333_v30 = vld [vmem:[%s592_s27 + $0x20] sm:$0xff]  ;;  %v334_v35 = vld [vmem:[%s592_s27 + $0x28] sm:$0xff] }
  0x15   : > { %v348_v24 = vld [vmem:[%s597_s30 + $0x18] sm:$0xff]  ;;  %v317_v29 = vmax.bf16 %v301_v26, %v285_v25  ;;  %v349_v31 = vld [vmem:[%s597_s30 + $0x20] sm:$0xff]  ;;  %v350_v36 = vld [vmem:[%s597_s30 + $0x28] sm:$0xff]  ;;  %v318_v38 = vmax.bf16 %v302_v34, %v286_v32 }
  0x16   : > { %393 = vst [vmem:[%s611_s7] sm:$0xff] %v377_v16  ;;  %v364_v28 = vmax.bf16 %v348_v24, %v332_v21  ;;  %394 = vst [vmem:[%s611_s7 + $0x8] sm:$0xff] %v378_v22  ;;  %v365_v33 = vmax.bf16 %v349_v31, %v333_v30  ;;  %v366_v39 = vmax.bf16 %v350_v36, %v334_v35  ;;  %v287_v40 = vld [vmem:[%s582_s21 + $0x30] sm:$0xff]  ;;  %v288_v46 = vld [vmem:[%s582_s21 + $0x38] sm:$0xff] }
  0x17   : > { %395 = vst [vmem:[%s611_s7 + $0x10] sm:$0xff] %v379_v27  ;;  %v303_v41 = vld [vmem:[%s587_s24 + $0x30] sm:$0xff]  ;;  %v304_v47 = vld [vmem:[%s587_s24 + $0x38] sm:$0xff]  ;;  %v289_v53 = vld [vmem:[%s582_s21 + $0x40] sm:$0xff] }
  0x18   : > { %v380_v37 = vmax.bf16 %v364_v28, %v316_v23  ;;  %v335_v42 = vld [vmem:[%s592_s27 + $0x30] sm:$0xff]  ;;  %v381_v43 = vmax.bf16 %v365_v33, %v317_v29  ;;  %v319_v44 = vmax.bf16 %v303_v41, %v287_v40  ;;  %v382_v48 = vmax.bf16 %v366_v39, %v318_v38  ;;  %v336_v51 = vld [vmem:[%s592_s27 + $0x38] sm:$0xff]  ;;  %v305_v55 = vld [vmem:[%s587_s24 + $0x40] sm:$0xff] }
  0x19   : > { %v351_v45 = vld [vmem:[%s597_s30 + $0x30] sm:$0xff]  ;;  %v320_v50 = vmax.bf16 %v304_v47, %v288_v46  ;;  %v352_v52 = vld [vmem:[%s597_s30 + $0x38] sm:$0xff]  ;;  %v337_v56 = vld [vmem:[%s592_s27 + $0x40] sm:$0xff]  ;;  %v321_v59 = vmax.bf16 %v305_v55, %v289_v53 }
  0x1a   : > { %396 = vst [vmem:[%s611_s7 + $0x18] sm:$0xff] %v380_v37  ;;  %v367_v49 = vmax.bf16 %v351_v45, %v335_v42  ;;  %397 = vst [vmem:[%s611_s7 + $0x20] sm:$0xff] %v381_v43  ;;  %v368_v54 = vmax.bf16 %v352_v52, %v336_v51  ;;  %v353_v57 = vld [vmem:[%s597_s30 + $0x40] sm:$0xff]  ;;  %v290_v61 = vld [vmem:[%s582_s21 + $0x48] sm:$0xff] }
  0x1b   : > { %398 = vst [vmem:[%s611_s7 + $0x28] sm:$0xff] %v382_v48  ;;  %v369_v60 = vmax.bf16 %v353_v57, %v337_v56  ;;  %v306_v62 = vld [vmem:[%s587_s24 + $0x48] sm:$0xff]  ;;  %v291_v3 = vld [vmem:[%s582_s21 + $0x50] sm:$0xff]  ;;  %v292_v10 = vld [vmem:[%s582_s21 + $0x58] sm:$0xff] }
  0x1c   : > { %v383_v58 = vmax.bf16 %v367_v49, %v319_v44  ;;  %v338_v63 = vld [vmem:[%s592_s27 + $0x48] sm:$0xff]  ;;  %v384_v0 = vmax.bf16 %v368_v54, %v320_v50  ;;  %v322_v1 = vmax.bf16 %v306_v62, %v290_v61  ;;  %v307_v4 = vld [vmem:[%s587_s24 + $0x50] sm:$0xff]  ;;  %v308_v12 = vld [vmem:[%s587_s24 + $0x58] sm:$0xff] }
  0x1d   : > { %v354_v2 = vld [vmem:[%s597_s30 + $0x48] sm:$0xff]  ;;  %v385_v5 = vmax.bf16 %v369_v60, %v321_v59  ;;  %v323_v7 = vmax.bf16 %v307_v4, %v291_v3  ;;  %v339_v8 = vld [vmem:[%s592_s27 + $0x50] sm:$0xff]  ;;  %v340_v13 = vld [vmem:[%s592_s27 + $0x58] sm:$0xff]  ;;  %v324_v16 = vmax.bf16 %v308_v12, %v292_v10 }
  0x1e   : > { %399 = vst [vmem:[%s611_s7 + $0x30] sm:$0xff] %v383_v58  ;;  %v370_v6 = vmax.bf16 %v354_v2, %v338_v63  ;;  %v355_v9 = vld [vmem:[%s597_s30 + $0x50] sm:$0xff]  ;;  %400 = vst [vmem:[%s611_s7 + $0x38] sm:$0xff] %v384_v0  ;;  %v356_v14 = vld [vmem:[%s597_s30 + $0x58] sm:$0xff] }
  0x1f   : > { %v371_v11 = vmax.bf16 %v355_v9, %v339_v8  ;;  %401 = vst [vmem:[%s611_s7 + $0x40] sm:$0xff] %v385_v5  ;;  %v372_v17 = vmax.bf16 %v356_v14, %v340_v13  ;;  %v293_v18 = vld [vmem:[%s582_s21 + $0x60] sm:$0xff]  ;;  %v294_v24 = vld [vmem:[%s582_s21 + $0x68] sm:$0xff]  ;;  %v295_v31 = vld [vmem:[%s582_s21 + $0x70] sm:$0xff] }
  0x20   : > { %v386_v15 = vmax.bf16 %v370_v6, %v322_v1  ;;  %v309_v19 = vld [vmem:[%s587_s24 + $0x60] sm:$0xff]  ;;  %v310_v25 = vld [vmem:[%s587_s24 + $0x68] sm:$0xff]  ;;  %v311_v33 = vld [vmem:[%s587_s24 + $0x70] sm:$0xff] }
  0x21   : > { %v341_v20 = vld [vmem:[%s592_s27 + $0x60] sm:$0xff]  ;;  %v387_v21 = vmax.bf16 %v371_v11, %v323_v7  ;;  %v325_v22 = vmax.bf16 %v309_v19, %v293_v18  ;;  %v388_v26 = vmax.bf16 %v372_v17, %v324_v16  ;;  %v326_v28 = vmax.bf16 %v310_v25, %v294_v24  ;;  %v342_v29 = vld [vmem:[%s592_s27 + $0x68] sm:$0xff]  ;;  %v343_v34 = vld [vmem:[%s592_s27 + $0x70] sm:$0xff] }
  0x22   : > { %v357_v23 = vld [vmem:[%s597_s30 + $0x60] sm:$0xff]  ;;  %402 = vst [vmem:[%s611_s7 + $0x48] sm:$0xff] %v386_v15  ;;  %v358_v30 = vld [vmem:[%s597_s30 + $0x68] sm:$0xff]  ;;  %v359_v35 = vld [vmem:[%s597_s30 + $0x70] sm:$0xff]  ;;  %v327_v37 = vmax.bf16 %v311_v33, %v295_v31 }
  0x23   : > { %v373_v27 = vmax.bf16 %v357_v23, %v341_v20  ;;  %403 = vst [vmem:[%s611_s7 + $0x50] sm:$0xff] %v387_v21  ;;  %v374_v32 = vmax.bf16 %v358_v30, %v342_v29  ;;  %404 = vst [vmem:[%s611_s7 + $0x58] sm:$0xff] %v388_v26  ;;  %v375_v38 = vmax.bf16 %v359_v35, %v343_v34  ;;  %v296_v39 = vld [vmem:[%s582_s21 + $0x78] sm:$0xff] }
  0x24   : > { %v312_v40 = vld [vmem:[%s587_s24 + $0x78] sm:$0xff] }
  0x25   : > { %v389_v36 = vmax.bf16 %v373_v27, %v325_v22  ;;  %v344_v41 = vld [vmem:[%s592_s27 + $0x78] sm:$0xff]  ;;  %v390_v42 = vmax.bf16 %v374_v32, %v326_v28  ;;  %v328_v43 = vmax.bf16 %v312_v40, %v296_v39  ;;  %v391_v45 = vmax.bf16 %v375_v38, %v327_v37 }
  0x26   : > { %v360_v44 = vld [vmem:[%s597_s30 + $0x78] sm:$0xff] }
  0x27   : > { %405 = vst [vmem:[%s611_s7 + $0x60] sm:$0xff] %v389_v36  ;;  %v376_v46 = vmax.bf16 %v360_v44, %v344_v41  ;;  %406 = vst [vmem:[%s611_s7 + $0x68] sm:$0xff] %v390_v42 }
  0x28   : > { %407 = vst [vmem:[%s611_s7 + $0x70] sm:$0xff] %v391_v45 }
  0x29   : > { %v392_v47 = vmax.bf16 %v376_v46, %v328_v43 }
  0x2b   : > { %408 = vst [vmem:[%s611_s7 + $0x78] sm:$0xff] %v392_v47 }
  0x2c PF: > { %s14_s15 = sadd.s32 1, %s544_s15  }
  0x2d   : > { %p11_p4 = scmp.ge.s32.totalorder %s14_s15, 5  }
  0x2f   :  { %13 = sbr.rel (!%p11_p4) target bundleno = 1 (0x1), region = 75 }

// kernel: net_forward.11
= control target key start
LH: loop header
LB: loop body
LE: loop exit
PB: predicated region body
PF: predicated region fallthrough
CT: control target
= control target key end

     0   :  { %s2871_s12 = smov 0   ;;  %s3091_s0 = inlined_call_operand.vmem [shape: bf16[8,45056], index: 0, kind: input, shape index: {}]   ;;  %s3092_s1 = inlined_call_operand.vmem [shape: bf16[45056,120], index: 1, kind: input, shape index: {}]   ;;  %s3093_s2 = inlined_call_operand.vmem [shape: f32[1,120], index: 2, kind: input, shape index: {}]   ;;  %s3094_s3 = inlined_call_operand.vmem [shape: bf16[8,120], index: 3, kind: output, shape index: {}]  }
   0x1 LB: > { %s2877_s13 = sadd.s32 4294967295, %s2848_s12   ;;  %p2187_p0 = scmp.ge.s32.totalorder %s2848_s12, 1  ;;  %s2848_s12 = sphi %s2871_s12, %s13_s12  }
   0x2   : > { %p144_p1 = scmp.lt.s32.totalorder %s2848_s12, 17 }
   0x4   : > { %p145_p2 = pnand %p2187_p0, %p144_p1 }
   0x5   : > { %s168_s14 = smul.u32 (!%p145_p2), 22, %s2877_s13  ;;  %p2190_p5 = scmp.ne.s32.totalorder (!%p145_p2), %s2877_s13, 0 }
   0x6   : > { %148 = sbr.rel (%p145_p2) target bundleno = 431 (0x1af), region = 32 }
   0x7   : > { %s174_s15 = smul.u32 (!%p145_p2), 352, %s2877_s13  ;;  %p169_p3 = scmp.lt.s32.totalorder (!%p145_p2), %s168_s14, 351 }
   0x9   : > { %p175_p4 = scmp.lt.s32.totalorder (!%p145_p2), %s174_s15, 5631 }
   0xb   : > { %s3096_s14 = smov (!%p169_p3, %s168_s14), 351  ;;  %s3098_s15 = smov (!%p175_p4, %s174_s15), 5631 }
   0xc   : > { %s2188_s16 = sshll.u32 %s3096_s14, 2  ;;  %s2189_s20 = sshll.u32 %s3098_s15, 2 }
   0xd   : > { %s2886_s19 = scalar_lea.vmem %s3091_s0, %s2188_s16  ;;  %s2891_s23 = scalar_lea.vmem %s3092_s1, %s2189_s20 }
   0xe   : > { %184 = sbr.rel (%p2190_p5) target bundleno = 21 (0x15), region = 36 }
  0x13   : > { %vm185_vm0 = vcmask 982016   ;;  %v2850_v0 = vmov 0.0  }
  0x14   : > { %186 = vst.msk [vmem:[#allocation2] sm:$0xff] %vm185_vm0, %v2850_v0 }
  0x15 PF: > { %v2644_v1 = vld [vmem:[%s2891_s23 + $0x78] sm:$0xff]   ;;  %v2648_v5 = vld [vmem:[%s2891_s23 + $0x70] sm:$0xff]   ;;  %v2652_v9 = vld [vmem:[%s2891_s23 + $0x68] sm:$0xff]   ;;  %vm2125_vm1 = vcmask 982016   ;;  %p2389_p6 = scmp.ne.s32.totalorder %s2877_s13, 15 }
  0x16   : > { %v2645_v2 = vld [vmem:[%s2891_s23 + $0xf8] sm:$0xff]   ;;  %2393 = vmatprep.subr.bf16.mxu0 %v2644_v1  ;;  %v2649_v6 = vld [vmem:[%s2891_s23 + $0xf0] sm:$0xff]   ;;  %v2653_v10 = vld [vmem:[%s2891_s23 + $0xe8] sm:$0xff]  }
  0x17   : > { %v2646_v3 = vld [vmem:[%s2891_s23 + $0x38] sm:$0xff]   ;;  %2415 = vmatprep.subr.bf16.mxu1 %v2645_v2  ;;  %v2650_v7 = vld [vmem:[%s2891_s23 + $0x30] sm:$0xff]   ;;  %v2654_v11 = vld [vmem:[%s2891_s23 + $0x28] sm:$0xff]  }
  0x18   : > { %v2647_v4 = vld [vmem:[%s2891_s23 + $0xb8] sm:$0xff]   ;;  %2394 = vmatpush3.bf16.msra.mxu0 %v2646_v3  ;;  %v2651_v8 = vld [vmem:[%s2891_s23 + $0xb0] sm:$0xff]   ;;  %v2655_v12 = vld [vmem:[%s2891_s23 + $0xa8] sm:$0xff]  }
  0x19   : > { %2416 = vmatpush3.bf16.msra.mxu1 %v2647_v4  ;;  %2395 = vmatprep.subr.bf16.mxu0 %v2648_v5  ;;  %v2656_v13 = vld [vmem:[%s2891_s23 + $0x60] sm:$0xff]   ;;  %v2660_v17 = vld [vmem:[%s2891_s23 + $0x58] sm:$0xff]   ;;  %v2664_v21 = vld [vmem:[%s2891_s23 + $0x50] sm:$0xff]  }
  0x1a   : > { %2417 = vmatprep.subr.bf16.mxu1 %v2649_v6  ;;  %v2657_v14 = vld [vmem:[%s2891_s23 + $0xe0] sm:$0xff]   ;;  %v2661_v18 = vld [vmem:[%s2891_s23 + $0xd8] sm:$0xff]   ;;  %v2665_v22 = vld [vmem:[%s2891_s23 + $0xd0] sm:$0xff]  }
  0x1b   : > { %v2658_v15 = vld [vmem:[%s2891_s23 + $0x20] sm:$0xff]   ;;  %v2662_v19 = vld [vmem:[%s2891_s23 + $0x18] sm:$0xff]   ;;  %v2666_v23 = vld [vmem:[%s2891_s23 + $0x10] sm:$0xff]  }
  0x1c   : > { %2396 = vmatpush3.bf16.msra.mxu0 %v2650_v7  ;;  %v2659_v16 = vld [vmem:[%s2891_s23 + $0xa0] sm:$0xff]   ;;  %v2663_v20 = vld [vmem:[%s2891_s23 + $0x98] sm:$0xff]   ;;  %v2667_v24 = vld [vmem:[%s2891_s23 + $0x90] sm:$0xff]  }
  0x1d   : > { %2418 = vmatpush3.bf16.msra.mxu1 %v2651_v8  ;;  %2397 = vmatprep.subr.bf16.mxu0 %v2652_v9  ;;  %v2668_v25 = vld [vmem:[%s2891_s23 + $0x48] sm:$0xff]   ;;  %v2672_v29 = vld [vmem:[%s2891_s23 + $0x40] sm:$0xff]   ;;  %v2680_v39 = vld [vmem:[%s2891_s23 + $0x178] sm:$0xff]  }
  0x1e   : > { %2419 = vmatprep.subr.bf16.mxu1 %v2653_v10  ;;  %v2669_v26 = vld [vmem:[%s2891_s23 + $0xc8] sm:$0xff]   ;;  %v2673_v30 = vld [vmem:[%s2891_s23 + $0xc0] sm:$0xff]   ;;  %v2681_v40 = vld [vmem:[%s2891_s23 + $0x138] sm:$0xff]  }
  0x1f   : > { %v2670_v27 = vld [vmem:[%s2891_s23 + $0x8] sm:$0xff]   ;;  %v2674_v31 = vld [vmem:[%s2891_s23] sm:$0xff]   ;;  %v2682_v41 = vld [vmem:[%s2891_s23 + $0x1f8] sm:$0xff]  }
  0x20   : > { %2398 = vmatpush3.bf16.msra.mxu0 %v2654_v11  ;;  %v2671_v28 = vld [vmem:[%s2891_s23 + $0x88] sm:$0xff]   ;;  %v2675_v32 = vld [vmem:[%s2891_s23 + $0x80] sm:$0xff]   ;;  %v2683_v42 = vld [vmem:[%s2891_s23 + $0x1b8] sm:$0xff]  }
  0x21   : > { %2420 = vmatpush3.bf16.msra.mxu1 %v2655_v12  ;;  %2399 = vmatprep.subr.bf16.mxu0 %v2656_v13  ;;  %v188_v33 = vld [vmem:[%s2886_s19] sm:$0xff]  ;;  %v189_v34 = vld [vmem:[%s2886_s19 + $0x8] sm:$0xff]  ;;  %v2684_v43 = vld [vmem:[%s2891_s23 + $0x170] sm:$0xff]  }
  0x22   : > { %2421 = vmatprep.subr.bf16.mxu1 %v2657_v14  ;;  %v2191_v35 = vcombine.low %v188_v33, %v188_v33  ;;  %v2192_v36 = vcombine.high %v188_v33, %v188_v33  ;;  %v2193_v37 = vcombine.low %v189_v34, %v189_v34  ;;  %v2194_v38 = vcombine.high %v189_v34, %v189_v34  ;;  %v2685_v44 = vld [vmem:[%s2891_s23 + $0x130] sm:$0xff]   ;;  %v2688_v47 = vld [vmem:[%s2891_s23 + $0x168] sm:$0xff]   ;;  %v2692_v51 = vld [vmem:[%s2891_s23 + $0x160] sm:$0xff]  }
  0x23   : > { %v2686_v45 = vld [vmem:[%s2891_s23 + $0x1f0] sm:$0xff]   ;;  %v2689_v48 = vld [vmem:[%s2891_s23 + $0x128] sm:$0xff]   ;;  %v2693_v52 = vld [vmem:[%s2891_s23 + $0x120] sm:$0xff]  }
  0x24   : > { %2400 = vmatpush3.bf16.msra.mxu0 %v2658_v15  ;;  %1716 = vmatprep.mubr.bf16.mxu0 %v2192_v36  ;;  %v2687_v46 = vld [vmem:[%s2891_s23 + $0x1b0] sm:$0xff]   ;;  %v2690_v49 = vld [vmem:[%s2891_s23 + $0x1e8] sm:$0xff]   ;;  %v2694_v53 = vld [vmem:[%s2891_s23 + $0x1e0] sm:$0xff]  }
  0x25   : > { %2422 = vmatpush3.bf16.msra.mxu1 %v2659_v16  ;;  %2401 = vmatprep.subr.bf16.mxu0 %v2660_v17  ;;  %v2691_v50 = vld [vmem:[%s2891_s23 + $0x1a8] sm:$0xff]   ;;  %v2695_v54 = vld [vmem:[%s2891_s23 + $0x1a0] sm:$0xff]   ;;  %v2696_v55 = vld [vmem:[%s2891_s23 + $0x158] sm:$0xff]  }
  0x26   : > { %2423 = vmatprep.subr.bf16.mxu1 %v2661_v18  ;;  %1756 = vmatprep.mubr.bf16.mxu1 %v2194_v38  ;;  %v2697_v56 = vld [vmem:[%s2891_s23 + $0x118] sm:$0xff]   ;;  %v2700_v59 = vld [vmem:[%s2891_s23 + $0x150] sm:$0xff]   ;;  %v2704_v63 = vld [vmem:[%s2891_s23 + $0x148] sm:$0xff]  }
  0x27   : > { %v2698_v57 = vld [vmem:[%s2891_s23 + $0x1d8] sm:$0xff]   ;;  %v2701_v60 = vld [vmem:[%s2891_s23 + $0x110] sm:$0xff]   ;;  %v2705_v0 = vld [vmem:[%s2891_s23 + $0x108] sm:$0xff]  }
  0x28   : > { %2402 = vmatpush3.bf16.msra.mxu0 %v2662_v19  ;;  %v2699_v58 = vld [vmem:[%s2891_s23 + $0x198] sm:$0xff]   ;;  %v2702_v61 = vld [vmem:[%s2891_s23 + $0x1d0] sm:$0xff]   ;;  %v2706_v1 = vld [vmem:[%s2891_s23 + $0x1c8] sm:$0xff]  }
  0x29   : > { %2424 = vmatpush3.bf16.msra.mxu1 %v2663_v20  ;;  %2403 = vmatprep.subr.bf16.mxu0 %v2664_v21  ;;  %v2703_v62 = vld [vmem:[%s2891_s23 + $0x190] sm:$0xff]   ;;  %v2707_v2 = vld [vmem:[%s2891_s23 + $0x188] sm:$0xff]   ;;  %v2708_v3 = vld [vmem:[%s2891_s23 + $0x140] sm:$0xff]  }
  0x2a   : > { %2425 = vmatprep.subr.bf16.mxu1 %v2665_v22  ;;  %v2709_v4 = vld [vmem:[%s2891_s23 + $0x100] sm:$0xff]   ;;  %v190_v6 = vld [vmem:[%s2886_s19 + $0x10] sm:$0xff]  ;;  %v2714_v10 = vld [vmem:[%s2891_s23 + $0x278] sm:$0xff]  }
  0x2b   : > { %v2710_v5 = vld [vmem:[%s2891_s23 + $0x1c0] sm:$0xff]   ;;  %v2196_v7 = vcombine.high %v190_v6, %v190_v6  ;;  %v2195_v9 = vcombine.low %v190_v6, %v190_v6  ;;  %v191_v11 = vld [vmem:[%s2886_s19 + $0x18] sm:$0xff]  ;;  %v2720_v17 = vld [vmem:[%s2891_s23 + $0x270] sm:$0xff]  }
  0x2c   : > { %2404 = vmatpush3.bf16.msra.mxu0 %v2666_v23  ;;  %v2713_v8 = vld [vmem:[%s2891_s23 + $0x180] sm:$0xff]   ;;  %v2197_v12 = vcombine.low %v191_v11, %v191_v11  ;;  %v2198_v13 = vcombine.high %v191_v11, %v191_v11  ;;  %v2717_v14 = vld [vmem:[%s2891_s23 + $0x238] sm:$0xff]   ;;  %v2721_v18 = vld [vmem:[%s2891_s23 + $0x230] sm:$0xff]  }
  0x2d   : > { %2426 = vmatpush3.bf16.msra.mxu1 %v2667_v24  ;;  %2405 = vmatprep.subr.bf16.mxu0 %v2668_v25  ;;  %v2718_v15 = vld [vmem:[%s2891_s23 + $0x2f8] sm:$0xff]   ;;  %v2722_v19 = vld [vmem:[%s2891_s23 + $0x2f0] sm:$0xff]   ;;  %v2724_v21 = vld [vmem:[%s2891_s23 + $0x268] sm:$0xff]  }
  0x2e   : > { %2427 = vmatprep.subr.bf16.mxu1 %v2669_v26  ;;  %v2719_v16 = vld [vmem:[%s2891_s23 + $0x2b8] sm:$0xff]   ;;  %v2723_v20 = vld [vmem:[%s2891_s23 + $0x2b0] sm:$0xff]   ;;  %v2725_v22 = vld [vmem:[%s2891_s23 + $0x228] sm:$0xff]  }
  0x2f   : > { %v2726_v23 = vld [vmem:[%s2891_s23 + $0x2e8] sm:$0xff]   ;;  %v2728_v25 = vld [vmem:[%s2891_s23 + $0x260] sm:$0xff]   ;;  %v2736_v33 = vld [vmem:[%s2891_s23 + $0x250] sm:$0xff]  }
  0x30   : > { %2406 = vmatpush3.bf16.msra.mxu0 %v2670_v27  ;;  %v2727_v24 = vld [vmem:[%s2891_s23 + $0x2a8] sm:$0xff]   ;;  %v2729_v26 = vld [vmem:[%s2891_s23 + $0x220] sm:$0xff]   ;;  %v2737_v34 = vld [vmem:[%s2891_s23 + $0x210] sm:$0xff]  }
  0x31   : > { %2428 = vmatpush3.bf16.msra.mxu1 %v2671_v28  ;;  %2407 = vmatprep.subr.bf16.mxu0 %v2672_v29  ;;  %v2730_v27 = vld [vmem:[%s2891_s23 + $0x2e0] sm:$0xff]   ;;  %v2732_v29 = vld [vmem:[%s2891_s23 + $0x258] sm:$0xff]   ;;  %v2739_v36 = vld [vmem:[%s2891_s23 + $0x290] sm:$0xff]  }
  0x32   : > { %2429 = vmatprep.subr.bf16.mxu1 %v2673_v30  ;;  %v2731_v28 = vld [vmem:[%s2891_s23 + $0x2a0] sm:$0xff]   ;;  %v2733_v30 = vld [vmem:[%s2891_s23 + $0x218] sm:$0xff]   ;;  %v2741_v38 = vld [vmem:[%s2891_s23 + $0x208] sm:$0xff]  }
  0x33   : > { %v2771_v6 = vld [vmem:[%s2891_s23 + $0x398] sm:$0xff]   ;;  %v2776_v11 = vld [vmem:[%s2891_s23 + $0x348] sm:$0xff]  }
  0x34   : > { %2408 = vmatpush3.bf16.msra.mxu0 %v2674_v31  ;;  %v2734_v31 = vld [vmem:[%s2891_s23 + $0x2d8] sm:$0xff]  }
  0x35   : > { %2430 = vmatpush3.bf16.msra.mxu1 %v2675_v32  ;;  %2437 = vmatprep.subr.bf16.mxu0 %v2680_v39  ;;  %v2735_v32 = vld [vmem:[%s2891_s23 + $0x298] sm:$0xff]   ;;  %v2742_v39 = vld [vmem:[%s2891_s23 + $0x2c8] sm:$0xff]  }
  0x36   : > { %2459 = vmatprep.subr.bf16.mxu1 %v2682_v41  ;;  %v2744_v41 = vld [vmem:[%s2891_s23 + $0x240] sm:$0xff]  }
  0x37   : > { %1717 = vmatmul.mubr.bf16.vlgmr.msra.gmra.mxu0 %v2191_v35  ;;  %v2738_v35 = vld [vmem:[%s2891_s23 + $0x2d0] sm:$0xff]  }
  0x38   : > { %1757 = vmatmul.mubr.bf16.vlgmr.msra.gmra.mxu1 %v2193_v37  ;;  %2438 = vmatpush3.bf16.msra.mxu0 %v2681_v40  ;;  %v2740_v37 = vld [vmem:[%s2891_s23 + $0x248] sm:$0xff]  }
  0x39   : > { %2460 = vmatpush3.bf16.msra.mxu1 %v2683_v42  ;;  %2439 = vmatprep.subr.bf16.mxu0 %v2684_v43  ;;  %v2743_v40 = vld [vmem:[%s2891_s23 + $0x288] sm:$0xff]   ;;  %v2745_v42 = vld [vmem:[%s2891_s23 + $0x200] sm:$0xff]  }
  0x3a   : > { %2461 = vmatprep.subr.bf16.mxu1 %v2686_v45  ;;  %1796 = vmatprep.mubr.bf16.mxu0 %v2196_v7  ;;  %v2746_v43 = vld [vmem:[%s2891_s23 + $0x2c0] sm:$0xff]   ;;  %v2772_v7 = vld [vmem:[%s2891_s23 + $0x350] sm:$0xff]  }
  0x3b   : > { %1836 = vmatprep.mubr.bf16.mxu1 %v2198_v13  ;;  %v2778_v13 = vld [vmem:[%s2891_s23 + $0x3c8] sm:$0xff]  }
  0x3c   : > { %2440 = vmatpush3.bf16.msra.mxu0 %v2685_v44  ;;  %v192_v44 = vld [vmem:[%s2886_s19 + $0x20] sm:$0xff] }
  0x3d   : > { %2462 = vmatpush3.bf16.msra.mxu1 %v2687_v46  ;;  %2441 = vmatprep.subr.bf16.mxu0 %v2688_v47  ;;  %v2199_v45 = vcombine.low %v192_v44, %v192_v44  ;;  %v2200_v46 = vcombine.high %v192_v44, %v192_v44  ;;  %v2749_v47 = vld [vmem:[%s2891_s23 + $0x280] sm:$0xff]   ;;  %v2807_v44 = vld [vmem:[%s2891_s23 + $0x498] sm:$0xff]  }
  0x3e   : > { %2463 = vmatprep.subr.bf16.mxu1 %v2690_v49  ;;  %v193_v49 = vld [vmem:[%s2886_s19 + $0x28] sm:$0xff] }
  0x40   : > { %2442 = vmatpush3.bf16.msra.mxu0 %v2689_v48  ;;  %v2750_v48 = vld [vmem:[%s2891_s23 + $0x378] sm:$0xff]  }
  0x41   : > { %2464 = vmatpush3.bf16.msra.mxu1 %v2691_v50  ;;  %2443 = vmatprep.subr.bf16.mxu0 %v2692_v51  ;;  %v2201_v50 = vcombine.low %v193_v49, %v193_v49  ;;  %v2202_v51 = vcombine.high %v193_v49, %v193_v49  ;;  %v2812_v49 = vld [vmem:[%s2891_s23 + $0x448] sm:$0xff]  }
  0x42   : > { %2465 = vmatprep.subr.bf16.mxu1 %v2694_v53  ;;  %v2754_v53 = vld [vmem:[%s2891_s23 + $0x3f8] sm:$0xff]  }
  0x44   : > { %2444 = vmatpush3.bf16.msra.mxu0 %v2693_v52  ;;  %v2753_v52 = vld [vmem:[%s2891_s23 + $0x338] sm:$0xff]  }
  0x45   : > { %2466 = vmatpush3.bf16.msra.mxu1 %v2695_v54  ;;  %2445 = vmatprep.subr.bf16.mxu0 %v2696_v55  ;;  %v2755_v54 = vld [vmem:[%s2891_s23 + $0x3b8] sm:$0xff]   ;;  %v2756_v55 = vld [vmem:[%s2891_s23 + $0x370] sm:$0xff]  }
  0x46   : > { %2467 = vmatprep.subr.bf16.mxu1 %v2698_v57  ;;  %v2758_v57 = vld [vmem:[%s2891_s23 + $0x3f0] sm:$0xff]  }
  0x48   : > { %2446 = vmatpush3.bf16.msra.mxu0 %v2697_v56  ;;  %v2757_v56 = vld [vmem:[%s2891_s23 + $0x330] sm:$0xff]  }
  0x49   : > { %2468 = vmatpush3.bf16.msra.mxu1 %v2699_v58  ;;  %2447 = vmatprep.subr.bf16.mxu0 %v2700_v59  ;;  %v2759_v58 = vld [vmem:[%s2891_s23 + $0x3b0] sm:$0xff]   ;;  %v2760_v59 = vld [vmem:[%s2891_s23 + $0x368] sm:$0xff]  }
  0x4a   : > { %2469 = vmatprep.subr.bf16.mxu1 %v2702_v61  ;;  %v2762_v61 = vld [vmem:[%s2891_s23 + $0x3e8] sm:$0xff]  }
  0x4c   : > { %2448 = vmatpush3.bf16.msra.mxu0 %v2701_v60  ;;  %v2761_v60 = vld [vmem:[%s2891_s23 + $0x328] sm:$0xff]  }
  0x4d   : > { %2470 = vmatpush3.bf16.msra.mxu1 %v2703_v62  ;;  %2449 = vmatprep.subr.bf16.mxu0 %v2704_v63  ;;  %v2763_v62 = vld [vmem:[%s2891_s23 + $0x3a8] sm:$0xff]   ;;  %v2764_v63 = vld [vmem:[%s2891_s23 + $0x360] sm:$0xff]  }
  0x4e   : > { %2471 = vmatprep.subr.bf16.mxu1 %v2706_v1  ;;  %v2766_v1 = vld [vmem:[%s2891_s23 + $0x3e0] sm:$0xff]  }
  0x50   : > { %2450 = vmatpush3.bf16.msra.mxu0 %v2705_v0  ;;  %v2765_v0 = vld [vmem:[%s2891_s23 + $0x320] sm:$0xff]  }
  0x51   : > { %2472 = vmatpush3.bf16.msra.mxu1 %v2707_v2  ;;  %2451 = vmatprep.subr.bf16.mxu0 %v2708_v3  ;;  %v2767_v2 = vld [vmem:[%s2891_s23 + $0x3a0] sm:$0xff]   ;;  %v2768_v3 = vld [vmem:[%s2891_s23 + $0x358] sm:$0xff]  }
  0x52   : > { %2473 = vmatprep.subr.bf16.mxu1 %v2710_v5  ;;  %v2770_v5 = vld [vmem:[%s2891_s23 + $0x3d8] sm:$0xff]  }
  0x54   : > { %2452 = vmatpush3.bf16.msra.mxu0 %v2709_v4  ;;  %v2769_v4 = vld [vmem:[%s2891_s23 + $0x318] sm:$0xff]  }
  0x55   : > { %2474 = vmatpush3.bf16.msra.mxu1 %v2713_v8  ;;  %2481 = vmatprep.subr.bf16.mxu0 %v2714_v10  ;;  %v2773_v8 = vld [vmem:[%s2891_s23 + $0x310] sm:$0xff]  }
  0x56   : > { %2503 = vmatprep.subr.bf16.mxu1 %v2718_v15  ;;  %v2775_v10 = vld [vmem:[%s2891_s23 + $0x390] sm:$0xff]   ;;  %v2780_v15 = vld [vmem:[%s2891_s23 + $0x340] sm:$0xff]  }
  0x57   : > { %1797 = vmatmul.mubr.bf16.vlgmr.msra.gmra.mxu0 %v2195_v9  ;;  %v2774_v9 = vld [vmem:[%s2891_s23 + $0x3d0] sm:$0xff]  }
  0x58   : > { %2482 = vmatpush3.bf16.msra.mxu0 %v2717_v14  ;;  %1837 = vmatmul.mubr.bf16.vlgmr.msra.gmra.mxu1 %v2197_v12  ;;  %v2777_v12 = vld [vmem:[%s2891_s23 + $0x308] sm:$0xff]  }
  0x59   : > { %2504 = vmatpush3.bf16.msra.mxu1 %v2719_v16  ;;  %2483 = vmatprep.subr.bf16.mxu0 %v2720_v17  ;;  %v2779_v14 = vld [vmem:[%s2891_s23 + $0x388] sm:$0xff]   ;;  %v2781_v16 = vld [vmem:[%s2891_s23 + $0x300] sm:$0xff]  }
  0x5a   : > { %2505 = vmatprep.subr.bf16.mxu1 %v2722_v19  ;;  %1876 = vmatprep.mubr.bf16.mxu0 %v2200_v46  ;;  %v2782_v17 = vld [vmem:[%s2891_s23 + $0x3c0] sm:$0xff]   ;;  %v2809_v46 = vld [vmem:[%s2891_s23 + $0x410] sm:$0xff]  }
  0x5b   : > { %1916 = vmatprep.mubr.bf16.mxu1 %v2202_v51  ;;  %v2814_v51 = vld [vmem:[%s2891_s23 + $0x4c8] sm:$0xff]  }
  0x5c   : > { %2484 = vmatpush3.bf16.msra.mxu0 %v2721_v18  ;;  %v194_v18 = vld [vmem:[%s2886_s19 + $0x30] sm:$0xff] }
  0x5d   : > { %2506 = vmatpush3.bf16.msra.mxu1 %v2723_v20  ;;  %2485 = vmatprep.subr.bf16.mxu0 %v2724_v21  ;;  %v2203_v19 = vcombine.low %v194_v18, %v194_v18  ;;  %v2204_v20 = vcombine.high %v194_v18, %v194_v18  ;;  %v2785_v21 = vld [vmem:[%s2891_s23 + $0x380] sm:$0xff]  }
  0x5e   : > { %2507 = vmatprep.subr.bf16.mxu1 %v2726_v23  ;;  %v195_v23 = vld [vmem:[%s2886_s19 + $0x38] sm:$0xff] }
  0x60   : > { %2486 = vmatpush3.bf16.msra.mxu0 %v2725_v22  ;;  %v2786_v22 = vld [vmem:[%s2891_s23 + $0x478] sm:$0xff]  }
  0x61   : > { %2508 = vmatpush3.bf16.msra.mxu1 %v2727_v24  ;;  %2487 = vmatprep.subr.bf16.mxu0 %v2728_v25  ;;  %v2205_v24 = vcombine.low %v195_v23, %v195_v23  ;;  %v2206_v25 = vcombine.high %v195_v23, %v195_v23 }
  0x62   : > { %2509 = vmatprep.subr.bf16.mxu1 %v2730_v27  ;;  %v2790_v27 = vld [vmem:[%s2891_s23 + $0x4f8] sm:$0xff]  }
  0x64   : > { %2488 = vmatpush3.bf16.msra.mxu0 %v2729_v26  ;;  %v2789_v26 = vld [vmem:[%s2891_s23 + $0x438] sm:$0xff]  }
  0x65   : > { %2510 = vmatpush3.bf16.msra.mxu1 %v2731_v28  ;;  %2489 = vmatprep.subr.bf16.mxu0 %v2732_v29  ;;  %v2791_v28 = vld [vmem:[%s2891_s23 + $0x4b8] sm:$0xff]   ;;  %v2792_v29 = vld [vmem:[%s2891_s23 + $0x470] sm:$0xff]  }
  0x66   : > { %2511 = vmatprep.subr.bf16.mxu1 %v2734_v31  ;;  %v2794_v31 = vld [vmem:[%s2891_s23 + $0x4f0] sm:$0xff]  }
  0x68   : > { %2490 = vmatpush3.bf16.msra.mxu0 %v2733_v30  ;;  %v2793_v30 = vld [vmem:[%s2891_s23 + $0x430] sm:$0xff]  }
  0x69   : > { %2512 = vmatpush3.bf16.msra.mxu1 %v2735_v32  ;;  %2491 = vmatprep.subr.bf16.mxu0 %v2736_v33  ;;  %v2795_v32 = vld [vmem:[%s2891_s23 + $0x4b0] sm:$0xff]   ;;  %v2796_v33 = vld [vmem:[%s2891_s23 + $0x468] sm:$0xff]  }
  0x6a   : > { %2513 = vmatprep.subr.bf16.mxu1 %v2738_v35  ;;  %v2798_v35 = vld [vmem:[%s2891_s23 + $0x4e8] sm:$0xff]  }
  0x6c   : > { %2492 = vmatpush3.bf16.msra.mxu0 %v2737_v34  ;;  %v2797_v34 = vld [vmem:[%s2891_s23 + $0x428] sm:$0xff]  }
  0x6d   : > { %2514 = vmatpush3.bf16.msra.mxu1 %v2739_v36  ;;  %2493 = vmatprep.subr.bf16.mxu0 %v2740_v37  ;;  %v2799_v36 = vld [vmem:[%s2891_s23 + $0x4a8] sm:$0xff]   ;;  %v2800_v37 = vld [vmem:[%s2891_s23 + $0x460] sm:$0xff]  }
  0x6e   : > { %2515 = vmatprep.subr.bf16.mxu1 %v2742_v39  ;;  %v2802_v39 = vld [vmem:[%s2891_s23 + $0x4e0] sm:$0xff]  }
  0x70   : > { %2494 = vmatpush3.bf16.msra.mxu0 %v2741_v38  ;;  %v2801_v38 = vld [vmem:[%s2891_s23 + $0x420] sm:$0xff]  }
  0x71   : > { %2516 = vmatpush3.bf16.msra.mxu1 %v2743_v40  ;;  %2495 = vmatprep.subr.bf16.mxu0 %v2744_v41  ;;  %v2803_v40 = vld [vmem:[%s2891_s23 + $0x4a0] sm:$0xff]   ;;  %v2804_v41 = vld [vmem:[%s2891_s23 + $0x458] sm:$0xff]  }
  0x72   : > { %2517 = vmatprep.subr.bf16.mxu1 %v2746_v43  ;;  %v2806_v43 = vld [vmem:[%s2891_s23 + $0x4d8] sm:$0xff]  }
  0x74   : > { %2496 = vmatpush3.bf16.msra.mxu0 %v2745_v42  ;;  %v2805_v42 = vld [vmem:[%s2891_s23 + $0x418] sm:$0xff]  }
  0x75   : > { %2518 = vmatpush3.bf16.msra.mxu1 %v2749_v47  ;;  %2525 = vmatprep.subr.bf16.mxu0 %v2750_v48  ;;  %v2810_v47 = vld [vmem:[%s2891_s23 + $0x4d0] sm:$0xff]  }
  0x76   : > { %2547 = vmatprep.subr.bf16.mxu1 %v2754_v53  ;;  %v2811_v48 = vld [vmem:[%s2891_s23 + $0x490] sm:$0xff]   ;;  %v2816_v53 = vld [vmem:[%s2891_s23 + $0x440] sm:$0xff]  }
  0x77   : > { %1877 = vmatmul.mubr.bf16.vlgmr.msra.gmra.mxu0 %v2199_v45  ;;  %v2808_v45 = vld [vmem:[%s2891_s23 + $0x450] sm:$0xff]  }
  0x78   : > { %2526 = vmatpush3.bf16.msra.mxu0 %v2753_v52  ;;  %1917 = vmatmul.mubr.bf16.vlgmr.msra.gmra.mxu1 %v2201_v50  ;;  %v2813_v50 = vld [vmem:[%s2891_s23 + $0x408] sm:$0xff]  }
  0x79   : > { %2548 = vmatpush3.bf16.msra.mxu1 %v2755_v54  ;;  %2527 = vmatprep.subr.bf16.mxu0 %v2756_v55  ;;  %v2815_v52 = vld [vmem:[%s2891_s23 + $0x488] sm:$0xff]   ;;  %v2817_v54 = vld [vmem:[%s2891_s23 + $0x400] sm:$0xff]  }
  0x7a   : > { %2549 = vmatprep.subr.bf16.mxu1 %v2758_v57  ;;  %1956 = vmatprep.mubr.bf16.mxu0 %v2204_v20  ;;  %v2818_v55 = vld [vmem:[%s2891_s23 + $0x4c0] sm:$0xff]  }
  0x7b   : > { %1996 = vmatprep.mubr.bf16.mxu1 %v2206_v25 }
  0x7c   : > { %2528 = vmatpush3.bf16.msra.mxu0 %v2757_v56  ;;  %v196_v56 = vld [vmem:[%s2886_s19 + $0x40] sm:$0xff] }
  0x7d   : > { %2550 = vmatpush3.bf16.msra.mxu1 %v2759_v58  ;;  %2529 = vmatprep.subr.bf16.mxu0 %v2760_v59  ;;  %v2207_v57 = vcombine.low %v196_v56, %v196_v56  ;;  %v2208_v58 = vcombine.high %v196_v56, %v196_v56  ;;  %v2821_v59 = vld [vmem:[%s2891_s23 + $0x480] sm:$0xff]  }
  0x7e   : > { %2551 = vmatprep.subr.bf16.mxu1 %v2762_v61  ;;  %v197_v61 = vld [vmem:[%s2886_s19 + $0x48] sm:$0xff] }
  0x80   : > { %2530 = vmatpush3.bf16.msra.mxu0 %v2761_v60  ;;  %v2822_v60 = vld [vmem:[%s2891_s23 + $0x578] sm:$0xff]  }
  0x81   : > { %2552 = vmatpush3.bf16.msra.mxu1 %v2763_v62  ;;  %2531 = vmatprep.subr.bf16.mxu0 %v2764_v63  ;;  %v2209_v62 = vcombine.low %v197_v61, %v197_v61  ;;  %v2210_v63 = vcombine.high %v197_v61, %v197_v61 }
  0x82   : > { %2553 = vmatprep.subr.bf16.mxu1 %v2766_v1  ;;  %v2826_v1 = vld [vmem:[%s2891_s23 + $0x570] sm:$0xff]  }
  0x84   : > { %2532 = vmatpush3.bf16.msra.mxu0 %v2765_v0  ;;  %v2825_v0 = vld [vmem:[%s2891_s23 + $0x538] sm:$0xff]  }
  0x85   : > { %2554 = vmatpush3.bf16.msra.mxu1 %v2767_v2  ;;  %2533 = vmatprep.subr.bf16.mxu0 %v2768_v3  ;;  %v2827_v2 = vld [vmem:[%s2891_s23 + $0x530] sm:$0xff]   ;;  %v2828_v3 = vld [vmem:[%s2891_s23 + $0x568] sm:$0xff]  }
  0x86   : > { %2555 = vmatprep.subr.bf16.mxu1 %v2770_v5  ;;  %v2830_v5 = vld [vmem:[%s2891_s23 + $0x560] sm:$0xff]  }
  0x88   : > { %2534 = vmatpush3.bf16.msra.mxu0 %v2769_v4  ;;  %v2829_v4 = vld [vmem:[%s2891_s23 + $0x528] sm:$0xff]  }
  0x89   : > { %2556 = vmatpush3.bf16.msra.mxu1 %v2771_v6  ;;  %2535 = vmatprep.subr.bf16.mxu0 %v2772_v7  ;;  %v2831_v6 = vld [vmem:[%s2891_s23 + $0x520] sm:$0xff]   ;;  %v2832_v7 = vld [vmem:[%s2891_s23 + $0x558] sm:$0xff]  }
  0x8a   : > { %2557 = vmatprep.subr.bf16.mxu1 %v2774_v9  ;;  %v198_v9 = vld [vmem:[%s2886_s19 + $0x50] sm:$0xff] }
  0x8c   : > { %2536 = vmatpush3.bf16.msra.mxu0 %v2773_v8  ;;  %v2833_v8 = vld [vmem:[%s2891_s23 + $0x518] sm:$0xff]  }
  0x8d   : > { %2558 = vmatpush3.bf16.msra.mxu1 %v2775_v10  ;;  %2537 = vmatprep.subr.bf16.mxu0 %v2776_v11  ;;  %v2834_v10 = vld [vmem:[%s2891_s23 + $0x550] sm:$0xff]   ;;  %v2212_v11 = vcombine.high %v198_v9, %v198_v9 }
  0x8e   : > { %2559 = vmatprep.subr.bf16.mxu1 %v2778_v13  ;;  %v2836_v13 = vld [vmem:[%s2891_s23 + $0x548] sm:$0xff]  }
  0x90   : > { %2538 = vmatpush3.bf16.msra.mxu0 %v2777_v12  ;;  %v2835_v12 = vld [vmem:[%s2891_s23 + $0x510] sm:$0xff]  }
  0x91   : > { %2560 = vmatpush3.bf16.msra.mxu1 %v2779_v14  ;;  %2539 = vmatprep.subr.bf16.mxu0 %v2780_v15  ;;  %v2837_v14 = vld [vmem:[%s2891_s23 + $0x508] sm:$0xff]   ;;  %v2838_v15 = vld [vmem:[%s2891_s23 + $0x540] sm:$0xff]  }
  0x92   : > { %2561 = vmatprep.subr.bf16.mxu1 %v2782_v17  ;;  %v2211_v17 = vcombine.low %v198_v9, %v198_v9 }
  0x94   : > { %2540 = vmatpush3.bf16.msra.mxu0 %v2781_v16  ;;  %v2839_v16 = vld [vmem:[%s2891_s23 + $0x500] sm:$0xff]  }
  0x95   : > { %2562 = vmatpush3.bf16.msra.mxu1 %v2785_v21  ;;  %2569 = vmatprep.subr.bf16.mxu0 %v2786_v22 }
  0x96   : > { %2591 = vmatprep.subr.bf16.mxu1 %v2790_v27 }
  0x97   : > { %1957 = vmatmul.mubr.bf16.vlgmr.msra.gmra.mxu0 %v2203_v19 }
  0x98   : > { %2570 = vmatpush3.bf16.msra.mxu0 %v2789_v26  ;;  %1997 = vmatmul.mubr.bf16.vlgmr.msra.gmra.mxu1 %v2205_v24 }
  0x99   : > { %2592 = vmatpush3.bf16.msra.mxu1 %v2791_v28  ;;  %2571 = vmatprep.subr.bf16.mxu0 %v2792_v29 }
  0x9a   : > { %2593 = vmatprep.subr.bf16.mxu1 %v2794_v31  ;;  %2036 = vmatprep.mubr.bf16.mxu0 %v2208_v58 }
  0x9b   : > { %2076 = vmatprep.mubr.bf16.mxu1 %v2210_v63 }
  0x9c   : > { %2572 = vmatpush3.bf16.msra.mxu0 %v2793_v30 }
  0x9d   : > { %2594 = vmatpush3.bf16.msra.mxu1 %v2795_v32  ;;  %2573 = vmatprep.subr.bf16.mxu0 %v2796_v33 }
  0x9e   : > { %2595 = vmatprep.subr.bf16.mxu1 %v2798_v35 }
  0xa0   : > { %2574 = vmatpush3.bf16.msra.mxu0 %v2797_v34 }
  0xa1   : > { %2596 = vmatpush3.bf16.msra.mxu1 %v2799_v36  ;;  %2575 = vmatprep.subr.bf16.mxu0 %v2800_v37 }
  0xa2   : > { %2597 = vmatprep.subr.bf16.mxu1 %v2802_v39 }
  0xa4   : > { %2576 = vmatpush3.bf16.msra.mxu0 %v2801_v38 }
  0xa5   : > { %2598 = vmatpush3.bf16.msra.mxu1 %v2803_v40  ;;  %2577 = vmatprep.subr.bf16.mxu0 %v2804_v41 }
  0xa6   : > { %2599 = vmatprep.subr.bf16.mxu1 %v2806_v43 }
  0xa8   : > { %2578 = vmatpush3.bf16.msra.mxu0 %v2805_v42 }
  0xa9   : > { %2600 = vmatpush3.bf16.msra.mxu1 %v2807_v44  ;;  %2579 = vmatprep.subr.bf16.mxu0 %v2808_v45 }
  0xaa   : > { %2601 = vmatprep.subr.bf16.mxu1 %v2810_v47 }
  0xac   : > { %2580 = vmatpush3.bf16.msra.mxu0 %v2809_v46 }
  0xad   : > { %2602 = vmatpush3.bf16.msra.mxu1 %v2811_v48  ;;  %2581 = vmatprep.subr.bf16.mxu0 %v2812_v49 }
  0xae   : > { %2603 = vmatprep.subr.bf16.mxu1 %v2814_v51 }
  0xb0   : > { %2582 = vmatpush3.bf16.msra.mxu0 %v2813_v50 }
  0xb1   : > { %2604 = vmatpush3.bf16.msra.mxu1 %v2815_v52  ;;  %2583 = vmatprep.subr.bf16.mxu0 %v2816_v53 }
  0xb2   : > { %2605 = vmatprep.subr.bf16.mxu1 %v2818_v55 }
  0xb4   : > { %2584 = vmatpush3.bf16.msra.mxu0 %v2817_v54 }
  0xb5   : > { %2606 = vmatpush3.bf16.msra.mxu1 %v2821_v59  ;;  %2613 = vmatprep.subr.bf16.mxu0 %v2822_v60 }
  0xb7   : > { %2037 = vmatmul.mubr.bf16.vlgmr.msra.gmra.mxu0 %v2207_v57 }
  0xb8   : > { %2614 = vmatpush3.bf16.msra.mxu0 %v2825_v0  ;;  %2077 = vmatmul.mubr.bf16.vlgmr.msra.gmra.mxu1 %v2209_v62 }
  0xb9   : > { %2615 = vmatprep.subr.bf16.mxu0 %v2826_v1  ;;  %2116 = vmatprep.mubr.bf16.mxu0 %v2212_v11 }
  0xbc   : > { %2616 = vmatpush3.bf16.msra.mxu0 %v2827_v2 }
  0xbd   : > { %2617 = vmatprep.subr.bf16.mxu0 %v2828_v3 }
  0xc0   : > { %2618 = vmatpush3.bf16.msra.mxu0 %v2829_v4 }
  0xc1   : > { %2619 = vmatprep.subr.bf16.mxu0 %v2830_v5 }
  0xc4   : > { %2620 = vmatpush3.bf16.msra.mxu0 %v2831_v6 }
  0xc5   : > { %2621 = vmatprep.subr.bf16.mxu0 %v2832_v7 }
  0xc8   : > { %2622 = vmatpush3.bf16.msra.mxu0 %v2833_v8 }
  0xc9   : > { %2623 = vmatprep.subr.bf16.mxu0 %v2834_v10 }
  0xcc   : > { %2624 = vmatpush3.bf16.msra.mxu0 %v2835_v12 }
  0xcd   : > { %2625 = vmatprep.subr.bf16.mxu0 %v2836_v13 }
  0xd0   : > { %2626 = vmatpush3.bf16.msra.mxu0 %v2837_v14 }
  0xd1   : > { %2627 = vmatprep.subr.bf16.mxu0 %v2838_v15 }
  0xd4   : > { %2628 = vmatpush3.bf16.msra.mxu0 %v2839_v16  ;;  %v187_v16 = vld [vmem:[#allocation2] sm:$0xff] }
  0xd7   : > { %2117 = vmatmul.mubr.bf16.vlgmr.msra.gmra.mxu0 %v2211_v17 }
  0xf7   : > { %v2409_v18 = vpop.f32.mrf.mxu0 }
  0xf8   : > { %v2431_v19 = vpop.f32.mrf.mxu1 }
  0xf9   : > { %v2410_v20 = vpop.f32.mrf.mxu0 }
  0xfa   : > { %v2432_v21 = vpop.f32.mrf.mxu1  ;;  %v2411_v22 = vadd.f32 %v2410_v20, %v2409_v18 }
  0xfb   : > { %v2433_v23 = vadd.f32 %v2432_v21, %v2431_v19  ;;  %v2412_v24 = vpop.f32.mrf.mxu0 }
  0xfc   : > { %v2434_v25 = vpop.f32.mrf.mxu1 }
  0xfd   : > { %v1759_v26 = vadd.f32 %v2433_v23, %v2411_v22  ;;  %v2413_v27 = vpop.f32.mrf.mxu0 }
  0xfe   : > { %v2435_v28 = vpop.f32.mrf.mxu1 }
 0x117   : > { %v2453_v29 = vpop.f32.mrf.mxu0 }
 0x118   : > { %v2475_v30 = vpop.f32.mrf.mxu1 }
 0x119   : > { %v2454_v31 = vpop.f32.mrf.mxu0 }
 0x11a   : > { %v2455_v32 = vadd.f32 %v2454_v31, %v2453_v29  ;;  %v2476_v33 = vpop.f32.mrf.mxu1 }
 0x11b   : > { %v2456_v34 = vpop.f32.mrf.mxu0  ;;  %v2477_v35 = vadd.f32 %v2476_v33, %v2475_v30 }
 0x11c   : > { %v1799_v36 = vadd.f32 %v2455_v32, %v1759_v26  ;;  %v2478_v37 = vpop.f32.mrf.mxu1 }
 0x11d   : > { %v2457_v38 = vpop.f32.mrf.mxu0 }
 0x11e   : > { %v1839_v39 = vadd.f32 %v2477_v35, %v1799_v36  ;;  %v2479_v40 = vpop.f32.mrf.mxu1 }
 0x137   : > { %v2497_v41 = vpop.f32.mrf.mxu0 }
 0x138   : > { %v2519_v43 = vpop.f32.mrf.mxu1 }
 0x139   : > { %v2498_v42 = vpop.f32.mrf.mxu0 }
 0x13a   : > { %v2499_v44 = vadd.f32 %v2498_v42, %v2497_v41  ;;  %v2520_v46 = vpop.f32.mrf.mxu1 }
 0x13b   : > { %v2500_v45 = vpop.f32.mrf.mxu0  ;;  %v2521_v48 = vadd.f32 %v2520_v46, %v2519_v43 }
 0x13c   : > { %v1879_v47 = vadd.f32 %v2499_v44, %v1839_v39  ;;  %v2522_v50 = vpop.f32.mrf.mxu1 }
 0x13d   : > { %v2501_v49 = vpop.f32.mrf.mxu0 }
 0x13e   : > { %v1919_v51 = vadd.f32 %v2521_v48, %v1879_v47  ;;  %v2523_v52 = vpop.f32.mrf.mxu1 }
 0x157   : > { %v2541_v53 = vpop.f32.mrf.mxu0 }
 0x158   : > { %v2563_v55 = vpop.f32.mrf.mxu1 }
 0x159   : > { %v2542_v54 = vpop.f32.mrf.mxu0 }
 0x15a   : > { %v2564_v57 = vpop.f32.mrf.mxu1  ;;  %v2543_v5 = vadd.f32 %v2542_v54, %v2541_v53 }
 0x15b   : > { %v2544_v56 = vpop.f32.mrf.mxu0  ;;  %v2565_v7 = vadd.f32 %v2564_v57, %v2563_v55 }
 0x15c   : > { %v2566_v59 = vpop.f32.mrf.mxu1  ;;  %v1959_v6 = vadd.f32 %v2543_v5, %v1919_v51 }
 0x15d   : > { %v2545_v58 = vpop.f32.mrf.mxu0 }
 0x15e   : > { %v2567_v60 = vpop.f32.mrf.mxu1  ;;  %v1999_v9 = vadd.f32 %v2565_v7, %v1959_v6 }
 0x177   : > { %v2585_v61 = vpop.f32.mrf.mxu0 }
 0x178   : > { %v2607_v63 = vpop.f32.mrf.mxu1 }
 0x179   : > { %v2586_v62 = vpop.f32.mrf.mxu0 }
 0x17a   : > { %v2608_v1 = vpop.f32.mrf.mxu1  ;;  %v2587_v8 = vadd.f32 %v2586_v62, %v2585_v61 }
 0x17b   : > { %v2588_v0 = vpop.f32.mrf.mxu0  ;;  %v2609_v11 = vadd.f32 %v2608_v1, %v2607_v63 }
 0x17c   : > { %v2610_v3 = vpop.f32.mrf.mxu1  ;;  %v2039_v10 = vadd.f32 %v2587_v8, %v1999_v9 }
 0x17d   : > { %v2589_v2 = vpop.f32.mrf.mxu0 }
 0x17e   : > { %v2611_v4 = vpop.f32.mrf.mxu1  ;;  %v2079_v14 = vadd.f32 %v2609_v11, %v2039_v10 }
 0x197   : > { %v2629_v12 = vpop.f32.mrf.mxu0 }
 0x199   : > { %v2630_v13 = vpop.f32.mrf.mxu0 }
 0x19a   : > { %v2631_v15 = vadd.f32 %v2630_v13, %v2629_v12 }
 0x19b   : > { %v2632_v17 = vpop.f32.mrf.mxu0 }
 0x19c   : > { %v2119_v18 = vadd.f32 %v2631_v15, %v2079_v14  ;;  %2130 = sbr.rel (%p2389_p6) target bundleno = 431 (0x1af), region = 40 }
 0x19d   : > { %v2633_v19 = vpop.f32.mrf.mxu0 }
 0x19e   : > { %v2124_v20 = vadd.f32 %v2119_v18, %v187_v16 }
 0x1a0   : > { %2126 = vst.msk [vmem:[#allocation2] sm:$0xff] %vm2125_vm1, %v2124_v20 }
 0x1a1   : > { %v2390_v22 = vld [vmem:[%s3093_s2] ss:$0 sm:$0xff]  ;;  %vm2142_vm2 = vcmask 977920  }
 0x1a7   : > { %v2131_v21 = vld [vmem:[#allocation2] sm:$0xff] }
 0x1a8   : > { %v2139_v23 = vadd.f32 %v2390_v22, %v2131_v21 }
 0x1aa   : > { %v2140_v24 = vmax.f32 %v2139_v23, 0.0 }
 0x1ac   : > { %v2141_v25 = vpack.c.bf16 %v2140_v24, %v2140_v24 }
 0x1ae   : > { %2143 = vst.msk [vmem:[%s3094_s3] sm:$0xf] %vm2142_vm2, %v2141_v25 }
 0x1af PF: > { %s13_s12 = sadd.s32 1, %s2848_s12  }
 0x1b0   : > { %p10_p7 = scmp.ge.s32.totalorder %s13_s12, 18  }
 0x1b2   :  { %12 = sbr.rel (!%p10_p7) target bundleno = 1 (0x1), region = 69 }

// kernel: net_forward.12
= control target key start
LH: loop header
LB: loop body
LE: loop exit
PB: predicated region body
PF: predicated region fallthrough
CT: control target
= control target key end

     0   :  { %vm87_vm0 = vcmask 1043456   ;;  %v188_v0 = vmov 0.0   ;;  %vm189_vm1 = vmmov 0   ;;  %vm83_vm2 = vcmask 982016   ;;  %s243_s1 = inlined_call_operand.vmem [shape: bf16[120,60], index: 1, kind: input, shape index: {}]   ;;  %s244_s0 = inlined_call_operand.vmem [shape: bf16[8,120], index: 0, kind: input, shape index: {}]   ;;  %s245_s2 = inlined_call_operand.vmem [shape: f32[1,60], index: 2, kind: input, shape index: {}]   ;;  %s246_s3 = inlined_call_operand.vmem [shape: bf16[8,60], index: 3, kind: output, shape index: {}]  }
   0x1   :  { %158 = vmatprep.subr.bf16.mxu0 %v188_v0  ;;  %v180_v1 = vld [vmem:[%s243_s1 + $0x38] ss:$0 sps:$4 sm:$0xff]   ;;  %174 = vmatprep.mubr.msk.bf16.mxu0 %vm189_vm1, %v188_v0  ;;  %v181_v3 = vld [vmem:[%s243_s1 + $0x30] sm:$0xff]   ;;  %v182_v4 = vld [vmem:[%s243_s1 + $0x28] sm:$0xff]   ;;  %vm133_vm3 = vcmask 486400  }
   0x2   :  { %v89_v2 = vsel %vm87_vm0, %v180_v1, 0  ;;  %v183_v5 = vld [vmem:[%s243_s1 + $0x20] sm:$0xff]   ;;  %v184_v6 = vld [vmem:[%s243_s1 + $0x18] sm:$0xff]   ;;  %v185_v7 = vld [vmem:[%s243_s1 + $0x10] sm:$0xff]  }
   0x3   :  { %159 = vmatpush3.bf16.msra.mxu0 %v89_v2  ;;  %v186_v8 = vld [vmem:[%s243_s1 + $0x8] sm:$0xff]   ;;  %v187_v9 = vld [vmem:[%s243_s1] sm:$0xff]  }
   0x4   :  { %160 = vmatprep.subr.bf16.mxu0 %v188_v0  ;;  %v15_v10 = vld [vmem:[%s244_s0] sm:$0xf] }
   0x5   :  { %v139_v11 = vld [vmem:[%s245_s2] ss:$0 sm:$0xff] }
   0x7   :  { %161 = vmatpush3.bf16.msra.mxu0 %v181_v3 }
   0x8   :  { %162 = vmatprep.subr.bf16.mxu0 %v188_v0 }
   0xb   :  { %163 = vmatpush3.bf16.msra.mxu0 %v182_v4 }
   0xc   :  { %164 = vmatprep.subr.bf16.mxu0 %v188_v0 }
   0xf   :  { %165 = vmatpush3.bf16.msra.mxu0 %v183_v5 }
  0x10   :  { %166 = vmatprep.subr.bf16.mxu0 %v188_v0 }
  0x13   :  { %167 = vmatpush3.bf16.msra.mxu0 %v184_v6 }
  0x14   :  { %168 = vmatprep.subr.bf16.mxu0 %v188_v0 }
  0x17   :  { %169 = vmatpush3.bf16.msra.mxu0 %v185_v7 }
  0x18   :  { %170 = vmatprep.subr.bf16.mxu0 %v188_v0 }
  0x1b   :  { %171 = vmatpush3.bf16.msra.mxu0 %v186_v8 }
  0x1c   :  { %172 = vmatprep.subr.bf16.mxu0 %v188_v0 }
  0x1f   :  { %173 = vmatpush3.bf16.msra.mxu0 %v187_v9 }
  0x22   :  { %175 = vmatmul.mubr.msk.bf16.vlgmr.msra.gmra.mxu0 %vm83_vm2, %v15_v10 }
  0xe2   :  { %v125_v12 = vpop.f32.mrf.mxu0 }
  0xe3   :  { %v126_v13 = vadd.f32 %v139_v11, %v125_v12 }
  0xe4   :  { %v176_v14 = vpop.f32.mrf.mxu0 }
  0xe5   :  { %v131_v15 = vmax.f32 %v126_v13, 0.0 }
  0xe6   :  { %v128_v16 = vpop.f32.mrf.mxu0 }
  0xe7   :  { %v132_v17 = vpack.c.bf16 %v131_v15, %v131_v15 }
  0xe8   :  { %v177_v18 = vpop.f32.mrf.mxu0 }
  0xe9   :  { %134 = vst.msk [vmem:[%s246_s3] sm:$0xf] %vm133_vm3, %v132_v17 }

// kernel: net_forward.13
= control target key start
LH: loop header
LB: loop body
LE: loop exit
PB: predicated region body
PF: predicated region fallthrough
CT: control target
= control target key end

     0   :  { %vm58_vm0 = vcmask 1045504   ;;  %v137_v0 = vmov 0.0   ;;  %vm138_vm1 = vmmov 0   ;;  %vm54_vm2 = vcmask 490496   ;;  %s180_s1 = inlined_call_operand.vmem [shape: bf16[60,2], index: 1, kind: input, shape index: {}]   ;;  %s181_s0 = inlined_call_operand.vmem [shape: bf16[8,60], index: 0, kind: input, shape index: {}]   ;;  %s182_s2 = inlined_call_operand.vmem [shape: f32[1,2], index: 2, kind: input, shape index: {}]   ;;  %s183_s3 = inlined_call_operand.vmem [shape: f32[8,2], index: 3, kind: output, shape index: {}]  }
   0x1   :  { %119 = vmatprep.subr.bf16.mxu0 %v137_v0  ;;  %v133_v1 = vld [vmem:[%s180_s1 + $0x18] sm:$0x3f]   ;;  %127 = vmatprep.mubr.msk.bf16.mxu0 %vm138_vm1, %v137_v0  ;;  %v134_v3 = vld [vmem:[%s180_s1 + $0x10] sm:$0xff]   ;;  %v135_v4 = vld [vmem:[%s180_s1 + $0x8] sm:$0xff]   ;;  %vm102_vm3 = vcmask 15360  }
   0x2   :  { %v60_v2 = vsel %vm58_vm0, %v133_v1, 0  ;;  %v136_v5 = vld [vmem:[%s180_s1] sm:$0xff]  }
   0x3   :  { %120 = vmatpush3.bf16.msra.mxu0 %v60_v2  ;;  %v15_v6 = vld [vmem:[%s181_s0] sm:$0xf] }
   0x4   :  { %121 = vmatprep.subr.bf16.mxu0 %v137_v0  ;;  %v108_v7 = vld [vmem:[%s182_s2] ss:$0 sm:$0xff] }
   0x7   :  { %122 = vmatpush3.bf16.msra.mxu0 %v134_v3 }
   0x8   :  { %123 = vmatprep.subr.bf16.mxu0 %v137_v0 }
   0xb   :  { %124 = vmatpush3.bf16.msra.mxu0 %v135_v4 }
   0xc   :  { %125 = vmatprep.subr.bf16.mxu0 %v137_v0 }
   0xf   :  { %126 = vmatpush3.bf16.msra.mxu0 %v136_v5 }
  0x12   :  { %128 = vmatmul.mubr.msk.bf16.vlgmr.msra.gmra.mxu0 %vm54_vm2, %v15_v6 }
  0xd2   :  { %v96_v8 = vpop.f32.mrf.mxu0 }
  0xd3   :  { %v97_v9 = vadd.f32 %v108_v7, %v96_v8 }
  0xd4   :  { %v129_v10 = vpop.f32.mrf.mxu0 }
  0xd5   :  { %103 = vst.msk [vmem:[%s183_s3] sm:$0xff] %vm102_vm3, %v97_v9 }
  0xd6   :  { %v99_v11 = vpop.f32.mrf.mxu0 }
  0xd8   :  { %v130_v12 = vpop.f32.mrf.mxu0 }

</bundles_post_ra>
